<compile_context>
chip_gen: v5e
topology: v5e:2x2
jax: 0.10.0
libtpu: 0.0.40
codegen_flags: <defaults>
</compile_context>

<pallas_src>
import functools

import jax
import jax.numpy as jnp
from jax.experimental import pallas as pl
from jax.experimental.pallas import tpu as pltpu

LANE = 128


def _round_up(x, m):
    return ((x + m - 1) // m) * m


def _cdiv(a, b):
    return -(-a // b)


# ----------------------------------------------------------------------------
# Kernel A (layer 1 only): tiled  Y = X @ W + b (+ LeakyReLU), f32 accumulator
# ----------------------------------------------------------------------------
def _matmul_bias_act_kernel(x_ref, w_ref, b_ref, o_ref, acc_ref, *, slope, act):
    k = pl.program_id(2)

    @pl.when(k == 0)
    def _():
        acc_ref[...] = jnp.zeros_like(acc_ref)

    acc_ref[...] += jnp.dot(x_ref[...], w_ref[...],
                            preferred_element_type=jnp.float32)

    @pl.when(k == pl.num_programs(2) - 1)
    def _():
        y = acc_ref[...] + b_ref[...]
        if act:
            y = jnp.where(y > 0, y, slope * y)
        o_ref[...] = y.astype(o_ref.dtype)


def matmul_bias_act(x, w, b, act, out_dtype, slope=0.01):
    """x: (M, K), w: (K, Np) bf16 with Np % 128 == 0, b: (1, Np) f32."""
    M, K = x.shape
    Kw, Np = w.shape
    assert K == Kw and Np % LANE == 0
    x = x.astype(w.dtype)                       # bf16 MXU inputs, f32 accumulation

    tm = min(1024, _round_up(M, 16))            # multiple of 16 (bf16 sublanes)
    if K <= 512:
        tk = K                                  # single K block (full dim)
    else:
        assert K % 256 == 0, "pad K to a multiple of 256 at prep time"
        tk = 512 if K % 512 == 0 else 256
    tn = 256 if Np % 256 == 0 else 128
    nm, nn, nk = _cdiv(M, tm), Np // tn, K // tk

    # Exact per-buffer VMEM estimate (double-buffered ins/outs + f32 acc).
    est = (2 * tm * tk * 2 + 2 * tk * tn * 2 + 2 * tn * 4
           + 2 * tm * tn * jnp.dtype(out_dtype).itemsize + tm * tn * 4)
    vmem_limit = int(min(48 * 1024 * 1024,
                         max(32 * 1024 * 1024, int(est * 1.5))))

    # TODO(synk): consider pipeline_mode=pl.Buffered(3) on the x spec for the
    # thin-K (K=48) first layer to hide its DMA latency a bit more.
    kernel = functools.partial(_matmul_bias_act_kernel, slope=slope, act=act)
    return pl.pallas_call(
        kernel,
        out_shape=jax.ShapeDtypeStruct((M, Np), out_dtype),
        grid=(nm, nn, nk),
        in_specs=[
            pl.BlockSpec((tm, tk), lambda i, j, k: (i, k)),
            pl.BlockSpec((tk, tn), lambda i, j, k: (k, j)),
            pl.BlockSpec((1, tn), lambda i, j, k: (0, j)),
        ],
        out_specs=pl.BlockSpec((tm, tn), lambda i, j, k: (i, j)),
        scratch_shapes=[pltpu.VMEM((tm, tn), jnp.float32)],
        compiler_params=pltpu.CompilerParams(
            dimension_semantics=("parallel", "parallel", "arbitrary"),
            vmem_limit_bytes=vmem_limit,
        ),
    )(x, w, b)


def _im2col(x_nhwc, kh, kw, stride, pad):
    if pad:
        x_nhwc = jnp.pad(x_nhwc, ((0, 0), (pad, pad), (pad, pad), (0, 0)))
    B, H, W, C = x_nhwc.shape
    ho = (H - kh) // stride + 1
    wo = (W - kw) // stride + 1
    cols = []
    for i in range(kh):
        for j in range(kw):
            cols.append(x_nhwc[:, i:i + stride * ho:stride,
                               j:j + stride * wo:stride, :])
    patches = jnp.stack(cols, axis=3)                     # (B, ho, wo, kh*kw, C)
    return patches.reshape(B * ho * wo, kh * kw * C), ho, wo


def conv2d_im2col(x_nhwc, layer, out_dtype):
    cols, ho, wo = _im2col(x_nhwc, layer["kh"], layer["kw"],
                           layer["stride"], layer["pad"])
    y = matmul_bias_act(cols, layer["w_mat"], layer["b_row"],
                        layer["act"], out_dtype)
    return y.reshape(x_nhwc.shape[0], ho, wo, layer["n_pad"])


# ----------------------------------------------------------------------------
# Kernel B (all other convs): fused patch extraction + matmul + bias + act
# ----------------------------------------------------------------------------
def _fused_conv_kernel(x_ref, w_ref, b_ref, o_ref, acc_ref, *,
                       kh, stride, nwin, ho, wo, act, slope):
    # x_ref : (bb, s, hp/s, wp/s, s*C)  stride-phase-split padded activation
    # w_ref : (kh, nwin*s*C, tn)        per-tap-row weight slabs
    # b_ref : (1, tn)
    # o_ref : (bb, ho*wo, tn)
    # acc   : (bb*ho*wo, tn) f32 scratch
    bb = o_ref.shape[0]
    m = bb * ho * wo
    for ki in range(kh):
        pi, si = ki % stride, ki // stride
        slab = x_ref[:, pi, si:si + ho, :, :]             # (bb, ho, wp/s, s*C)
        if nwin > 1:
            pieces = [slab[:, :, r:r + wo, :] for r in range(nwin)]
            lhs = jnp.concatenate(pieces, axis=-1)        # (bb, ho, wo, nwin*s*C)
        else:
            lhs = slab[:, :, 0:wo, :]
        lhs = lhs.reshape(m, -1)
        part = jnp.dot(lhs, w_ref[ki], preferred_element_type=jnp.float32)
        if ki == 0:
            acc_ref[...] = part
        else:
            acc_ref[...] += part
    y = acc_ref[...] + b_ref[...]
    if act:
        y = jnp.where(y > 0, y, slope * y)
    o_ref[...] = y.reshape(o_ref.shape).astype(o_ref.dtype)


def _choose_batch_block(batch, m_img, target_rows=512):
    bb = 1
    while bb * 2 <= batch and batch % (bb * 2) == 0 and bb * m_img < target_rows:
        bb *= 2
    return bb


def conv2d_fused(x_nhwc, layer, out_dtype):
    """x_nhwc holds the REAL (un-padded) input channels."""
    B, H, W, C = x_nhwc.shape
    kh, kw, s, p = layer["kh"], layer["kw"], layer["stride"], layer["pad"]
    assert C == layer["cin"]
    ho = (H + 2 * p - kh) // s + 1
    wo = (W + 2 * p - kw) // s + 1
    nwin = _cdiv(kw, s)

    # Spatial pad (+ extra so padded dims divide the stride and the windowed
    # reshape covers the last output column).  One cheap XLA copy, then a free
    # reshape folding s input columns into the lane dim, then the H-phase split.
    hp = _round_up(H + 2 * p, s)
    wp = max(_round_up(W + 2 * p, s), s * (wo - 1 + nwin))
    x_p = jnp.pad(x_nhwc.astype(jnp.bfloat16),
                  ((0, 0), (p, hp - H - p), (p, wp - W - p), (0, 0)))
    x_p = x_p.reshape(B, hp // s, s, wp // s, s * C)       # free (row-major) reshape
    x_ph = jnp.transpose(x_p, (0, 2, 1, 3, 4))             # (B, s, hp/s, wp/s, s*C)

    hps, wps, sC = hp // s, wp // s, s * C
    m_img = ho * wo
    n_pad = layer["n_pad"]
    tn = 256 if n_pad % 256 == 0 else 128
    nn = n_pad // tn
    k_i = layer["w_mat"].shape[1]
    assert k_i == nwin * sC
    out_isz = jnp.dtype(out_dtype).itemsize

    def _vmem_est(bb_):
        x_blk = bb_ * s * hps * _round_up(wps, 16) * _round_up(sC, LANE) * 2
        w_blk = kh * _round_up(k_i, 16) * tn * 2
        o_blk = bb_ * _round_up(m_img, 16) * tn * out_isz
        acc_b = _round_up(bb_ * m_img, 16) * tn * 4
        lhs_b = _round_up(bb_ * m_img, 16) * _round_up(k_i, LANE) * 2
        return 2 * (x_blk + w_blk + o_blk) + acc_b + 2 * lhs_b + (2 << 20)

    bb = _choose_batch_block(B, m_img)
    while bb > 1 and _vmem_est(bb) > 40 * 1024 * 1024:
        bb //= 2
    vmem_limit = int(min(48 * 1024 * 1024,
                         max(32 * 1024 * 1024, int(_vmem_est(bb) * 1.25))))

    kernel = functools.partial(_fused_conv_kernel, kh=kh, stride=s, nwin=nwin,
                               ho=ho, wo=wo, act=layer["act"], slope=0.01)

    # Grid: output-channel tile outermost, batch block innermost -> weights are
    # DMA'd from HBM exactly once; the (small) per-image activation is re-read
    # nn times.  Both axes are independent ("parallel") for megacore sharding.
    out = pl.pallas_call(
        kernel,
        out_shape=jax.ShapeDtypeStruct((B, m_img, n_pad), out_dtype),
        grid=(nn, B // bb),
        in_specs=[
            pl.BlockSpec((bb, s, hps, wps, sC), lambda j, b: (b, 0, 0, 0, 0)),
            pl.BlockSpec((kh, k_i, tn), lambda j, b: (0, 0, j)),
            pl.BlockSpec((1, tn), lambda j, b: (0, j)),
        ],
        out_specs=pl.BlockSpec((bb, m_img, tn), lambda j, b: (b, 0, j)),
        scratch_shapes=[pltpu.VMEM((bb * m_img, tn), jnp.float32)],
        compiler_params=pltpu.CompilerParams(
            dimension_semantics=("parallel", "parallel"),
            vmem_limit_bytes=vmem_limit,
        ),
    )(x_ph, layer["w_mat"], layer["b_row"])
    return out.reshape(B, ho, wo, n_pad)


def conv2d_any(x_nhwc, layer, out_dtype):
    if layer["kind"] == "im2col":
        return conv2d_im2col(x_nhwc, layer, out_dtype)
    return conv2d_fused(x_nhwc, layer, out_dtype)


# ----------------------------------------------------------------------------
# Parameter init (PyTorch layout) + one-time prep into kernel-ready layouts
# ----------------------------------------------------------------------------
def init_params(key, image_size, conv_dim, c_dim, repeat_num):
    keys = jax.random.split(key, repeat_num + 2)
    main = []
    cin, cout = 3, conv_dim
    for i in range(repeat_num):
        kw_, kb_ = jax.random.split(keys[i])
        w = jax.random.normal(kw_, (cout, cin, 4, 4), jnp.float32) * 0.05
        b = jax.random.normal(kb_, (cout,), jnp.float32) * 0.01
        main.append((w, b))
        cin, cout = cout, cout * 2
    final_dim = cin
    ks = image_size // 2 ** repeat_num
    out_src_w = jax.random.normal(keys[repeat_num], (1, final_dim, 3, 3),
                                  jnp.float32) * 0.05
    out_cls_w = jax.random.normal(keys[repeat_num + 1], (c_dim, final_dim, ks, ks),
                                  jnp.float32) * 0.05
    return {"main": main, "out_src_w": out_src_w, "out_cls_w": out_cls_w}


def _bias_row(b, cout, n_pad):
    if b is None:
        return jnp.zeros((1, n_pad), jnp.float32)
    return jnp.pad(b.astype(jnp.float32), (0, n_pad - cout)).reshape(1, n_pad)


def _prep_conv_im2col(w_oihw, b, stride, pad, act):
    cout, cin, kh, kw = w_oihw.shape
    n_pad = _round_up(cout, LANE)
    wt = jnp.transpose(w_oihw, (2, 3, 1, 0))                  # (kh, kw, cin, cout)
    wt = jnp.pad(wt, ((0, 0), (0, 0), (0, 0), (0, n_pad - cout)))
    w_mat = wt.reshape(kh * kw * cin, n_pad).astype(jnp.bfloat16)
    return dict(kind="im2col", w_mat=w_mat, b_row=_bias_row(b, cout, n_pad),
                kh=kh, kw=kw, stride=stride, pad=pad, act=act,
                cin=cin, cout=cout, n_pad=n_pad)


def _prep_conv_fused(w_oihw, b, stride, pad, act):
    cout, cin, kh, kw = w_oihw.shape
    n_pad = _round_up(cout, LANE)
    nwin = _cdiv(kw, stride)
    wt = jnp.transpose(w_oihw, (2, 3, 1, 0))                  # (kh, kw, cin, cout)
    # Pad kw up to nwin*stride (extra tap columns get zero weights) and Cout to 128.
    wt = jnp.pad(wt, ((0, 0), (0, nwin * stride - kw), (0, 0), (0, n_pad - cout)))
    w_mat = wt.reshape(kh, nwin * stride * cin, n_pad).astype(jnp.bfloat16)
    return dict(kind="fused", w_mat=w_mat, b_row=_bias_row(b, cout, n_pad),
                kh=kh, kw=kw, stride=stride, pad=pad, act=act,
                cin=cin, cout=cout, n_pad=n_pad)


def _prep_conv(w_oihw, b, stride, pad, act):
    cin = w_oihw.shape[1]
    if cin < 16:                       # first layer (RGB): im2col layout is better
        return _prep_conv_im2col(w_oihw, b, stride, pad, act)
    return _prep_conv_fused(w_oihw, b, stride, pad, act)


def prepare_params(params):
    main = [_prep_conv(w, b, stride=2, pad=1, act=True) for (w, b) in params["main"]]
    out_src = _prep_conv(params["out_src_w"], None, stride=1, pad=1, act=False)
    out_cls = _prep_conv(params["out_cls_w"], None, stride=1, pad=0, act=False)
    return {"main": main, "out_src": out_src, "out_cls": out_cls}


# ----------------------------------------------------------------------------
# Forward pass
# ----------------------------------------------------------------------------
def discriminator_forward(x_nchw, prepped):
    B = x_nchw.shape[0]
    h = jnp.transpose(x_nchw, (0, 2, 3, 1)).astype(jnp.bfloat16)    # NCHW -> NHWC
    for layer in prepped["main"]:
        h = conv2d_any(h, layer, out_dtype=jnp.bfloat16)
        h = h[..., :layer["cout"]]       # drop lane-padding channels before next conv
    src = conv2d_any(h, prepped["out_src"], out_dtype=jnp.float32)
    cls = conv2d_any(h, prepped["out_cls"], out_dtype=jnp.float32)
    out_src = jnp.transpose(src[..., :prepped["out_src"]["cout"]], (0, 3, 1, 2))
    assert cls.shape[1] == 1 and cls.shape[2] == 1, "cls head must be 1x1 spatial"
    out_cls = cls[:, 0, 0, :prepped["out_cls"]["cout"]]
    return out_src, out_cls


# ----------------------------------------------------------------------------
# Pure-JAX f32 reference (lax.conv) for correctness check
# ----------------------------------------------------------------------------
def _ref_conv(x, w, b, stride, pad):
    y = jax.lax.conv_general_dilated(
        x, w, (stride, stride), ((pad, pad), (pad, pad)),
        dimension_numbers=("NCHW", "OIHW", "NCHW"))
    if b is not None:
        y = y + b[None, :, None, None]
    return y


def discriminator_forward_ref(x_nchw, params):
    h = x_nchw
    for (w, b) in params["main"]:
        h = _ref_conv(h, w, b, 2, 1)
        h = jnp.where(h > 0, h, 0.01 * h)
    out_src = _ref_conv(h, params["out_src_w"], None, 1, 1)
    out_cls = _ref_conv(h, params["out_cls_w"], None, 1, 0)
    return out_src, out_cls.reshape(out_cls.shape[0], out_cls.shape[1])


if __name__ == "__main__":
    # Small, shape-consistent config (image_size / 2**repeat_num must be >= 1).
    IMAGE_SIZE, CONV_DIM, C_DIM, REPEAT_NUM, BATCH = 16, 32, 5, 2, 2

    key = jax.random.PRNGKey(0)
    k_params, k_x = jax.random.split(key)
    params = init_params(k_params, IMAGE_SIZE, CONV_DIM, C_DIM, REPEAT_NUM)
    prepped = prepare_params(params)
    x = jax.random.normal(k_x, (BATCH, 3, IMAGE_SIZE, IMAGE_SIZE), jnp.float32)

    fwd = jax.jit(lambda inp: discriminator_forward(inp, prepped))
    out_src, out_cls = fwd(x)
    out_src, out_cls = jax.block_until_ready((out_src, out_cls))

    ref_src, ref_cls = discriminator_forward_ref(x, params)

    assert out_src.shape == (BATCH, 1, IMAGE_SIZE // 2 ** REPEAT_NUM,
                             IMAGE_SIZE // 2 ** REPEAT_NUM)
    assert out_cls.shape == (BATCH, C_DIM)
    # bf16 MXU inputs with f32 accumulation -> loosened tolerance vs f32 reference.
    assert jnp.allclose(out_src, ref_src, rtol=5e-2, atol=5e-2)
    assert jnp.allclose(out_cls, ref_cls, rtol=5e-2, atol=5e-2)

    print("KERNEL_OK")
</pallas_src>

<mosaic_0001>
module attributes {stable_mosaic.version = 11 : i64} {
  func.func @_matmul_bias_act_kernel(%arg0: i32, %arg1: i32, %arg2: i32, %arg3: memref<128x48xbf16, #tpu.memory_space<vmem>>, %arg4: memref<48x128xbf16, #tpu.memory_space<vmem>>, %arg5: memref<1x128xf32, #tpu.memory_space<vmem>>, %arg6: memref<128x128xbf16, #tpu.memory_space<vmem>>, %arg7: memref<128x128xf32, #tpu.memory_space<vmem>>) attributes {dimension_semantics = [#tpu.dimension_semantics<parallel>, #tpu.dimension_semantics<parallel>, #tpu.dimension_semantics<arbitrary>], iteration_bounds = array<i64: 1, 1, 1>, scalar_prefetch = 0 : i64, scratch_operands = 1 : i64, tpu.core_type = #tpu.core_type<tc>, window_params = [{transform_indices = @transform_0, window_bounds = array<i64: 128, 48>}, {transform_indices = @transform_1, window_bounds = array<i64: 48, 128>}, {transform_indices = @transform_2, window_bounds = array<i64: 1, 128>}, {transform_indices = @transform_3, window_bounds = array<i64: 128, 128>}]} {
    %c0_i32 = arith.constant 0 : i32
    %0 = arith.cmpi eq, %arg2, %c0_i32 : i32
    %1 = arith.extui %0 : i1 to i32
    %c0_i32_0 = arith.constant 0 : i32
    %2 = arith.cmpi ne, %1, %c0_i32_0 : i32
    scf.if %2 {
      %cst_10 = arith.constant 0.000000e+00 : f32
      %12 = vector.broadcast %cst_10 : f32 to vector<128x128xf32>
      %c0_11 = arith.constant 0 : index
      %c0_12 = arith.constant 0 : index
      %13 = vector.load %arg7[%c0_11, %c0_12] : memref<128x128xf32, #tpu.memory_space<vmem>>, vector<128x128xf32>
      tpu.vector_store %arg7[%c0_11, %c0_12], %12 {strides = array<i32>} : memref<128x128xf32, #tpu.memory_space<vmem>>, vector<128x128xf32>,
    } else {
    }
    %c0 = arith.constant 0 : index
    %c0_1 = arith.constant 0 : index
    %3 = vector.load %arg7[%c0, %c0_1] : memref<128x128xf32, #tpu.memory_space<vmem>>, vector<128x128xf32>
    %c0_2 = arith.constant 0 : index
    %c0_3 = arith.constant 0 : index
    %4 = vector.load %arg3[%c0_2, %c0_3] : memref<128x48xbf16, #tpu.memory_space<vmem>>, vector<128x48xbf16>
    %c0_4 = arith.constant 0 : index
    %c0_5 = arith.constant 0 : index
    %5 = vector.load %arg4[%c0_4, %c0_5] : memref<48x128xbf16, #tpu.memory_space<vmem>>, vector<48x128xbf16>
    %cst = arith.constant dense<0.000000e+00> : vector<128x128xf32>
    %6 = tpu.matmul %4, %5, %cst {dimension_numbers = #tpu.dot_dimension_numbers<[1], [0], [0], [1], [0, 0, 1, 1], [], []>} : vector<128x48xbf16>, vector<48x128xbf16>, vector<128x128xf32> -> vector<128x128xf32>
    %7 = arith.addf %3, %6 : vector<128x128xf32>
    %c0_6 = arith.constant 0 : index
    %c0_7 = arith.constant 0 : index
    %8 = vector.load %arg7[%c0_6, %c0_7] : memref<128x128xf32, #tpu.memory_space<vmem>>, vector<128x128xf32>
    tpu.vector_store %arg7[%c0_6, %c0_7], %7 {strides = array<i32>} : memref<128x128xf32, #tpu.memory_space<vmem>>, vector<128x128xf32>,
    %c0_i32_8 = arith.constant 0 : i32
    %9 = arith.cmpi eq, %arg2, %c0_i32_8 : i32
    %10 = arith.extui %9 : i1 to i32
    %c0_i32_9 = arith.constant 0 : i32
    %11 = arith.cmpi ne, %10, %c0_i32_9 : i32
    scf.if %11 {
      %c0_10 = arith.constant 0 : index
      %c0_11 = arith.constant 0 : index
      %12 = vector.load %arg7[%c0_10, %c0_11] : memref<128x128xf32, #tpu.memory_space<vmem>>, vector<128x128xf32>
      %c0_12 = arith.constant 0 : index
      %c0_13 = arith.constant 0 : index
      %13 = vector.load %arg5[%c0_12, %c0_13] : memref<1x128xf32, #tpu.memory_space<vmem>>, vector<1x128xf32>
      %14 = vector.broadcast %13 : vector<1x128xf32> to vector<128x128xf32>
      %15 = arith.addf %12, %14 : vector<128x128xf32>
      %cst_14 = arith.constant 0.000000e+00 : f32
      %16 = vector.broadcast %cst_14 : f32 to vector<128x128xf32>
      %17 = arith.cmpf ogt, %15, %16 : vector<128x128xf32>
      %cst_15 = arith.constant 0.00999999977 : f32
      %18 = vector.broadcast %cst_15 : f32 to vector<128x128xf32>
      %19 = arith.mulf %18, %15 : vector<128x128xf32>
      %20 = arith.select %17, %15, %19 : vector<128x128xi1>, vector<128x128xf32>
      %21 = arith.truncf %20 : vector<128x128xf32> to vector<128x128xbf16>
      %c0_16 = arith.constant 0 : index
      %c0_17 = arith.constant 0 : index
      %22 = vector.load %arg6[%c0_16, %c0_17] : memref<128x128xbf16, #tpu.memory_space<vmem>>, vector<128x128xbf16>
      tpu.vector_store %arg6[%c0_16, %c0_17], %21 {strides = array<i32>} : memref<128x128xbf16, #tpu.memory_space<vmem>>, vector<128x128xbf16>,
    } else {
    }
    return
  }
  func.func @transform_0(%arg0: i32, %arg1: i32, %arg2: i32) -> (i32, i32) {
    %c0_i32 = arith.constant 0 : i32
    return %arg0, %arg2 : i32, i32
  }
  func.func @transform_1(%arg0: i32, %arg1: i32, %arg2: i32) -> (i32, i32) {
    %c0_i32 = arith.constant 0 : i32
    return %arg2, %arg1 : i32, i32
  }
  func.func @transform_2(%arg0: i32, %arg1: i32, %arg2: i32) -> (i32, i32) {
    %c0_i32 = arith.constant 0 : i32
    %c0_i32_0 = arith.constant 0 : i32
    return %c0_i32, %arg1 : i32, i32
  }
  func.func @transform_3(%arg0: i32, %arg1: i32, %arg2: i32) -> (i32, i32) {
    %c0_i32 = arith.constant 0 : i32
    return %arg0, %arg1 : i32, i32
  }
}

module attributes {stable_mosaic.version = 11 : i64} {
  func.func @_fused_conv_kernel(%arg0: i32, %arg1: i32, %arg2: memref<2x2x5x5x64xbf16, #tpu.memory_space<vmem>>, %arg3: memref<4x128x128xbf16, #tpu.memory_space<vmem>>, %arg4: memref<1x128xf32, #tpu.memory_space<vmem>>, %arg5: memref<2x16x128xbf16, #tpu.memory_space<vmem>>, %arg6: memref<32x128xf32, #tpu.memory_space<vmem>>) attributes {dimension_semantics = [#tpu.dimension_semantics<parallel>, #tpu.dimension_semantics<parallel>], iteration_bounds = array<i64: 1, 1>, scalar_prefetch = 0 : i64, scratch_operands = 1 : i64, tpu.core_type = #tpu.core_type<tc>, window_params = [{transform_indices = @transform_0, window_bounds = array<i64: 2, 2, 5, 5, 64>}, {transform_indices = @transform_1, window_bounds = array<i64: 4, 128, 128>}, {transform_indices = @transform_2, window_bounds = array<i64: 1, 128>}, {transform_indices = @transform_3, window_bounds = array<i64: 2, 16, 128>}]} {
    %c0 = arith.constant 0 : index
    %c0_0 = arith.constant 0 : index
    %c0_1 = arith.constant 0 : index
    %c0_2 = arith.constant 0 : index
    %c0_3 = arith.constant 0 : index
    %0 = vector.load %arg2[%c0, %c0_0, %c0_1, %c0_2, %c0_3] : memref<2x2x5x5x64xbf16, #tpu.memory_space<vmem>>, vector<2x1x4x5x64xbf16>
    %1 = vector.shape_cast %0 : vector<2x1x4x5x64xbf16> to vector<2x4x5x64xbf16>
    %2 = vector.extract_strided_slice %1 {offsets = [0, 0, 0, 0], sizes = [2, 4, 4, 64], strides = [1, 1, 1, 1]} : vector<2x4x5x64xbf16> to vector<2x4x4x64xbf16>
    %3 = vector.extract_strided_slice %1 {offsets = [0, 0, 1, 0], sizes = [2, 4, 4, 64], strides = [1, 1, 1, 1]} : vector<2x4x5x64xbf16> to vector<2x4x4x64xbf16>
    %4 = tpu.concatenate %2, %3 in 3 : vector<2x4x4x64xbf16>, vector<2x4x4x64xbf16> -> vector<2x4x4x128xbf16>
    %5 = vector.shape_cast %4 : vector<2x4x4x128xbf16> to vector<32x128xbf16>
    %c0_4 = arith.constant 0 : index
    %c0_5 = arith.constant 0 : index
    %c0_6 = arith.constant 0 : index
    %6 = vector.load %arg3[%c0_4, %c0_5, %c0_6] : memref<4x128x128xbf16, #tpu.memory_space<vmem>>, vector<1x128x128xbf16>
    %7 = vector.shape_cast %6 : vector<1x128x128xbf16> to vector<128x128xbf16>
    %cst = arith.constant dense<0.000000e+00> : vector<32x128xf32>
    %8 = tpu.matmul %5, %7, %cst {dimension_numbers = #tpu.dot_dimension_numbers<[1], [0], [0], [1], [0, 0, 1, 1], [], []>} : vector<32x128xbf16>, vector<128x128xbf16>, vector<32x128xf32> -> vector<32x128xf32>
    %c0_7 = arith.constant 0 : index
    %c0_8 = arith.constant 0 : index
    %9 = vector.load %arg6[%c0_7, %c0_8] : memref<32x128xf32, #tpu.memory_space<vmem>>, vector<32x128xf32>
    tpu.vector_store %arg6[%c0_7, %c0_8], %8 {strides = array<i32>} : memref<32x128xf32, #tpu.memory_space<vmem>>, vector<32x128xf32>,
    %c0_9 = arith.constant 0 : index
    %c1 = arith.constant 1 : index
    %c0_10 = arith.constant 0 : index
    %c0_11 = arith.constant 0 : index
    %c0_12 = arith.constant 0 : index
    %10 = vector.load %arg2[%c0_9, %c1, %c0_10, %c0_11, %c0_12] : memref<2x2x5x5x64xbf16, #tpu.memory_space<vmem>>, vector<2x1x4x5x64xbf16>
    %11 = vector.shape_cast %10 : vector<2x1x4x5x64xbf16> to vector<2x4x5x64xbf16>
    %12 = vector.extract_strided_slice %11 {offsets = [0, 0, 0, 0], sizes = [2, 4, 4, 64], strides = [1, 1, 1, 1]} : vector<2x4x5x64xbf16> to vector<2x4x4x64xbf16>
    %13 = vector.extract_strided_slice %11 {offsets = [0, 0, 1, 0], sizes = [2, 4, 4, 64], strides = [1, 1, 1, 1]} : vector<2x4x5x64xbf16> to vector<2x4x4x64xbf16>
    %14 = tpu.concatenate %12, %13 in 3 : vector<2x4x4x64xbf16>, vector<2x4x4x64xbf16> -> vector<2x4x4x128xbf16>
    %15 = vector.shape_cast %14 : vector<2x4x4x128xbf16> to vector<32x128xbf16>
    %c1_13 = arith.constant 1 : index
    %c0_14 = arith.constant 0 : index
    %c0_15 = arith.constant 0 : index
    %16 = vector.load %arg3[%c1_13, %c0_14, %c0_15] : memref<4x128x128xbf16, #tpu.memory_space<vmem>>, vector<1x128x128xbf16>
    %17 = vector.shape_cast %16 : vector<1x128x128xbf16> to vector<128x128xbf16>
    %cst_16 = arith.constant dense<0.000000e+00> : vector<32x128xf32>
    %18 = tpu.matmul %15, %17, %cst_16 {dimension_numbers = #tpu.dot_dimension_numbers<[1], [0], [0], [1], [0, 0, 1, 1], [], []>} : vector<32x128xbf16>, vector<128x128xbf16>, vector<32x128xf32> -> vector<32x128xf32>
    %c0_17 = arith.constant 0 : index
    %c0_18 = arith.constant 0 : index
    %19 = vector.load %arg6[%c0_17, %c0_18] : memref<32x128xf32, #tpu.memory_space<vmem>>, vector<32x128xf32>
    %20 = arith.addf %19, %18 : vector<32x128xf32>
    %c0_19 = arith.constant 0 : index
    %c0_20 = arith.constant 0 : index
    %21 = vector.load %arg6[%c0_19, %c0_20] : memref<32x128xf32, #tpu.memory_space<vmem>>, vector<32x128xf32>
    tpu.vector_store %arg6[%c0_19, %c0_20], %20 {strides = array<i32>} : memref<32x128xf32, #tpu.memory_space<vmem>>, vector<32x128xf32>,
    %c0_21 = arith.constant 0 : index
    %c0_22 = arith.constant 0 : index
    %c1_23 = arith.constant 1 : index
    %c0_24 = arith.constant 0 : index
    %c0_25 = arith.constant 0 : index
    %22 = vector.load %arg2[%c0_21, %c0_22, %c1_23, %c0_24, %c0_25] : memref<2x2x5x5x64xbf16, #tpu.memory_space<vmem>>, vector<2x1x4x5x64xbf16>
    %23 = vector.shape_cast %22 : vector<2x1x4x5x64xbf16> to vector<2x4x5x64xbf16>
    %24 = vector.extract_strided_slice %23 {offsets = [0, 0, 0, 0], sizes = [2, 4, 4, 64], strides = [1, 1, 1, 1]} : vector<2x4x5x64xbf16> to vector<2x4x4x64xbf16>
    %25 = vector.extract_strided_slice %23 {offsets = [0, 0, 1, 0], sizes = [2, 4, 4, 64], strides = [1, 1, 1, 1]} : vector<2x4x5x64xbf16> to vector<2x4x4x64xbf16>
    %26 = tpu.concatenate %24, %25 in 3 : vector<2x4x4x64xbf16>, vector<2x4x4x64xbf16> -> vector<2x4x4x128xbf16>
    %27 = vector.shape_cast %26 : vector<2x4x4x128xbf16> to vector<32x128xbf16>
    %c2 = arith.constant 2 : index
    %c0_26 = arith.constant 0 : index
    %c0_27 = arith.constant 0 : index
    %28 = vector.load %arg3[%c2, %c0_26, %c0_27] : memref<4x128x128xbf16, #tpu.memory_space<vmem>>, vector<1x128x128xbf16>
    %29 = vector.shape_cast %28 : vector<1x128x128xbf16> to vector<128x128xbf16>
    %cst_28 = arith.constant dense<0.000000e+00> : vector<32x128xf32>
    %30 = tpu.matmul %27, %29, %cst_28 {dimension_numbers = #tpu.dot_dimension_numbers<[1], [0], [0], [1], [0, 0, 1, 1], [], []>} : vector<32x128xbf16>, vector<128x128xbf16>, vector<32x128xf32> -> vector<32x128xf32>
    %c0_29 = arith.constant 0 : index
    %c0_30 = arith.constant 0 : index
    %31 = vector.load %arg6[%c0_29, %c0_30] : memref<32x128xf32, #tpu.memory_space<vmem>>, vector<32x128xf32>
    %32 = arith.addf %31, %30 : vector<32x128xf32>
    %c0_31 = arith.constant 0 : index
    %c0_32 = arith.constant 0 : index
    %33 = vector.load %arg6[%c0_31, %c0_32] : memref<32x128xf32, #tpu.memory_space<vmem>>, vector<32x128xf32>
    tpu.vector_store %arg6[%c0_31, %c0_32], %32 {strides = array<i32>} : memref<32x128xf32, #tpu.memory_space<vmem>>, vector<32x128xf32>,
    %c0_33 = arith.constant 0 : index
    %c1_34 = arith.constant 1 : index
    %c1_35 = arith.constant 1 : index
    %c0_36 = arith.constant 0 : index
    %c0_37 = arith.constant 0 : index
    %34 = vector.load %arg2[%c0_33, %c1_34, %c1_35, %c0_36, %c0_37] : memref<2x2x5x5x64xbf16, #tpu.memory_space<vmem>>, vector<2x1x4x5x64xbf16>
    %35 = vector.shape_cast %34 : vector<2x1x4x5x64xbf16> to vector<2x4x5x64xbf16>
    %36 = vector.extract_strided_slice %35 {offsets = [0, 0, 0, 0], sizes = [2, 4, 4, 64], strides = [1, 1, 1, 1]} : vector<2x4x5x64xbf16> to vector<2x4x4x64xbf16>
    %37 = vector.extract_strided_slice %35 {offsets = [0, 0, 1, 0], sizes = [2, 4, 4, 64], strides = [1, 1, 1, 1]} : vector<2x4x5x64xbf16> to vector<2x4x4x64xbf16>
    %38 = tpu.concatenate %36, %37 in 3 : vector<2x4x4x64xbf16>, vector<2x4x4x64xbf16> -> vector<2x4x4x128xbf16>
    %39 = vector.shape_cast %38 : vector<2x4x4x128xbf16> to vector<32x128xbf16>
    %c3 = arith.constant 3 : index
    %c0_38 = arith.constant 0 : index
    %c0_39 = arith.constant 0 : index
    %40 = vector.load %arg3[%c3, %c0_38, %c0_39] : memref<4x128x128xbf16, #tpu.memory_space<vmem>>, vector<1x128x128xbf16>
    %41 = vector.shape_cast %40 : vector<1x128x128xbf16> to vector<128x128xbf16>
    %cst_40 = arith.constant dense<0.000000e+00> : vector<32x128xf32>
    %42 = tpu.matmul %39, %41, %cst_40 {dimension_numbers = #tpu.dot_dimension_numbers<[1], [0], [0], [1], [0, 0, 1, 1], [], []>} : vector<32x128xbf16>, vector<128x128xbf16>, vector<32x128xf32> -> vector<32x128xf32>
    %c0_41 = arith.constant 0 : index
    %c0_42 = arith.constant 0 : index
    %43 = vector.load %arg6[%c0_41, %c0_42] : memref<32x128xf32, #tpu.memory_space<vmem>>, vector<32x128xf32>
    %44 = arith.addf %43, %42 : vector<32x128xf32>
    %c0_43 = arith.constant 0 : index
    %c0_44 = arith.constant 0 : index
    %45 = vector.load %arg6[%c0_43, %c0_44] : memref<32x128xf32, #tpu.memory_space<vmem>>, vector<32x128xf32>
    tpu.vector_store %arg6[%c0_43, %c0_44], %44 {strides = array<i32>} : memref<32x128xf32, #tpu.memory_space<vmem>>, vector<32x128xf32>,
    %c0_45 = arith.constant 0 : index
    %c0_46 = arith.constant 0 : index
    %46 = vector.load %arg6[%c0_45, %c0_46] : memref<32x128xf32, #tpu.memory_space<vmem>>, vector<32x128xf32>
    %c0_47 = arith.constant 0 : index
    %c0_48 = arith.constant 0 : index
    %47 = vector.load %arg4[%c0_47, %c0_48] : memref<1x128xf32, #tpu.memory_space<vmem>>, vector<1x128xf32>
    %48 = vector.broadcast %47 : vector<1x128xf32> to vector<32x128xf32>
    %49 = arith.addf %46, %48 : vector<32x128xf32>
    %cst_49 = arith.constant 0.000000e+00 : f32
    %50 = vector.broadcast %cst_49 : f32 to vector<32x128xf32>
    %51 = arith.cmpf ogt, %49, %50 : vector<32x128xf32>
    %cst_50 = arith.constant 0.00999999977 : f32
    %52 = vector.broadcast %cst_50 : f32 to vector<32x128xf32>
    %53 = arith.mulf %52, %49 : vector<32x128xf32>
    %54 = arith.select %51, %49, %53 : vector<32x128xi1>, vector<32x128xf32>
    %55 = vector.shape_cast %54 : vector<32x128xf32> to vector<2x16x128xf32>
    %56 = arith.truncf %55 : vector<2x16x128xf32> to vector<2x16x128xbf16>
    %c0_51 = arith.constant 0 : index
    %c0_52 = arith.constant 0 : index
    %c0_53 = arith.constant 0 : index
    %57 = vector.load %arg5[%c0_51, %c0_52, %c0_53] : memref<2x16x128xbf16, #tpu.memory_space<vmem>>, vector<2x16x128xbf16>
    tpu.vector_store %arg5[%c0_51, %c0_52, %c0_53], %56 {strides = array<i32>} : memref<2x16x128xbf16, #tpu.memory_space<vmem>>, vector<2x16x128xbf16>,
    return
  }
  func.func @transform_0(%arg0: i32, %arg1: i32) -> (i32, i32, i32, i32, i32) {
    %c0_i32 = arith.constant 0 : i32
    %c0_i32_0 = arith.constant 0 : i32
    %c0_i32_1 = arith.constant 0 : i32
    %c0_i32_2 = arith.constant 0 : i32
    %c0_i32_3 = arith.constant 0 : i32
    return %arg1, %c0_i32, %c0_i32_0, %c0_i32_1, %c0_i32_2 : i32, i32, i32, i32, i32
  }
  func.func @transform_1(%arg0: i32, %arg1: i32) -> (i32, i32, i32) {
    %c0_i32 = arith.constant 0 : i32
    %c0_i32_0 = arith.constant 0 : i32
    %c0_i32_1 = arith.constant 0 : i32
    return %c0_i32, %c0_i32_0, %arg0 : i32, i32, i32
  }
  func.func @transform_2(%arg0: i32, %arg1: i32) -> (i32, i32) {
    %c0_i32 = arith.constant 0 : i32
    %c0_i32_0 = arith.constant 0 : i32
    return %c0_i32, %arg0 : i32, i32
  }
  func.func @transform_3(%arg0: i32, %arg1: i32) -> (i32, i32, i32) {
    %c0_i32 = arith.constant 0 : i32
    %c0_i32_0 = arith.constant 0 : i32
    return %arg1, %c0_i32, %arg0 : i32, i32, i32
  }
}

module attributes {stable_mosaic.version = 11 : i64} {
  func.func @_fused_conv_kernel(%arg0: i32, %arg1: i32, %arg2: memref<2x1x6x6x64xbf16, #tpu.memory_space<vmem>>, %arg3: memref<3x192x128xbf16, #tpu.memory_space<vmem>>, %arg4: memref<1x128xf32, #tpu.memory_space<vmem>>, %arg5: memref<2x16x128xf32, #tpu.memory_space<vmem>>, %arg6: memref<32x128xf32, #tpu.memory_space<vmem>>) attributes {dimension_semantics = [#tpu.dimension_semantics<parallel>, #tpu.dimension_semantics<parallel>], iteration_bounds = array<i64: 1, 1>, scalar_prefetch = 0 : i64, scratch_operands = 1 : i64, tpu.core_type = #tpu.core_type<tc>, window_params = [{transform_indices = @transform_0, window_bounds = array<i64: 2, 1, 6, 6, 64>}, {transform_indices = @transform_1, window_bounds = array<i64: 3, 192, 128>}, {transform_indices = @transform_2, window_bounds = array<i64: 1, 128>}, {transform_indices = @transform_3, window_bounds = array<i64: 2, 16, 128>}]} {
    %c0 = arith.constant 0 : index
    %c0_0 = arith.constant 0 : index
    %c0_1 = arith.constant 0 : index
    %c0_2 = arith.constant 0 : index
    %c0_3 = arith.constant 0 : index
    %0 = vector.load %arg2[%c0, %c0_0, %c0_1, %c0_2, %c0_3] : memref<2x1x6x6x64xbf16, #tpu.memory_space<vmem>>, vector<2x1x4x6x64xbf16>
    %1 = vector.shape_cast %0 : vector<2x1x4x6x64xbf16> to vector<2x4x6x64xbf16>
    %2 = vector.extract_strided_slice %1 {offsets = [0, 0, 0, 0], sizes = [2, 4, 4, 64], strides = [1, 1, 1, 1]} : vector<2x4x6x64xbf16> to vector<2x4x4x64xbf16>
    %3 = vector.extract_strided_slice %1 {offsets = [0, 0, 1, 0], sizes = [2, 4, 4, 64], strides = [1, 1, 1, 1]} : vector<2x4x6x64xbf16> to vector<2x4x4x64xbf16>
    %4 = vector.extract_strided_slice %1 {offsets = [0, 0, 2, 0], sizes = [2, 4, 4, 64], strides = [1, 1, 1, 1]} : vector<2x4x6x64xbf16> to vector<2x4x4x64xbf16>
    %5 = tpu.concatenate %2, %3, %4 in 3 : vector<2x4x4x64xbf16>, vector<2x4x4x64xbf16>, vector<2x4x4x64xbf16> -> vector<2x4x4x192xbf16>
    %6 = vector.shape_cast %5 : vector<2x4x4x192xbf16> to vector<32x192xbf16>
    %c0_4 = arith.constant 0 : index
    %c0_5 = arith.constant 0 : index
    %c0_6 = arith.constant 0 : index
    %7 = vector.load %arg3[%c0_4, %c0_5, %c0_6] : memref<3x192x128xbf16, #tpu.memory_space<vmem>>, vector<1x192x128xbf16>
    %8 = vector.shape_cast %7 : vector<1x192x128xbf16> to vector<192x128xbf16>
    %cst = arith.constant dense<0.000000e+00> : vector<32x128xf32>
    %9 = tpu.matmul %6, %8, %cst {dimension_numbers = #tpu.dot_dimension_numbers<[1], [0], [0], [1], [0, 0, 1, 1], [], []>} : vector<32x192xbf16>, vector<192x128xbf16>, vector<32x128xf32> -> vector<32x128xf32>
    %c0_7 = arith.constant 0 : index
    %c0_8 = arith.constant 0 : index
    %10 = vector.load %arg6[%c0_7, %c0_8] : memref<32x128xf32, #tpu.memory_space<vmem>>, vector<32x128xf32>
    tpu.vector_store %arg6[%c0_7, %c0_8], %9 {strides = array<i32>} : memref<32x128xf32, #tpu.memory_space<vmem>>, vector<32x128xf32>,
    %c0_9 = arith.constant 0 : index
    %c0_10 = arith.constant 0 : index
    %c1 = arith.constant 1 : index
    %c0_11 = arith.constant 0 : index
    %c0_12 = arith.constant 0 : index
    %11 = vector.load %arg2[%c0_9, %c0_10, %c1, %c0_11, %c0_12] : memref<2x1x6x6x64xbf16, #tpu.memory_space<vmem>>, vector<2x1x4x6x64xbf16>
    %12 = vector.shape_cast %11 : vector<2x1x4x6x64xbf16> to vector<2x4x6x64xbf16>
    %13 = vector.extract_strided_slice %12 {offsets = [0, 0, 0, 0], sizes = [2, 4, 4, 64], strides = [1, 1, 1, 1]} : vector<2x4x6x64xbf16> to vector<2x4x4x64xbf16>
    %14 = vector.extract_strided_slice %12 {offsets = [0, 0, 1, 0], sizes = [2, 4, 4, 64], strides = [1, 1, 1, 1]} : vector<2x4x6x64xbf16> to vector<2x4x4x64xbf16>
    %15 = vector.extract_strided_slice %12 {offsets = [0, 0, 2, 0], sizes = [2, 4, 4, 64], strides = [1, 1, 1, 1]} : vector<2x4x6x64xbf16> to vector<2x4x4x64xbf16>
    %16 = tpu.concatenate %13, %14, %15 in 3 : vector<2x4x4x64xbf16>, vector<2x4x4x64xbf16>, vector<2x4x4x64xbf16> -> vector<2x4x4x192xbf16>
    %17 = vector.shape_cast %16 : vector<2x4x4x192xbf16> to vector<32x192xbf16>
    %c1_13 = arith.constant 1 : index
    %c0_14 = arith.constant 0 : index
    %c0_15 = arith.constant 0 : index
    %18 = vector.load %arg3[%c1_13, %c0_14, %c0_15] : memref<3x192x128xbf16, #tpu.memory_space<vmem>>, vector<1x192x128xbf16>
    %19 = vector.shape_cast %18 : vector<1x192x128xbf16> to vector<192x128xbf16>
    %cst_16 = arith.constant dense<0.000000e+00> : vector<32x128xf32>
    %20 = tpu.matmul %17, %19, %cst_16 {dimension_numbers = #tpu.dot_dimension_numbers<[1], [0], [0], [1], [0, 0, 1, 1], [], []>} : vector<32x192xbf16>, vector<192x128xbf16>, vector<32x128xf32> -> vector<32x128xf32>
    %c0_17 = arith.constant 0 : index
    %c0_18 = arith.constant 0 : index
    %21 = vector.load %arg6[%c0_17, %c0_18] : memref<32x128xf32, #tpu.memory_space<vmem>>, vector<32x128xf32>
    %22 = arith.addf %21, %20 : vector<32x128xf32>
    %c0_19 = arith.constant 0 : index
    %c0_20 = arith.constant 0 : index
    %23 = vector.load %arg6[%c0_19, %c0_20] : memref<32x128xf32, #tpu.memory_space<vmem>>, vector<32x128xf32>
    tpu.vector_store %arg6[%c0_19, %c0_20], %22 {strides = array<i32>} : memref<32x128xf32, #tpu.memory_space<vmem>>, vector<32x128xf32>,
    %c0_21 = arith.constant 0 : index
    %c0_22 = arith.constant 0 : index
    %c2 = arith.constant 2 : index
    %c0_23 = arith.constant 0 : index
    %c0_24 = arith.constant 0 : index
    %24 = vector.load %arg2[%c0_21, %c0_22, %c2, %c0_23, %c0_24] : memref<2x1x6x6x64xbf16, #tpu.memory_space<vmem>>, vector<2x1x4x6x64xbf16>
    %25 = vector.shape_cast %24 : vector<2x1x4x6x64xbf16> to vector<2x4x6x64xbf16>
    %26 = vector.extract_strided_slice %25 {offsets = [0, 0, 0, 0], sizes = [2, 4, 4, 64], strides = [1, 1, 1, 1]} : vector<2x4x6x64xbf16> to vector<2x4x4x64xbf16>
    %27 = vector.extract_strided_slice %25 {offsets = [0, 0, 1, 0], sizes = [2, 4, 4, 64], strides = [1, 1, 1, 1]} : vector<2x4x6x64xbf16> to vector<2x4x4x64xbf16>
    %28 = vector.extract_strided_slice %25 {offsets = [0, 0, 2, 0], sizes = [2, 4, 4, 64], strides = [1, 1, 1, 1]} : vector<2x4x6x64xbf16> to vector<2x4x4x64xbf16>
    %29 = tpu.concatenate %26, %27, %28 in 3 : vector<2x4x4x64xbf16>, vector<2x4x4x64xbf16>, vector<2x4x4x64xbf16> -> vector<2x4x4x192xbf16>
    %30 = vector.shape_cast %29 : vector<2x4x4x192xbf16> to vector<32x192xbf16>
    %c2_25 = arith.constant 2 : index
    %c0_26 = arith.constant 0 : index
    %c0_27 = arith.constant 0 : index
    %31 = vector.load %arg3[%c2_25, %c0_26, %c0_27] : memref<3x192x128xbf16, #tpu.memory_space<vmem>>, vector<1x192x128xbf16>
    %32 = vector.shape_cast %31 : vector<1x192x128xbf16> to vector<192x128xbf16>
    %cst_28 = arith.constant dense<0.000000e+00> : vector<32x128xf32>
    %33 = tpu.matmul %30, %32, %cst_28 {dimension_numbers = #tpu.dot_dimension_numbers<[1], [0], [0], [1], [0, 0, 1, 1], [], []>} : vector<32x192xbf16>, vector<192x128xbf16>, vector<32x128xf32> -> vector<32x128xf32>
    %c0_29 = arith.constant 0 : index
    %c0_30 = arith.constant 0 : index
    %34 = vector.load %arg6[%c0_29, %c0_30] : memref<32x128xf32, #tpu.memory_space<vmem>>, vector<32x128xf32>
    %35 = arith.addf %34, %33 : vector<32x128xf32>
    %c0_31 = arith.constant 0 : index
    %c0_32 = arith.constant 0 : index
    %36 = vector.load %arg6[%c0_31, %c0_32] : memref<32x128xf32, #tpu.memory_space<vmem>>, vector<32x128xf32>
    tpu.vector_store %arg6[%c0_31, %c0_32], %35 {strides = array<i32>} : memref<32x128xf32, #tpu.memory_space<vmem>>, vector<32x128xf32>,
    %c0_33 = arith.constant 0 : index
    %c0_34 = arith.constant 0 : index
    %37 = vector.load %arg6[%c0_33, %c0_34] : memref<32x128xf32, #tpu.memory_space<vmem>>, vector<32x128xf32>
    %c0_35 = arith.constant 0 : index
    %c0_36 = arith.constant 0 : index
    %38 = vector.load %arg4[%c0_35, %c0_36] : memref<1x128xf32, #tpu.memory_space<vmem>>, vector<1x128xf32>
    %39 = vector.broadcast %38 : vector<1x128xf32> to vector<32x128xf32>
    %40 = arith.addf %37, %39 : vector<32x128xf32>
    %41 = vector.shape_cast %40 : vector<32x128xf32> to vector<2x16x128xf32>
    %c0_37 = arith.constant 0 : index
    %c0_38 = arith.constant 0 : index
    %c0_39 = arith.constant 0 : index
    %42 = vector.load %arg5[%c0_37, %c0_38, %c0_39] : memref<2x16x128xf32, #tpu.memory_space<vmem>>, vector<2x16x128xf32>
    tpu.vector_store %arg5[%c0_37, %c0_38, %c0_39], %41 {strides = array<i32>} : memref<2x16x128xf32, #tpu.memory_space<vmem>>, vector<2x16x128xf32>,
    return
  }
  func.func @transform_0(%arg0: i32, %arg1: i32) -> (i32, i32, i32, i32, i32) {
    %c0_i32 = arith.constant 0 : i32
    %c0_i32_0 = arith.constant 0 : i32
    %c0_i32_1 = arith.constant 0 : i32
    %c0_i32_2 = arith.constant 0 : i32
    %c0_i32_3 = arith.constant 0 : i32
    return %arg1, %c0_i32, %c0_i32_0, %c0_i32_1, %c0_i32_2 : i32, i32, i32, i32, i32
  }
  func.func @transform_1(%arg0: i32, %arg1: i32) -> (i32, i32, i32) {
    %c0_i32 = arith.constant 0 : i32
    %c0_i32_0 = arith.constant 0 : i32
    %c0_i32_1 = arith.constant 0 : i32
    return %c0_i32, %c0_i32_0, %arg0 : i32, i32, i32
  }
  func.func @transform_2(%arg0: i32, %arg1: i32) -> (i32, i32) {
    %c0_i32 = arith.constant 0 : i32
    %c0_i32_0 = arith.constant 0 : i32
    return %c0_i32, %arg0 : i32, i32
  }
  func.func @transform_3(%arg0: i32, %arg1: i32) -> (i32, i32, i32) {
    %c0_i32 = arith.constant 0 : i32
    %c0_i32_0 = arith.constant 0 : i32
    return %arg1, %c0_i32, %arg0 : i32, i32, i32
  }
}

module attributes {stable_mosaic.version = 11 : i64} {
  func.func @_fused_conv_kernel(%arg0: i32, %arg1: i32, %arg2: memref<2x1x4x4x64xbf16, #tpu.memory_space<vmem>>, %arg3: memref<4x256x128xbf16, #tpu.memory_space<vmem>>, %arg4: memref<1x128xf32, #tpu.memory_space<vmem>>, %arg5: memref<2x1x128xf32, #tpu.memory_space<vmem>>, %arg6: memref<2x128xf32, #tpu.memory_space<vmem>>) attributes {dimension_semantics = [#tpu.dimension_semantics<parallel>, #tpu.dimension_semantics<parallel>], iteration_bounds = array<i64: 1, 1>, scalar_prefetch = 0 : i64, scratch_operands = 1 : i64, tpu.core_type = #tpu.core_type<tc>, window_params = [{transform_indices = @transform_0, window_bounds = array<i64: 2, 1, 4, 4, 64>}, {transform_indices = @transform_1, window_bounds = array<i64: 4, 256, 128>}, {transform_indices = @transform_2, window_bounds = array<i64: 1, 128>}, {transform_indices = @transform_3, window_bounds = array<i64: 2, 1, 128>}]} {
    %c0 = arith.constant 0 : index
    %c0_0 = arith.constant 0 : index
    %c0_1 = arith.constant 0 : index
    %c0_2 = arith.constant 0 : index
    %c0_3 = arith.constant 0 : index
    %0 = vector.load %arg2[%c0, %c0_0, %c0_1, %c0_2, %c0_3] : memref<2x1x4x4x64xbf16, #tpu.memory_space<vmem>>, vector<2x1x1x4x64xbf16>
    %1 = vector.shape_cast %0 : vector<2x1x1x4x64xbf16> to vector<2x1x4x64xbf16>
    %2 = vector.extract_strided_slice %1 {offsets = [0, 0, 0, 0], sizes = [2, 1, 1, 64], strides = [1, 1, 1, 1]} : vector<2x1x4x64xbf16> to vector<2x1x1x64xbf16>
    %3 = vector.extract_strided_slice %1 {offsets = [0, 0, 1, 0], sizes = [2, 1, 1, 64], strides = [1, 1, 1, 1]} : vector<2x1x4x64xbf16> to vector<2x1x1x64xbf16>
    %4 = vector.extract_strided_slice %1 {offsets = [0, 0, 2, 0], sizes = [2, 1, 1, 64], strides = [1, 1, 1, 1]} : vector<2x1x4x64xbf16> to vector<2x1x1x64xbf16>
    %5 = vector.extract_strided_slice %1 {offsets = [0, 0, 3, 0], sizes = [2, 1, 1, 64], strides = [1, 1, 1, 1]} : vector<2x1x4x64xbf16> to vector<2x1x1x64xbf16>
    %6 = tpu.concatenate %2, %3, %4, %5 in 3 : vector<2x1x1x64xbf16>, vector<2x1x1x64xbf16>, vector<2x1x1x64xbf16>, vector<2x1x1x64xbf16> -> vector<2x1x1x256xbf16>
    %7 = vector.shape_cast %6 : vector<2x1x1x256xbf16> to vector<2x256xbf16>
    %c0_4 = arith.constant 0 : index
    %c0_5 = arith.constant 0 : index
    %c0_6 = arith.constant 0 : index
    %8 = vector.load %arg3[%c0_4, %c0_5, %c0_6] : memref<4x256x128xbf16, #tpu.memory_space<vmem>>, vector<1x256x128xbf16>
    %9 = vector.shape_cast %8 : vector<1x256x128xbf16> to vector<256x128xbf16>
    %cst = arith.constant dense<0.000000e+00> : vector<2x128xf32>
    %10 = tpu.matmul %7, %9, %cst {dimension_numbers = #tpu.dot_dimension_numbers<[1], [0], [0], [1], [0, 0, 1, 1], [], []>} : vector<2x256xbf16>, vector<256x128xbf16>, vector<2x128xf32> -> vector<2x128xf32>
    %c0_7 = arith.constant 0 : index
    %c0_8 = arith.constant 0 : index
    %11 = vector.load %arg6[%c0_7, %c0_8] : memref<2x128xf32, #tpu.memory_space<vmem>>, vector<2x128xf32>
    tpu.vector_store %arg6[%c0_7, %c0_8], %10 {strides = array<i32>} : memref<2x128xf32, #tpu.memory_space<vmem>>, vector<2x128xf32>,
    %c0_9 = arith.constant 0 : index
    %c0_10 = arith.constant 0 : index
    %c1 = arith.constant 1 : index
    %c0_11 = arith.constant 0 : index
    %c0_12 = arith.constant 0 : index
    %12 = vector.load %arg2[%c0_9, %c0_10, %c1, %c0_11, %c0_12] : memref<2x1x4x4x64xbf16, #tpu.memory_space<vmem>>, vector<2x1x1x4x64xbf16>
    %13 = vector.shape_cast %12 : vector<2x1x1x4x64xbf16> to vector<2x1x4x64xbf16>
    %14 = vector.extract_strided_slice %13 {offsets = [0, 0, 0, 0], sizes = [2, 1, 1, 64], strides = [1, 1, 1, 1]} : vector<2x1x4x64xbf16> to vector<2x1x1x64xbf16>
    %15 = vector.extract_strided_slice %13 {offsets = [0, 0, 1, 0], sizes = [2, 1, 1, 64], strides = [1, 1, 1, 1]} : vector<2x1x4x64xbf16> to vector<2x1x1x64xbf16>
    %16 = vector.extract_strided_slice %13 {offsets = [0, 0, 2, 0], sizes = [2, 1, 1, 64], strides = [1, 1, 1, 1]} : vector<2x1x4x64xbf16> to vector<2x1x1x64xbf16>
    %17 = vector.extract_strided_slice %13 {offsets = [0, 0, 3, 0], sizes = [2, 1, 1, 64], strides = [1, 1, 1, 1]} : vector<2x1x4x64xbf16> to vector<2x1x1x64xbf16>
    %18 = tpu.concatenate %14, %15, %16, %17 in 3 : vector<2x1x1x64xbf16>, vector<2x1x1x64xbf16>, vector<2x1x1x64xbf16>, vector<2x1x1x64xbf16> -> vector<2x1x1x256xbf16>
    %19 = vector.shape_cast %18 : vector<2x1x1x256xbf16> to vector<2x256xbf16>
    %c1_13 = arith.constant 1 : index
    %c0_14 = arith.constant 0 : index
    %c0_15 = arith.constant 0 : index
    %20 = vector.load %arg3[%c1_13, %c0_14, %c0_15] : memref<4x256x128xbf16, #tpu.memory_space<vmem>>, vector<1x256x128xbf16>
    %21 = vector.shape_cast %20 : vector<1x256x128xbf16> to vector<256x128xbf16>
    %cst_16 = arith.constant dense<0.000000e+00> : vector<2x128xf32>
    %22 = tpu.matmul %19, %21, %cst_16 {dimension_numbers = #tpu.dot_dimension_numbers<[1], [0], [0], [1], [0, 0, 1, 1], [], []>} : vector<2x256xbf16>, vector<256x128xbf16>, vector<2x128xf32> -> vector<2x128xf32>
    %c0_17 = arith.constant 0 : index
    %c0_18 = arith.constant 0 : index
    %23 = vector.load %arg6[%c0_17, %c0_18] : memref<2x128xf32, #tpu.memory_space<vmem>>, vector<2x128xf32>
    %24 = arith.addf %23, %22 : vector<2x128xf32>
    %c0_19 = arith.constant 0 : index
    %c0_20 = arith.constant 0 : index
    %25 = vector.load %arg6[%c0_19, %c0_20] : memref<2x128xf32, #tpu.memory_space<vmem>>, vector<2x128xf32>
    tpu.vector_store %arg6[%c0_19, %c0_20], %24 {strides = array<i32>} : memref<2x128xf32, #tpu.memory_space<vmem>>, vector<2x128xf32>,
    %c0_21 = arith.constant 0 : index
    %c0_22 = arith.constant 0 : index
    %c2 = arith.constant 2 : index
    %c0_23 = arith.constant 0 : index
    %c0_24 = arith.constant 0 : index
    %26 = vector.load %arg2[%c0_21, %c0_22, %c2, %c0_23, %c0_24] : memref<2x1x4x4x64xbf16, #tpu.memory_space<vmem>>, vector<2x1x1x4x64xbf16>
    %27 = vector.shape_cast %26 : vector<2x1x1x4x64xbf16> to vector<2x1x4x64xbf16>
    %28 = vector.extract_strided_slice %27 {offsets = [0, 0, 0, 0], sizes = [2, 1, 1, 64], strides = [1, 1, 1, 1]} : vector<2x1x4x64xbf16> to vector<2x1x1x64xbf16>
    %29 = vector.extract_strided_slice %27 {offsets = [0, 0, 1, 0], sizes = [2, 1, 1, 64], strides = [1, 1, 1, 1]} : vector<2x1x4x64xbf16> to vector<2x1x1x64xbf16>
    %30 = vector.extract_strided_slice %27 {offsets = [0, 0, 2, 0], sizes = [2, 1, 1, 64], strides = [1, 1, 1, 1]} : vector<2x1x4x64xbf16> to vector<2x1x1x64xbf16>
    %31 = vector.extract_strided_slice %27 {offsets = [0, 0, 3, 0], sizes = [2, 1, 1, 64], strides = [1, 1, 1, 1]} : vector<2x1x4x64xbf16> to vector<2x1x1x64xbf16>
    %32 = tpu.concatenate %28, %29, %30, %31 in 3 : vector<2x1x1x64xbf16>, vector<2x1x1x64xbf16>, vector<2x1x1x64xbf16>, vector<2x1x1x64xbf16> -> vector<2x1x1x256xbf16>
    %33 = vector.shape_cast %32 : vector<2x1x1x256xbf16> to vector<2x256xbf16>
    %c2_25 = arith.constant 2 : index
    %c0_26 = arith.constant 0 : index
    %c0_27 = arith.constant 0 : index
    %34 = vector.load %arg3[%c2_25, %c0_26, %c0_27] : memref<4x256x128xbf16, #tpu.memory_space<vmem>>, vector<1x256x128xbf16>
    %35 = vector.shape_cast %34 : vector<1x256x128xbf16> to vector<256x128xbf16>
    %cst_28 = arith.constant dense<0.000000e+00> : vector<2x128xf32>
    %36 = tpu.matmul %33, %35, %cst_28 {dimension_numbers = #tpu.dot_dimension_numbers<[1], [0], [0], [1], [0, 0, 1, 1], [], []>} : vector<2x256xbf16>, vector<256x128xbf16>, vector<2x128xf32> -> vector<2x128xf32>
    %c0_29 = arith.constant 0 : index
    %c0_30 = arith.constant 0 : index
    %37 = vector.load %arg6[%c0_29, %c0_30] : memref<2x128xf32, #tpu.memory_space<vmem>>, vector<2x128xf32>
    %38 = arith.addf %37, %36 : vector<2x128xf32>
    %c0_31 = arith.constant 0 : index
    %c0_32 = arith.constant 0 : index
    %39 = vector.load %arg6[%c0_31, %c0_32] : memref<2x128xf32, #tpu.memory_space<vmem>>, vector<2x128xf32>
    tpu.vector_store %arg6[%c0_31, %c0_32], %38 {strides = array<i32>} : memref<2x128xf32, #tpu.memory_space<vmem>>, vector<2x128xf32>,
    %c0_33 = arith.constant 0 : index
    %c0_34 = arith.constant 0 : index
    %c3 = arith.constant 3 : index
    %c0_35 = arith.constant 0 : index
    %c0_36 = arith.constant 0 : index
    %40 = vector.load %arg2[%c0_33, %c0_34, %c3, %c0_35, %c0_36] : memref<2x1x4x4x64xbf16, #tpu.memory_space<vmem>>, vector<2x1x1x4x64xbf16>
    %41 = vector.shape_cast %40 : vector<2x1x1x4x64xbf16> to vector<2x1x4x64xbf16>
    %42 = vector.extract_strided_slice %41 {offsets = [0, 0, 0, 0], sizes = [2, 1, 1, 64], strides = [1, 1, 1, 1]} : vector<2x1x4x64xbf16> to vector<2x1x1x64xbf16>
    %43 = vector.extract_strided_slice %41 {offsets = [0, 0, 1, 0], sizes = [2, 1, 1, 64], strides = [1, 1, 1, 1]} : vector<2x1x4x64xbf16> to vector<2x1x1x64xbf16>
    %44 = vector.extract_strided_slice %41 {offsets = [0, 0, 2, 0], sizes = [2, 1, 1, 64], strides = [1, 1, 1, 1]} : vector<2x1x4x64xbf16> to vector<2x1x1x64xbf16>
    %45 = vector.extract_strided_slice %41 {offsets = [0, 0, 3, 0], sizes = [2, 1, 1, 64], strides = [1, 1, 1, 1]} : vector<2x1x4x64xbf16> to vector<2x1x1x64xbf16>
    %46 = tpu.concatenate %42, %43, %44, %45 in 3 : vector<2x1x1x64xbf16>, vector<2x1x1x64xbf16>, vector<2x1x1x64xbf16>, vector<2x1x1x64xbf16> -> vector<2x1x1x256xbf16>
    %47 = vector.shape_cast %46 : vector<2x1x1x256xbf16> to vector<2x256xbf16>
    %c3_37 = arith.constant 3 : index
    %c0_38 = arith.constant 0 : index
    %c0_39 = arith.constant 0 : index
    %48 = vector.load %arg3[%c3_37, %c0_38, %c0_39] : memref<4x256x128xbf16, #tpu.memory_space<vmem>>, vector<1x256x128xbf16>
    %49 = vector.shape_cast %48 : vector<1x256x128xbf16> to vector<256x128xbf16>
    %cst_40 = arith.constant dense<0.000000e+00> : vector<2x128xf32>
    %50 = tpu.matmul %47, %49, %cst_40 {dimension_numbers = #tpu.dot_dimension_numbers<[1], [0], [0], [1], [0, 0, 1, 1], [], []>} : vector<2x256xbf16>, vector<256x128xbf16>, vector<2x128xf32> -> vector<2x128xf32>
    %c0_41 = arith.constant 0 : index
    %c0_42 = arith.constant 0 : index
    %51 = vector.load %arg6[%c0_41, %c0_42] : memref<2x128xf32, #tpu.memory_space<vmem>>, vector<2x128xf32>
    %52 = arith.addf %51, %50 : vector<2x128xf32>
    %c0_43 = arith.constant 0 : index
    %c0_44 = arith.constant 0 : index
    %53 = vector.load %arg6[%c0_43, %c0_44] : memref<2x128xf32, #tpu.memory_space<vmem>>, vector<2x128xf32>
    tpu.vector_store %arg6[%c0_43, %c0_44], %52 {strides = array<i32>} : memref<2x128xf32, #tpu.memory_space<vmem>>, vector<2x128xf32>,
    %c0_45 = arith.constant 0 : index
    %c0_46 = arith.constant 0 : index
    %54 = vector.load %arg6[%c0_45, %c0_46] : memref<2x128xf32, #tpu.memory_space<vmem>>, vector<2x128xf32>
    %c0_47 = arith.constant 0 : index
    %c0_48 = arith.constant 0 : index
    %55 = vector.load %arg4[%c0_47, %c0_48] : memref<1x128xf32, #tpu.memory_space<vmem>>, vector<1x128xf32>
    %56 = vector.broadcast %55 : vector<1x128xf32> to vector<2x128xf32>
    %57 = arith.addf %54, %56 : vector<2x128xf32>
    %58 = vector.shape_cast %57 : vector<2x128xf32> to vector<2x1x128xf32>
    %c0_49 = arith.constant 0 : index
    %c0_50 = arith.constant 0 : index
    %c0_51 = arith.constant 0 : index
    %59 = vector.load %arg5[%c0_49, %c0_50, %c0_51] : memref<2x1x128xf32, #tpu.memory_space<vmem>>, vector<2x1x128xf32>
    tpu.vector_store %arg5[%c0_49, %c0_50, %c0_51], %58 {strides = array<i32>} : memref<2x1x128xf32, #tpu.memory_space<vmem>>, vector<2x1x128xf32>,
    return
  }
  func.func @transform_0(%arg0: i32, %arg1: i32) -> (i32, i32, i32, i32, i32) {
    %c0_i32 = arith.constant 0 : i32
    %c0_i32_0 = arith.constant 0 : i32
    %c0_i32_1 = arith.constant 0 : i32
    %c0_i32_2 = arith.constant 0 : i32
    %c0_i32_3 = arith.constant 0 : i32
    return %arg1, %c0_i32, %c0_i32_0, %c0_i32_1, %c0_i32_2 : i32, i32, i32, i32, i32
  }
  func.func @transform_1(%arg0: i32, %arg1: i32) -> (i32, i32, i32) {
    %c0_i32 = arith.constant 0 : i32
    %c0_i32_0 = arith.constant 0 : i32
    %c0_i32_1 = arith.constant 0 : i32
    return %c0_i32, %c0_i32_0, %arg0 : i32, i32, i32
  }
  func.func @transform_2(%arg0: i32, %arg1: i32) -> (i32, i32) {
    %c0_i32 = arith.constant 0 : i32
    %c0_i32_0 = arith.constant 0 : i32
    return %c0_i32, %arg0 : i32, i32
  }
  func.func @transform_3(%arg0: i32, %arg1: i32) -> (i32, i32, i32) {
    %c0_i32 = arith.constant 0 : i32
    %c0_i32_0 = arith.constant 0 : i32
    return %arg1, %c0_i32, %arg0 : i32, i32, i32
  }
}

</mosaic_0001>

<bundles_post_ra>
// kernel: _lambda_.4
= control target key start
LH: loop header
LB: loop body
LE: loop exit
PB: predicated region body
PF: predicated region fallthrough
CT: control target
= control target key end

     0   :  { %vm131_vm0 = vcmask 392192   ;;  %s586_s1 = inlined_call_operand.vmem [shape: bf16[48,128], index: 1, kind: input, shape index: {}]   ;;  %s587_s2 = inlined_call_operand.vmem [shape: f32[1,128], index: 2, kind: input, shape index: {}]   ;;  %s588_s0 = inlined_call_operand.vmem [shape: bf16[128,48], index: 0, kind: input, shape index: {}]   ;;  %s589_s3 = inlined_call_operand.vmem [shape: bf16[128,128], index: 3, kind: output, shape index: {}]  }
   0x1   :  { %v422_v0 = vld [vmem:[%s586_s1 + $0x10] sm:$0xff]  ;;  %v421_v1 = vld [vmem:[%s586_s1 + $0x8] sm:$0xff]  ;;  %v420_v2 = vld [vmem:[%s586_s1] sm:$0xff] }
   0x2   :  { %161 = vmatpush.bf16.msra.mxu0 %v422_v0  ;;  %470 = vmatpush.bf16.msra.mxu1 %v422_v0  ;;  %v412_v3 = vld [vmem:[%s588_s0] sm:$0xff]  ;;  %v414_v4 = vld [vmem:[%s588_s0 + $0x10] sm:$0xff]  ;;  %v413_v7 = vld [vmem:[%s588_s0 + $0x8] sm:$0xff] }
   0x3   :  { %471 = vmatpush.bf16.msra.mxu2 %v422_v0  ;;  %472 = vmatpush.bf16.msra.mxu3 %v422_v0  ;;  %v416_v5 = vld [vmem:[%s588_s0 + $0x20] sm:$0xff]  ;;  %v418_v6 = vld [vmem:[%s588_s0 + $0x30] sm:$0xff]  ;;  %v415_v8 = vld [vmem:[%s588_s0 + $0x18] sm:$0xff] }
   0x4   :  { %v417_v9 = vld [vmem:[%s588_s0 + $0x28] sm:$0xff]  ;;  %v419_v10 = vld [vmem:[%s588_s0 + $0x38] sm:$0xff]  ;;  %v544_v13 = vld [vmem:[%s587_s2] ss:$0 sm:$0xff] }
   0x6   :  { %162 = vmatpush.bf16.msra.mxu0 %v421_v1  ;;  %473 = vmatpush.bf16.msra.mxu1 %v421_v1 }
   0x7   :  { %474 = vmatpush.bf16.msra.mxu2 %v421_v1  ;;  %475 = vmatpush.bf16.msra.mxu3 %v421_v1 }
   0xa   :  { %163 = vmatpush.bf16.msra.mxu0 %v420_v2  ;;  %476 = vmatpush.bf16.msra.mxu1 %v420_v2 }
   0xb   :  { %477 = vmatpush.bf16.msra.mxu2 %v420_v2  ;;  %478 = vmatpush.bf16.msra.mxu3 %v420_v2 }
   0xd   :  { %404 = vmatmul.msk.bf16.vlgmr.msra.gmra.mxu0 %vm131_vm0, %v412_v3  ;;  %406 = vmatmul.msk.bf16.vlgmr.msra.gmra.mxu1 %vm131_vm0, %v414_v4 }
   0xe   :  { %408 = vmatmul.msk.bf16.vlgmr.msra.gmra.mxu2 %vm131_vm0, %v416_v5  ;;  %410 = vmatmul.msk.bf16.vlgmr.msra.gmra.mxu3 %vm131_vm0, %v418_v6 }
  0x1d   :  { %405 = vmatmul.msk.bf16.gmra.mxu0 %vm131_vm0, %v413_v7  ;;  %407 = vmatmul.msk.bf16.gmra.mxu1 %vm131_vm0, %v415_v8 }
  0x1e   :  { %409 = vmatmul.msk.bf16.gmra.mxu2 %vm131_vm0, %v417_v9  ;;  %411 = vmatmul.msk.bf16.gmra.mxu3 %vm131_vm0, %v419_v10 }
  0x8a   :  { %v165_v11 = vpop.f32.mrf.mxu0  ;;  %v175_v12 = vpop.f32.mrf.mxu1 }
  0x8b   :  { %v260_v14 = vadd.f32 %v544_v13, %v165_v11  ;;  %v264_v15 = vadd.f32 %v544_v13, %v175_v12 }
  0x8d   :  { %v292_v20 = vmul.f32 0.01, %v260_v14  ;;  %v296_v21 = vmul.f32 0.01, %v264_v15  ;;  %vm276_vm1 = vcmp.gt.f32.partialorder %v260_v14, 0.0  ;;  %vm280_vm2 = vcmp.gt.f32.partialorder %v264_v15, 0.0 }
  0x8f   :  { %v308_v28 = vsel %vm276_vm1, %v260_v14, %v292_v20  ;;  %v312_v29 = vsel %vm280_vm2, %v264_v15, %v296_v21 }
  0x91   :  { %v185_v16 = vpop.f32.mrf.mxu2  ;;  %v195_v17 = vpop.f32.mrf.mxu3 }
  0x92   :  { %v167_v18 = vpop.f32.mrf.mxu0  ;;  %v177_v19 = vpop.f32.mrf.mxu1  ;;  %v268_v26 = vadd.f32 %v544_v13, %v185_v16  ;;  %v272_v27 = vadd.f32 %v544_v13, %v195_v17 }
  0x93   :  { %v261_v22 = vadd.f32 %v544_v13, %v167_v18  ;;  %v265_v23 = vadd.f32 %v544_v13, %v177_v19 }
  0x94   :  { %v300_v36 = vmul.f32 0.01, %v268_v26  ;;  %v304_v37 = vmul.f32 0.01, %v272_v27  ;;  %vm284_vm5 = vcmp.gt.f32.partialorder %v268_v26, 0.0  ;;  %vm288_vm6 = vcmp.gt.f32.partialorder %v272_v27, 0.0 }
  0x95   :  { %vm277_vm3 = vcmp.gt.f32.partialorder %v261_v22, 0.0  ;;  %v293_v24 = vmul.f32 0.01, %v261_v22  ;;  %vm281_vm4 = vcmp.gt.f32.partialorder %v265_v23, 0.0  ;;  %v297_v25 = vmul.f32 0.01, %v265_v23 }
  0x96   :  { %v316_v44 = vsel %vm284_vm5, %v268_v26, %v300_v36  ;;  %v320_v45 = vsel %vm288_vm6, %v272_v27, %v304_v37 }
  0x97   :  { %v309_v30 = vsel %vm277_vm3, %v261_v22, %v293_v24  ;;  %v313_v31 = vsel %vm281_vm4, %v265_v23, %v297_v25 }
  0x98   :  { %v426_v32 = vpack.c.bf16 %v309_v30, %v308_v28  ;;  %v436_v33 = vpack.c.bf16 %v313_v31, %v312_v29 }
  0x99   :  { %v187_v34 = vpop.f32.mrf.mxu2  ;;  %v197_v35 = vpop.f32.mrf.mxu3 }
  0x9a   :  { %427 = vst [vmem:[%s589_s3] sm:$0xff] %v426_v32   ;;  %v269_v38 = vadd.f32 %v544_v13, %v187_v34  ;;  %v273_v39 = vadd.f32 %v544_v13, %v197_v35  ;;  %v170_v40 = vpop.f32.mrf.mxu0  ;;  %v180_v41 = vpop.f32.mrf.mxu1 }
  0x9b   :  { %464 = vst [vmem:[%s589_s3 + $0x10] sm:$0xff] %v436_v33   ;;  %v262_v50 = vadd.f32 %v544_v13, %v170_v40  ;;  %v266_v51 = vadd.f32 %v544_v13, %v180_v41 }
  0x9c   :  { %vm285_vm7 = vcmp.gt.f32.partialorder %v269_v38, 0.0  ;;  %v301_v42 = vmul.f32 0.01, %v269_v38  ;;  %vm289_vm8 = vcmp.gt.f32.partialorder %v273_v39, 0.0  ;;  %v305_v43 = vmul.f32 0.01, %v273_v39 }
  0x9d   :  { %v294_v56 = vmul.f32 0.01, %v262_v50  ;;  %v298_v57 = vmul.f32 0.01, %v266_v51  ;;  %vm278_vm9 = vcmp.gt.f32.partialorder %v262_v50, 0.0  ;;  %vm282_vm10 = vcmp.gt.f32.partialorder %v266_v51, 0.0 }
  0x9e   :  { %v317_v46 = vsel %vm285_vm7, %v269_v38, %v301_v42  ;;  %v321_v47 = vsel %vm289_vm8, %v273_v39, %v305_v43 }
  0x9f   :  { %v446_v48 = vpack.c.bf16 %v317_v46, %v316_v44  ;;  %v456_v49 = vpack.c.bf16 %v321_v47, %v320_v45  ;;  %v310_v0 = vsel %vm278_vm9, %v262_v50, %v294_v56  ;;  %v314_v1 = vsel %vm282_vm10, %v266_v51, %v298_v57 }
  0xa1   :  { %466 = vst [vmem:[%s589_s3 + $0x20] sm:$0xff] %v446_v48   ;;  %v190_v52 = vpop.f32.mrf.mxu2  ;;  %v200_v53 = vpop.f32.mrf.mxu3 }
  0xa2   :  { %468 = vst [vmem:[%s589_s3 + $0x30] sm:$0xff] %v456_v49   ;;  %v172_v54 = vpop.f32.mrf.mxu0  ;;  %v182_v55 = vpop.f32.mrf.mxu1  ;;  %v270_v62 = vadd.f32 %v544_v13, %v190_v52  ;;  %v274_v63 = vadd.f32 %v544_v13, %v200_v53 }
  0xa3   :  { %v263_v58 = vadd.f32 %v544_v13, %v172_v54  ;;  %v267_v59 = vadd.f32 %v544_v13, %v182_v55 }
  0xa4   :  { %v302_v8 = vmul.f32 0.01, %v270_v62  ;;  %v306_v9 = vmul.f32 0.01, %v274_v63  ;;  %vm286_vm13 = vcmp.gt.f32.partialorder %v270_v62, 0.0  ;;  %vm290_vm14 = vcmp.gt.f32.partialorder %v274_v63, 0.0 }
  0xa5   :  { %vm279_vm11 = vcmp.gt.f32.partialorder %v263_v58, 0.0  ;;  %v295_v60 = vmul.f32 0.01, %v263_v58  ;;  %vm283_vm12 = vcmp.gt.f32.partialorder %v267_v59, 0.0  ;;  %v299_v61 = vmul.f32 0.01, %v267_v59 }
  0xa6   :  { %v318_v15 = vsel %vm286_vm13, %v270_v62, %v302_v8  ;;  %v322_v16 = vsel %vm290_vm14, %v274_v63, %v306_v9 }
  0xa7   :  { %v311_v2 = vsel %vm279_vm11, %v263_v58, %v295_v60  ;;  %v315_v3 = vsel %vm283_vm12, %v267_v59, %v299_v61 }
  0xa8   :  { %v431_v4 = vpack.c.bf16 %v311_v2, %v310_v0  ;;  %v441_v5 = vpack.c.bf16 %v315_v3, %v314_v1 }
  0xa9   :  { %v192_v6 = vpop.f32.mrf.mxu2  ;;  %v202_v7 = vpop.f32.mrf.mxu3 }
  0xaa   :  { %463 = vst [vmem:[%s589_s3 + $0x8] sm:$0xff] %v431_v4   ;;  %v271_v10 = vadd.f32 %v544_v13, %v192_v6  ;;  %v275_v11 = vadd.f32 %v544_v13, %v202_v7 }
  0xab   :  { %465 = vst [vmem:[%s589_s3 + $0x18] sm:$0xff] %v441_v5  }
  0xac   :  { %vm287_vm15 = vcmp.gt.f32.partialorder %v271_v10, 0.0  ;;  %v303_v12 = vmul.f32 0.01, %v271_v10  ;;  %vm291_vm0 = vcmp.gt.f32.partialorder %v275_v11, 0.0  ;;  %v307_v14 = vmul.f32 0.01, %v275_v11 }
  0xae   :  { %v319_v17 = vsel %vm287_vm15, %v271_v10, %v303_v12  ;;  %v323_v18 = vsel %vm291_vm0, %v275_v11, %v307_v14 }
  0xaf   :  { %v451_v19 = vpack.c.bf16 %v319_v17, %v318_v15  ;;  %v461_v20 = vpack.c.bf16 %v323_v18, %v322_v16 }
  0xb1   :  { %467 = vst [vmem:[%s589_s3 + $0x28] sm:$0xff] %v451_v19  }
  0xb2   :  { %469 = vst [vmem:[%s589_s3 + $0x38] sm:$0xff] %v461_v20  }

// kernel: _lambda_.5
= control target key start
LH: loop header
LB: loop body
LE: loop exit
PB: predicated region body
PF: predicated region fallthrough
CT: control target
= control target key end

     0   :  { %s1262_s30 = smov 64   ;;  %vm118_vm0 = vcmask 523264   ;;  %s1676_s0 = inlined_call_operand.vmem [shape: bf16[2,2,5,5,64], index: 0, kind: input, shape index: {}]   ;;  %s1677_s1 = inlined_call_operand.vmem [shape: bf16[4,128,128], index: 1, kind: input, shape index: {}]   ;;  %s1678_s2 = inlined_call_operand.vmem [shape: f32[1,128], index: 2, kind: input, shape index: {}]   ;;  %s1679_s3 = inlined_call_operand.vmem [shape: bf16[2,16,128], index: 3, kind: output, shape index: {}]  }
   0x1   :  { %v1286_v0 = vld [vmem:[%s1676_s0 + $0x8] sm:$0x7]  ;;  %v1291_v1 = vld [vmem:[%s1676_s0] sm:$0x7]  ;;  %v1296_v2 = vld [vmem:[%s1676_s0 + $0xc] sm:$0x7] }
   0x2   :  { %v32_v3 = vunpack.c.l.b16 %v1286_v0  ;;  %v30_v4 = vunpack.c.l.b16 %v1291_v1  ;;  %v33_v5 = vunpack.c.l.b16 %v1296_v2  ;;  %v1304_v6 = vld [vmem:[%s1676_s0 + $0x4] sm:$0x7]  ;;  %v1310_v8 = vld [vmem:[%s1676_s0 + $0x14] sm:$0x7]  ;;  %v1315_v12 = vld [vmem:[%s1676_s0 + $0x20] sm:$0x7] }
   0x3   :  { %v31_v7 = vunpack.c.l.b16 %v1304_v6  ;;  %v1320_v13 = vld [vmem:[%s1676_s0 + $0x1c] sm:$0x7]  ;;  %v266_v15 = vunpack.c.l.b16 %v1310_v8  ;;  %v269_v20 = vunpack.c.l.b16 %v1315_v12  ;;  %v1328_v29 = vld [vmem:[%s1676_s0 + $0x18] sm:$0x7]  ;;  %v1333_v34 = vld [vmem:[%s1676_s0 + $0x30] sm:$0x7] }
   0x4   :  { %v40_v9 = vpack.c.b16 %v32_v3, %v32_v3  ;;  %v38_v10 = vpack.c.b16 %v30_v4, %v30_v4  ;;  %v41_v11 = vpack.c.b16 %v33_v5, %v33_v5  ;;  %v268_v21 = vunpack.c.l.b16 %v1320_v13  ;;  %v1340_v39 = vld [vmem:[%s1676_s0 + $0x28] sm:$0x7]  ;;  %v1345_v40 = vld [vmem:[%s1676_s0 + $0x2c] sm:$0x7]  ;;  %v1355_v59 = vld [vmem:[%s1676_s0 + $0x34] sm:$0x7] }
   0x5   :  { %v39_v14 = vpack.c.b16 %v31_v7, %v31_v7  ;;  %v274_v28 = vpack.c.b16 %v266_v15, %v266_v15  ;;  %v277_v32 = vpack.c.b16 %v269_v20, %v269_v20  ;;  %v267_v41 = vunpack.c.l.b16 %v1328_v29  ;;  %v1362_v63 = vld [vmem:[%s1676_s0 + $0x8] sm:$0x7]  ;;  %v1367_v3 = vld [vmem:[%s1676_s0 + $0x4] sm:$0x7] }
   0x6   :  { %v61_v16 = vshrl.u32 %v40_v9, 16  ;;  %v63_v17 = vshll.u32 %v40_v9, 16  ;;  %v47_v18 = vshrl.u32 %v38_v10, 16  ;;  %v49_v19 = vshll.u32 %v38_v10, 16 }
   0x7   :  { %v70_v24 = vshll.u32 %v41_v11, 16  ;;  %v56_v25 = vshll.u32 %v39_v14, 16  ;;  %v68_v30 = vshrl.u32 %v41_v11, 16  ;;  %v54_v31 = vshrl.u32 %v39_v14, 16 }
   0x8   :  { %v65_v22 = vrot.slane %v63_v17, 1  ;;  %v51_v23 = vrot.slane %v49_v19, 1  ;;  %v276_v33 = vpack.c.b16 %v268_v21, %v268_v21  ;;  %v283_v37 = vshrl.u32 %v274_v28, 16 }
   0x9   :  { %v72_v35 = vrot.slane %v70_v24, 1  ;;  %v58_v36 = vrot.slane %v56_v25, 1  ;;  %v285_v38 = vshll.u32 %v274_v28, 16  ;;  %v36_v43 = vunpack.c.l.b16 %v1333_v34  ;;  %v1388_v28 = vld [vmem:[%s1676_s0 + $0x10] sm:$0x7] }
   0xa   :  { %v66_v26 = vor.u32 %v65_v22, %v61_v16  ;;  %v52_v27 = vor.u32 %v51_v23, %v47_v18  ;;  %v306_v44 = vshll.u32 %v277_v32, 16  ;;  %v299_v45 = vshll.u32 %v276_v33, 16  ;;  %v1376_v22 = vld [vmem:[%s1676_s0 + $0xc] sm:$0x7] }
   0xb   :  { %v287_v42 = vrot.slane %v285_v38, 1  ;;  %v275_v46 = vpack.c.b16 %v267_v41, %v267_v41  ;;  %v34_v47 = vunpack.c.l.b16 %v1340_v39  ;;  %v73_v48 = vor.u32 %v72_v35, %v68_v30 }
   0xc   :  { %106 = vrot.lane.b32.xlu1 %v66_v26, %s1262_s30  ;;  %102 = vrot.lane.b32.xlu0 %v52_v27, %s1262_s30  ;;  %v59_v49 = vor.u32 %v58_v36, %v54_v31  ;;  %v35_v51 = vunpack.c.l.b16 %v1345_v40  ;;  %v304_v55 = vshrl.u32 %v277_v32, 16  ;;  %v308_v56 = vrot.slane %v306_v44, 1  ;;  %v1383_v27 = vld [vmem:[%s1676_s0 + $0x3c] sm:$0x7] }
   0xd   :  { %v288_v50 = vor.u32 %v287_v42, %v283_v37  ;;  %v292_v52 = vshll.u32 %v275_v46, 16  ;;  %v290_v53 = vshrl.u32 %v275_v46, 16  ;;  %v42_v54 = vpack.c.b16 %v34_v47, %v34_v47  ;;  %v1397_v47 = vld [vmem:[%s1676_s0 + $0x40] sm:$0x7] }
   0xe   :  { %v44_v57 = vpack.c.b16 %v36_v43, %v36_v43  ;;  %v297_v60 = vshrl.u32 %v276_v33, 16  ;;  %v301_v61 = vrot.slane %v299_v45, 1  ;;  %v43_v62 = vpack.c.b16 %v35_v51, %v35_v51 }
   0xf   :  { %338 = vrot.lane.b32.xlu2 %v288_v50, %s1262_s30  ;;  %v294_v58 = vrot.slane %v292_v52, 1  ;;  %v77_v5 = vshll.u32 %v42_v54, 16  ;;  %v37_v7 = vunpack.c.l.b16 %v1355_v59  ;;  %v309_v9 = vor.u32 %v308_v56, %v304_v55  ;;  %v1404_v52 = vld [vmem:[%s1676_s0 + $0x48] sm:$0x7] }
  0x10   :  { %v91_v10 = vshll.u32 %v44_v57, 16  ;;  %v302_v11 = vor.u32 %v301_v61, %v297_v60  ;;  %v84_v14 = vshll.u32 %v43_v62, 16  ;;  %v511_v15 = vunpack.c.l.b16 %v1362_v63 }
  0x11   :  { %v295_v4 = vor.u32 %v294_v58, %v290_v53  ;;  %v510_v16 = vunpack.c.l.b16 %v1367_v3  ;;  %v75_v17 = vshrl.u32 %v42_v54, 16  ;;  %v79_v18 = vrot.slane %v77_v5, 1  ;;  %v1409_v53 = vld [vmem:[%s1676_s0 + $0x44] sm:$0x7] }
  0x12   :  { %v45_v19 = vpack.c.b16 %v37_v7, %v37_v7  ;;  %v89_v20 = vshrl.u32 %v44_v57, 16  ;;  %v93_v21 = vrot.slane %v91_v10, 1  ;;  %v82_v23 = vshrl.u32 %v43_v62, 16 }
  0x13   :  { %v86_v24 = vrot.slane %v84_v14, 1  ;;  %v519_v25 = vpack.c.b16 %v511_v15, %v511_v15  ;;  %v518_v26 = vpack.c.b16 %v510_v16, %v510_v16  ;;  %v80_v30 = vor.u32 %v79_v18, %v75_v17  ;;  %v1418_v15 = vld [vmem:[%s1676_s0 + $0x18] sm:$0x7] }
  0x14   :  { %108 = vrot.lane.b32.xlu1 %v73_v48, %s1262_s30  ;;  %104 = vrot.lane.b32.xlu0 %v59_v49, %s1262_s30  ;;  %v98_v31 = vshll.u32 %v45_v19, 16  ;;  %v512_v32 = vunpack.c.l.b16 %v1376_v22  ;;  %v94_v33 = vor.u32 %v93_v21, %v89_v20  ;;  %v270_v35 = vunpack.c.l.b16 %v1383_v27  ;;  %v1430_v20 = vld [vmem:[%s1676_s0 + $0x1c] sm:$0x7] }
  0x15   :  { %v87_v36 = vor.u32 %v86_v24, %v82_v23  ;;  %v536_v37 = vshll.u32 %v519_v25, 16  ;;  %v529_v38 = vshll.u32 %v518_v26, 16  ;;  %v513_v41 = vunpack.c.l.b16 %v1388_v28 }
  0x16   :  { %v96_v42 = vshrl.u32 %v45_v19, 16  ;;  %v100_v43 = vrot.slane %v98_v31, 1  ;;  %v520_v44 = vpack.c.b16 %v512_v32, %v512_v32  ;;  %v534_v45 = vshrl.u32 %v519_v25, 16  ;;  %v1425_v19 = vld [vmem:[%s1676_s0 + $0x20] sm:$0x7] }
  0x17   :  { %340 = vrot.lane.b32.xlu2 %v295_v4, %s1262_s30  ;;  %v278_v46 = vpack.c.b16 %v270_v35, %v270_v35  ;;  %v538_v48 = vrot.slane %v536_v37, 1  ;;  %v527_v49 = vshrl.u32 %v518_v26, 16  ;;  %v531_v50 = vrot.slane %v529_v38, 1 }
  0x18   :  { %v521_v51 = vpack.c.b16 %v513_v41, %v513_v41  ;;  %v101_v54 = vor.u32 %v100_v43, %v96_v42  ;;  %v543_v55 = vshll.u32 %v520_v44, 16  ;;  %v271_v56 = vunpack.c.l.b16 %v1397_v47  ;;  %v1439_v42 = vld [vmem:[%s1676_s0 + $0x24] sm:$0x7] }
  0x19   :  { %v313_v57 = vshll.u32 %v278_v46, 16  ;;  %v273_v58 = vunpack.c.l.b16 %v1404_v52  ;;  %v539_v60 = vor.u32 %v538_v48, %v534_v45  ;;  %v532_v61 = vor.u32 %v531_v50, %v527_v49  ;;  %v1446_v48 = vld [vmem:[%s1676_s0 + $0x30] sm:$0x7]  ;;  %v1451_v49 = vld [vmem:[%s1676_s0 + $0x2c] sm:$0x7] }
  0x1a   :  { %v550_v62 = vshll.u32 %v521_v51, 16  ;;  %v272_v4 = vunpack.c.l.b16 %v1409_v53  ;;  %v541_v5 = vshrl.u32 %v520_v44, 16  ;;  %v545_v7 = vrot.slane %v543_v55, 1 }
  0x1b   :  { %v311_v10 = vshrl.u32 %v278_v46, 16  ;;  %v281_v14 = vpack.c.b16 %v273_v58, %v273_v58  ;;  %v548_v16 = vshrl.u32 %v521_v51, 16  ;;  %v754_v24 = vunpack.c.l.b16 %v1418_v15 }
  0x1c   :  { %344 = vrot.lane.b32.xlu1 %v309_v9, %s1262_s30  ;;  %342 = vrot.lane.b32.xlu0 %v302_v11, %s1262_s30  ;;  %v279_v9 = vpack.c.b16 %v271_v56, %v271_v56  ;;  %v315_v11 = vrot.slane %v313_v57, 1  ;;  %v552_v17 = vrot.slane %v550_v62, 1  ;;  %v280_v18 = vpack.c.b16 %v272_v4, %v272_v4 }
  0x1d   :  { %v546_v21 = vor.u32 %v545_v7, %v541_v5  ;;  %v334_v26 = vshll.u32 %v281_v14, 16  ;;  %v756_v32 = vunpack.c.l.b16 %v1425_v19  ;;  %v762_v37 = vpack.c.b16 %v754_v24, %v754_v24 }
  0x1e   :  { %v320_v23 = vshll.u32 %v279_v9, 16  ;;  %v316_v25 = vor.u32 %v315_v11, %v311_v10  ;;  %v327_v31 = vshll.u32 %v280_v18, 16  ;;  %v318_v35 = vshrl.u32 %v279_v9, 16  ;;  %v1460_v10 = vld [vmem:[%s1676_s0 + $0x40] sm:$0x7] }
  0x1f   :  { %110 = vrot.lane.b32.xlu2 %v80_v30, %s1262_s30  ;;  %v553_v30 = vor.u32 %v552_v17, %v548_v16  ;;  %v332_v38 = vshrl.u32 %v281_v14, 16  ;;  %v336_v41 = vrot.slane %v334_v26, 1  ;;  %v325_v43 = vshrl.u32 %v280_v18, 16  ;;  %v1467_v18 = vld [vmem:[%s1676_s0 + $0x34] sm:$0x7] }
  0x20   :  { %v329_v44 = vrot.slane %v327_v31, 1  ;;  %v764_v45 = vpack.c.b16 %v756_v32, %v756_v32  ;;  %v773_v51 = vshll.u32 %v762_v37, 16  ;;  %v515_v56 = vunpack.c.l.b16 %v1446_v48  ;;  %v1232_v31 = vld [vmem:[%s1677_s1 + $0x78] sm:$0xff] }
  0x21   :  { %v337_v55 = vor.u32 %v336_v41, %v332_v38  ;;  %v771_v62 = vshrl.u32 %v762_v37, 16  ;;  %v516_v26 = vunpack.c.l.b16 %v1467_v18  ;;  %462 = vmatpush.bf16.msra.mxu1 %v1232_v31  ;;  %v1231_v41 = vld [vmem:[%s1677_s1 + $0x70] sm:$0xff] }
  0x22   :  { %v330_v57 = vor.u32 %v329_v44, %v325_v43  ;;  %v787_v58 = vshll.u32 %v764_v45, 16  ;;  %v775_v4 = vrot.slane %v773_v51, 1  ;;  %v785_v7 = vshrl.u32 %v764_v45, 16 }
  0x23   :  { %v523_v9 = vpack.c.b16 %v515_v56, %v515_v56  ;;  %v524_v45 = vpack.c.b16 %v516_v26, %v516_v26 }
  0x24   :  { %114 = vrot.lane.b32.xlu1 %v94_v33, %s1262_s30  ;;  %112 = vrot.lane.b32.xlu0 %v87_v36, %s1262_s30  ;;  %v755_v33 = vunpack.c.l.b16 %v1430_v20  ;;  %v322_v36 = vrot.slane %v320_v23, 1  ;;  %v789_v11 = vrot.slane %v787_v58, 1  ;;  %v1475_v23 = vld [vmem:[%s1676_s0 + $0x38] sm:$0x7]  ;;  %v776_v24 = vor.u32 %v775_v4, %v771_v62 }
  0x25   :  { %v564_v32 = vshll.u32 %v523_v9, 16  ;;  %v517_v38 = vunpack.c.l.b16 %v1475_v23  ;;  %463 = vmatpush.bf16.msra.mxu1 %v1231_v41  ;;  %v571_v4 = vshll.u32 %v524_v45, 16 }
  0x26   :  { %v763_v46 = vpack.c.b16 %v755_v33, %v755_v33  ;;  %v323_v50 = vor.u32 %v322_v36, %v318_v35  ;;  %v758_v33 = vunpack.c.l.b16 %v1460_v10  ;;  %v790_v35 = vor.u32 %v789_v11, %v785_v7  ;;  %v1221_v7 = vld [vmem:[%s1677_s1 + $0x20] sm:$0xff] }
  0x27   :  { %116 = vrot.lane.b32.xlu2 %v101_v54, %s1262_s30  ;;  %v757_v54 = vunpack.c.l.b16 %v1439_v42  ;;  %v566_v51 = vrot.slane %v564_v32, 1  ;;  %v525_v58 = vpack.c.b16 %v517_v38, %v517_v38 }
  0x28   :  { %v778_v14 = vshrl.u32 %v763_v46, 16 }
  0x29   :  { %v765_v5 = vpack.c.b16 %v757_v54, %v757_v54  ;;  %v766_v54 = vpack.c.b16 %v758_v33, %v758_v33  ;;  %v576_v32 = vshrl.u32 %v525_v58, 16 }
  0x2b   :  { %v792_v43 = vshrl.u32 %v765_v5, 16  ;;  %v801_v11 = vshll.u32 %v766_v54, 16 }
  0x2c   :  { %584 = vrot.lane.b32.xlu1 %v539_v60, %s1262_s30  ;;  %582 = vrot.lane.b32.xlu0 %v532_v61, %s1262_s30  ;;  %v780_v60 = vshll.u32 %v763_v46, 16  ;;  %v514_v61 = vunpack.c.l.b16 %v1451_v49  ;;  %v1222_v46 = vld [vmem:[%s1677_s1 + $0x28] sm:$0xff] }
  0x2d   :  { %v803_v31 = vrot.slane %v801_v11, 1  ;;  %v1229_v11 = vld [vmem:[%s1677_s1 + $0x60] sm:$0xff] }
  0x2e   :  { %v782_v16 = vrot.slane %v780_v60, 1  ;;  %v522_v17 = vpack.c.b16 %v514_v61, %v514_v61  ;;  %v1503_v60 = vld [vmem:[%s1676_s0 + $0x4c] sm:$0x7]  ;;  %v1508_v61 = vld [vmem:[%s1676_s0 + $0x48] sm:$0x7] }
  0x2f   :  { %586 = vrot.lane.b32.xlu2 %v546_v21, %s1262_s30  ;;  %v1224_v21 = vld [vmem:[%s1677_s1 + $0x38] sm:$0xff] }
  0x30   :  { %226 = vmatpush.bf16.msra.mxu0 %v1224_v21  ;;  %v783_v36 = vor.u32 %v782_v16, %v778_v14  ;;  %v557_v37 = vshll.u32 %v522_v17, 16  ;;  %v555_v56 = vshrl.u32 %v522_v17, 16  ;;  %v578_v16 = vshll.u32 %v525_v58, 16 }
  0x31   :  { %v761_v17 = vunpack.c.l.b16 %v1503_v60  ;;  %v760_v21 = vunpack.c.l.b16 %v1508_v61 }
  0x32   :  { %v580_v33 = vrot.slane %v578_v16, 1  ;;  %v1228_v16 = vld [vmem:[%s1677_s1 + $0x58] sm:$0xff] }
  0x34   :  { %346 = vrot.lane.b32.xlu1 %v316_v25, %s1262_s30  ;;  %588 = vrot.lane.b32.xlu0 %v553_v30, %s1262_s30  ;;  %v794_v25 = vshll.u32 %v765_v5, 16  ;;  %v1223_v30 = vld [vmem:[%s1677_s1 + $0x30] sm:$0xff] }
  0x35   :  { %227 = vmatpush.bf16.msra.mxu0 %v1223_v30  ;;  %v799_v30 = vshrl.u32 %v766_v54, 16 }
  0x36   :  { %v796_v44 = vrot.slane %v794_v25, 1  ;;  %v573_v25 = vrot.slane %v571_v4, 1 }
  0x37   :  { %348 = vrot.lane.b32.xlu2 %v323_v50, %s1262_s30  ;;  %v562_v50 = vshrl.u32 %v523_v9, 16  ;;  %v804_v41 = vor.u32 %v803_v31, %v799_v30  ;;  %v1225_v31 = vld [vmem:[%s1677_s1 + $0x40] sm:$0xff] }
  0x38   :  { %v797_v62 = vor.u32 %v796_v44, %v792_v43  ;;  %v581_v43 = vor.u32 %v580_v33, %v576_v32  ;;  %v1239_v32 = vld [vmem:[%s1677_s1 + $0xb0] sm:$0xff]  ;;  %v1238_v33 = vld [vmem:[%s1677_s1 + $0xa8] sm:$0xff] }
  0x39   :  { %228 = vmatpush.bf16.msra.mxu0 %v1222_v46  ;;  %v567_v9 = vor.u32 %v566_v51, %v562_v50 }
  0x3c   :  { %352 = vrot.lane.b32.xlu1 %v337_v55, %s1262_s30  ;;  %350 = vrot.lane.b32.xlu0 %v330_v57, %s1262_s30  ;;  %v1496_v55 = vld [vmem:[%s1676_s0 + $0x44] sm:$0x7]  ;;  %v559_v57 = vrot.slane %v557_v37, 1 }
  0x3d   :  { %v759_v5 = vunpack.c.l.b16 %v1496_v55  ;;  %229 = vmatpush.bf16.msra.mxu0 %v1221_v7  ;;  %v1230_v7 = vld [vmem:[%s1677_s1 + $0x68] sm:$0xff] }
  0x3e   :  { %v560_v14 = vor.u32 %v559_v57, %v555_v56  ;;  %464 = vmatpush.bf16.msra.mxu1 %v1230_v7 }
  0x3f   :  { %826 = vrot.lane.b32.xlu2 %v776_v24, %s1262_s30  ;;  %v569_v24 = vshrl.u32 %v524_v45, 16  ;;  %v767_v26 = vpack.c.b16 %v759_v5, %v759_v5  ;;  %v1220_v5 = vld [vmem:[%s1677_s1 + $0x18] sm:$0xff] }
  0x41   :  { %v574_v37 = vor.u32 %v573_v25, %v569_v24  ;;  %v808_v38 = vshll.u32 %v767_v26, 16  ;;  %v806_v45 = vshrl.u32 %v767_v26, 16  ;;  %230 = vmatpush.bf16.msra.mxu0 %v1220_v5  ;;  %v1227_v24 = vld [vmem:[%s1677_s1 + $0x50] sm:$0xff]  ;;  %v1226_v25 = vld [vmem:[%s1677_s1 + $0x48] sm:$0xff]  ;;  %v1240_v26 = vld [vmem:[%s1677_s1 + $0xb8] sm:$0xff] }
  0x42   :  { %465 = vmatpush.bf16.msra.mxu1 %v1229_v11  ;;  %706 = vmatpush.bf16.msra.mxu2 %v1240_v26  ;;  %v1242_v26 = vld [vmem:[%s1677_s1 + $0xc8] sm:$0xff] }
  0x43   :  { %v810_v50 = vrot.slane %v808_v38, 1 }
  0x44   :  { %830 = vrot.lane.b32.xlu1 %v790_v35, %s1262_s30  ;;  %828 = vrot.lane.b32.xlu0 %v783_v36, %s1262_s30  ;;  %v769_v35 = vpack.c.b16 %v761_v17, %v761_v17  ;;  %v768_v36 = vpack.c.b16 %v760_v21, %v760_v21  ;;  %v1217_v21 = vld [vmem:[%s1677_s1] sm:$0xff] }
  0x45   :  { %v811_v58 = vor.u32 %v810_v50, %v806_v45  ;;  %v1235_v50 = vld [vmem:[%s1677_s1 + $0x90] sm:$0xff] }
  0x46   :  { %v822_v44 = vshll.u32 %v769_v35, 16  ;;  %v815_v46 = vshll.u32 %v768_v36, 16  ;;  %v820_v51 = vshrl.u32 %v769_v35, 16  ;;  %v813_v56 = vshrl.u32 %v768_v36, 16  ;;  %466 = vmatpush.bf16.msra.mxu1 %v1228_v16  ;;  %707 = vmatpush.bf16.msra.mxu2 %v1239_v32 }
  0x47   :  { %832 = vrot.lane.b32.xlu2 %v797_v62, %s1262_s30 }
  0x48   :  { %v824_v54 = vrot.slane %v822_v44, 1  ;;  %v817_v57 = vrot.slane %v815_v46, 1  ;;  %v1237_v44 = vld [vmem:[%s1677_s1 + $0xa0] sm:$0xff]  ;;  %v1248_v46 = vld [vmem:[%s1677_s1 + $0xf8] sm:$0xff] }
  0x49   :  { %950 = vmatpush.bf16.msra.mxu3 %v1248_v46 }
  0x4a   :  { %v825_v62 = vor.u32 %v824_v54, %v820_v51  ;;  %v818_v4 = vor.u32 %v817_v57, %v813_v56  ;;  %467 = vmatpush.bf16.msra.mxu1 %v1227_v24  ;;  %708 = vmatpush.bf16.msra.mxu2 %v1238_v33 }
  0x4c   :  { %592 = vrot.lane.b32.xlu1 %v567_v9, %s1262_s30  ;;  %590 = vrot.lane.b32.xlu0 %v560_v14, %s1262_s30  ;;  %v1219_v9 = vld [vmem:[%s1677_s1 + $0x10] sm:$0xff]  ;;  %v1218_v14 = vld [vmem:[%s1677_s1 + $0x8] sm:$0xff] }
  0x4d   :  { %231 = vmatpush.bf16.msra.mxu0 %v1219_v9 }
  0x4e   :  { %468 = vmatpush.bf16.msra.mxu1 %v1226_v25  ;;  %709 = vmatpush.bf16.msra.mxu2 %v1237_v44 }
  0x4f   :  { %594 = vrot.lane.b32.xlu2 %v574_v37, %s1262_s30 }
  0x51   :  { %232 = vmatpush.bf16.msra.mxu0 %v1218_v14 }
  0x52   :  { %469 = vmatpush.bf16.msra.mxu1 %v1225_v31 }
  0x54   :  { %834 = vrot.lane.b32.xlu1 %v804_v41, %s1262_s30  ;;  %596 = vrot.lane.b32.xlu0 %v581_v43, %s1262_s30 }
  0x55   :  { %233 = vmatpush.bf16.msra.mxu0 %v1217_v21 }
  0x57   :  { %836 = vrot.lane.b32.xlu2 %v811_v58, %s1262_s30  ;;  %v1246_v58 = vld [vmem:[%s1677_s1 + $0xe8] sm:$0xff] }
  0x5c   :  { %840 = vrot.lane.b32.xlu1 %v825_v62, %s1262_s30  ;;  %838 = vrot.lane.b32.xlu0 %v818_v4, %s1262_s30 }
  0x69   :  { %v339_v17 = vpop.permute.xlu2 %338 }
  0x6a   :  { %v356_v14 = vsel %vm118_vm0, %v1310_v8, %v339_v17 }
  0x71   :  { %v341_v30 = vpop.permute.xlu2 %340 }
  0x72   :  { %v359_v4 = vsel %vm118_vm0, %v1328_v29, %v341_v30  ;;  %v1244_v29 = vld [vmem:[%s1677_s1 + $0xd8] sm:$0xff] }
  0x79   :  { %v111_v35 = vpop.permute.xlu2 %110 }
  0x7a   :  { %v133_v36 = vsel %vm118_vm0, %v1340_v39, %v111_v35  ;;  %v1236_v39 = vld [vmem:[%s1677_s1 + $0x98] sm:$0xff] }
  0x7b   :  { %167 = vst [vmem:[#allocation1 + $0x20] ss:$4 sm:$0xff] %v133_v36  ;;  %710 = vmatpush.bf16.msra.mxu2 %v1236_v39 }
  0x7e   :  { %v107_v37 = vpop.permute.xlu1 %106  ;;  %v103_v38 = vpop.permute.xlu0 %102 }
  0x7f   :  { %v127_v41 = vsel %vm118_vm0, %v1286_v0, %v107_v37  ;;  %v121_v43 = vsel %vm118_vm0, %v1291_v1, %v103_v38  ;;  %v1247_v0 = vld [vmem:[%s1677_s1 + $0xf0] sm:$0xff]  ;;  %711 = vmatpush.bf16.msra.mxu2 %v1235_v50 }
  0x80   :  { %163 = vst [vmem:[#allocation1 + $0x2] ss:$4 sm:$0xff] %v127_v41  ;;  %951 = vmatpush.bf16.msra.mxu3 %v1247_v0 }
  0x81   :  { %159 = vst [vmem:[#allocation1] ss:$4 sm:$0xff] %v121_v43  ;;  %v117_v1 = vpop.permute.xlu2 %116 }
  0x82   :  { %v142_v45 = vsel %vm118_vm0, %v1355_v59, %v117_v1  ;;  %v1234_v59 = vld [vmem:[%s1677_s1 + $0x88] sm:$0xff] }
  0x83   :  { %173 = vst [vmem:[#allocation1 + $0x23] ss:$4 sm:$0xff] %v142_v45  ;;  %712 = vmatpush.bf16.msra.mxu2 %v1234_v59 }
  0x84   :  { %952 = vmatpush.bf16.msra.mxu3 %v1246_v58 }
  0x86   :  { %v109_v51 = vpop.permute.xlu1 %108  ;;  %v105_v54 = vpop.permute.xlu0 %104 }
  0x87   :  { %v130_v56 = vsel %vm118_vm0, %v1296_v2, %v109_v51  ;;  %v124_v57 = vsel %vm118_vm0, %v1304_v6, %v105_v54  ;;  %v1245_v2 = vld [vmem:[%s1677_s1 + $0xe0] sm:$0xff] }
  0x88   :  { %165 = vst [vmem:[#allocation1 + $0x3] ss:$4 sm:$0xff] %v130_v56  ;;  %v1233_v6 = vld [vmem:[%s1677_s1 + $0x80] sm:$0xff]  ;;  %953 = vmatpush.bf16.msra.mxu3 %v1245_v2 }
  0x89   :  { %161 = vst [vmem:[#allocation1 + $0x1] ss:$4 sm:$0xff] %v124_v57  ;;  %v587_v62 = vpop.permute.xlu2 %586  ;;  %713 = vmatpush.bf16.msra.mxu2 %v1233_v6 }
  0x8a   :  { %v606_v25 = vsel %vm118_vm0, %v1376_v22, %v587_v62 }
  0x8c   :  { %954 = vmatpush.bf16.msra.mxu3 %v1244_v29 }
  0x8e   :  { %v345_v5 = vpop.permute.xlu1 %344  ;;  %v343_v7 = vpop.permute.xlu0 %342 }
  0x8f   :  { %v365_v11 = vsel %vm118_vm0, %v1315_v12, %v345_v5  ;;  %v362_v16 = vsel %vm118_vm0, %v1320_v13, %v343_v7  ;;  %v1243_v12 = vld [vmem:[%s1677_s1 + $0xd0] sm:$0xff] }
  0x90   :  { %v174_v9 = vld.sshfl [vmem:[#allocation1] sm:$0xff pattern:$0x73625140]  ;;  %955 = vmatpush.bf16.msra.mxu3 %v1243_v12 }
  0x91   :  { %397 = vst [vmem:[#allocation1 + $0x1] ss:$4 sm:$0xff] %v359_v4  ;;  %234 = vmatmul.bf16.vlgmr.msra.gmra.mxu0 %v174_v9  ;;  %v349_v24 = vpop.permute.xlu2 %348 }
  0x92   :  { %395 = vst [vmem:[#allocation1] ss:$4 sm:$0xff] %v356_v14  ;;  %v371_v33 = vsel %vm118_vm0, %v1397_v47, %v349_v24 }
  0x93   :  { %401 = vst [vmem:[#allocation1 + $0x3] ss:$4 sm:$0xff] %v365_v11 }
  0x94   :  { %399 = vst [vmem:[#allocation1 + $0x2] ss:$4 sm:$0xff] %v362_v16  ;;  %956 = vmatpush.bf16.msra.mxu3 %v1242_v26 }
  0x96   :  { %v115_v21 = vpop.permute.xlu1 %114  ;;  %v113_v8 = vpop.permute.xlu0 %112 }
  0x97   :  { %v139_v17 = vsel %vm118_vm0, %v1333_v34, %v115_v21  ;;  %v136_v13 = vsel %vm118_vm0, %v1345_v40, %v113_v8  ;;  %v1241_v34 = vld [vmem:[%s1677_s1 + $0xc0] sm:$0xff] }
  0x98   :  { %171 = vst [vmem:[#allocation1 + $0x22] ss:$4 sm:$0xff] %v139_v17  ;;  %957 = vmatpush.bf16.msra.mxu3 %v1241_v34 }
  0x99   :  { %169 = vst [vmem:[#allocation1 + $0x21] ss:$4 sm:$0xff] %v136_v13  ;;  %v827_v36 = vpop.permute.xlu2 %826 }
  0x9a   :  { %v844_v44 = vsel %vm118_vm0, %v1418_v15, %v827_v36 }
  0x9b   :  { %v410_v30 = vld.sshfl [vmem:[#allocation1] sm:$0xff pattern:$0x73625140] }
  0x9c   :  { %470 = vmatmul.bf16.vlgmr.msra.gmra.mxu1 %v410_v30  ;;  %643 = vst [vmem:[#allocation1 + $0x2] ss:$4 sm:$0xff] %v606_v25 }
  0x9e   :  { %v585_v40 = vpop.permute.xlu1 %584  ;;  %v583_v31 = vpop.permute.xlu0 %582 }
  0x9f   :  { %v603_v32 = vsel %vm118_vm0, %v1362_v63, %v585_v40  ;;  %v600_v22 = vsel %vm118_vm0, %v1367_v3, %v583_v31 }
  0xa0   :  { %v175_v35 = vld.sshfl [vmem:[#allocation1 + $0x20] sm:$0xff pattern:$0x73625140]  ;;  %641 = vst [vmem:[#allocation1 + $0x1] ss:$4 sm:$0xff] %v603_v32 }
  0xa1   :  { %639 = vst [vmem:[#allocation1] ss:$4 sm:$0xff] %v600_v22  ;;  %239 = vmatmul.bf16.gmra.mxu0 %v175_v35  ;;  %v833_v3 = vpop.permute.xlu2 %832 }
  0xa2   :  { %405 = vst [vmem:[#allocation1 + $0x21] ss:$4 sm:$0xff] %v371_v33 }
  0xa6   :  { %v347_v37 = vpop.permute.xlu1 %346  ;;  %v589_v38 = vpop.permute.xlu0 %588 }
  0xa7   :  { %v368_v41 = vsel %vm118_vm0, %v1383_v27, %v347_v37  ;;  %v609_v63 = vsel %vm118_vm0, %v1388_v28, %v589_v38  ;;  %v853_v27 = vsel %vm118_vm0, %v1439_v42, %v833_v3 }
  0xa8   :  { %403 = vst [vmem:[#allocation1 + $0x20] ss:$4 sm:$0xff] %v368_v41 }
  0xa9   :  { %645 = vst [vmem:[#allocation1 + $0x3] ss:$4 sm:$0xff] %v609_v63  ;;  %v595_v28 = vpop.permute.xlu2 %594 }
  0xae   :  { %v353_v43 = vpop.permute.xlu1 %352  ;;  %v351_v47 = vpop.permute.xlu0 %350 }
  0xaf   :  { %v377_v39 = vsel %vm118_vm0, %v1404_v52, %v353_v43  ;;  %v374_v46 = vsel %vm118_vm0, %v1409_v53, %v351_v47  ;;  %v618_v53 = vsel %vm118_vm0, %v1467_v18, %v595_v28 }
  0xb0   :  { %409 = vst [vmem:[#allocation1 + $0x23] ss:$4 sm:$0xff] %v377_v39  ;;  %v654_v0 = vld.sshfl [vmem:[#allocation1] sm:$0xff pattern:$0x73625140] }
  0xb1   :  { %407 = vst [vmem:[#allocation1 + $0x22] ss:$4 sm:$0xff] %v374_v46  ;;  %714 = vmatmul.bf16.vlgmr.msra.gmra.mxu2 %v654_v0  ;;  %v837_v59 = vpop.permute.xlu2 %836 }
  0xb2   :  { %883 = vst [vmem:[#allocation1] ss:$4 sm:$0xff] %v844_v44  ;;  %v859_v58 = vsel %vm118_vm0, %v1496_v55, %v837_v59 }
  0xb3   :  { %889 = vst [vmem:[#allocation1 + $0x3] ss:$4 sm:$0xff] %v853_v27 }
  0xb6   :  { %v831_v1 = vpop.permute.xlu1 %830  ;;  %v829_v45 = vpop.permute.xlu0 %828 }
  0xb7   :  { %v850_v15 = vsel %vm118_vm0, %v1425_v19, %v831_v1  ;;  %v847_v52 = vsel %vm118_vm0, %v1430_v20, %v829_v45 }
  0xb8   :  { %887 = vst [vmem:[#allocation1 + $0x2] ss:$4 sm:$0xff] %v850_v15  ;;  %v411_v50 = vld.sshfl [vmem:[#allocation1 + $0x20] sm:$0xff pattern:$0x73625140] }
  0xb9   :  { %885 = vst [vmem:[#allocation1 + $0x1] ss:$4 sm:$0xff] %v847_v52  ;;  %475 = vmatmul.bf16.gmra.mxu1 %v411_v50 }
  0xba   :  { %651 = vst [vmem:[#allocation1 + $0x22] ss:$4 sm:$0xff] %v618_v53 }
  0xbe   :  { %v593_v42 = vpop.permute.xlu1 %592  ;;  %v591_v51 = vpop.permute.xlu0 %590 }
  0xbf   :  { %v615_v54 = vsel %vm118_vm0, %v1446_v48, %v593_v42  ;;  %v612_v56 = vsel %vm118_vm0, %v1451_v49, %v591_v51 }
  0xc0   :  { %649 = vst [vmem:[#allocation1 + $0x21] ss:$4 sm:$0xff] %v615_v54  ;;  %v898_v19 = vld.sshfl [vmem:[#allocation1] sm:$0xff pattern:$0x73625140] }
  0xc1   :  { %647 = vst [vmem:[#allocation1 + $0x20] ss:$4 sm:$0xff] %v612_v56  ;;  %958 = vmatmul.bf16.vlgmr.msra.gmra.mxu3 %v898_v19 }
  0xc6   :  { %v835_v20 = vpop.permute.xlu1 %834  ;;  %v597_v57 = vpop.permute.xlu0 %596 }
  0xc7   :  { %v621_v18 = vsel %vm118_vm0, %v1475_v23, %v597_v57  ;;  %v856_v48 = vsel %vm118_vm0, %v1460_v10, %v835_v20 }
  0xc8   :  { %653 = vst [vmem:[#allocation1 + $0x23] ss:$4 sm:$0xff] %v621_v18 }
  0xce   :  { %v841_v2 = vpop.permute.xlu1 %840  ;;  %v839_v62 = vpop.permute.xlu0 %838 }
  0xcf   :  { %v862_v49 = vsel %vm118_vm0, %v1508_v61, %v839_v62  ;;  %v655_v6 = vld.sshfl [vmem:[#allocation1 + $0x20] sm:$0xff pattern:$0x73625140]  ;;  %v865_v4 = vsel %vm118_vm0, %v1503_v60, %v841_v2 }
  0xd0   :  { %719 = vmatmul.bf16.gmra.mxu2 %v655_v6  ;;  %891 = vst [vmem:[#allocation1 + $0x20] ss:$4 sm:$0xff] %v856_v48  ;;  %v1261_v61 = vld [vmem:[%s1678_s2] ss:$0 sm:$0xff] }
  0xd1   :  { %893 = vst [vmem:[#allocation1 + $0x21] ss:$4 sm:$0xff] %v859_v58 }
  0xd2   :  { %895 = vst [vmem:[#allocation1 + $0x22] ss:$4 sm:$0xff] %v862_v49 }
  0xd3   :  { %897 = vst [vmem:[#allocation1 + $0x23] ss:$4 sm:$0xff] %v865_v4 }
  0xda   :  { %v899_v23 = vld.sshfl [vmem:[#allocation1 + $0x20] sm:$0xff pattern:$0x73625140] }
  0xdb   :  { %963 = vmatmul.bf16.gmra.mxu3 %v899_v23 }
 0x10e   :  { %v235_v5 = vpop.f32.mrf.mxu0 }
 0x116   :  { %v237_v60 = vpop.f32.mrf.mxu0 }
 0x119   :  { %v471_v55 = vpop.f32.mrf.mxu1 }
 0x11a   :  { %v485_v9 = vadd.f32 %v471_v55, %v235_v5 }
 0x11e   :  { %v240_v32 = vpop.f32.mrf.mxu0 }
 0x121   :  { %v473_v14 = vpop.f32.mrf.mxu1 }
 0x122   :  { %v486_v12 = vadd.f32 %v473_v14, %v237_v60 }
 0x126   :  { %v242_v41 = vpop.f32.mrf.mxu0 }
 0x134   :  { %v715_v7 = vpop.f32.mrf.mxu2 }
 0x135   :  { %v729_v10 = vadd.f32 %v715_v7, %v485_v9 }
 0x136   :  { %v476_v31 = vpop.f32.mrf.mxu1 }
 0x137   :  { %v487_v33 = vadd.f32 %v476_v31, %v240_v32 }
 0x13c   :  { %v717_v29 = vpop.f32.mrf.mxu2 }
 0x13d   :  { %v730_v21 = vadd.f32 %v717_v29, %v486_v12 }
 0x13e   :  { %v478_v37 = vpop.f32.mrf.mxu1 }
 0x13f   :  { %v488_v3 = vadd.f32 %v478_v37, %v242_v41 }
 0x144   :  { %v959_v11 = vpop.f32.mrf.mxu3 }
 0x145   :  { %v973_v16 = vadd.f32 %v959_v11, %v729_v10 }
 0x147   :  { %v989_v8 = vadd.f32 %v1261_v61, %v973_v16 }
 0x149   :  { %v997_v24 = vmul.f32 0.01, %v989_v8  ;;  %vm993_vm1 = vcmp.gt.f32.partialorder %v989_v8, 0.0 }
 0x14b   :  { %v1001_v30 = vsel %vm993_vm1, %v989_v8, %v997_v24 }
 0x14c   :  { %v961_v17 = vpop.f32.mrf.mxu3 }
 0x14d   :  { %v974_v13 = vadd.f32 %v961_v17, %v730_v21 }
 0x14f   :  { %v990_v25 = vadd.f32 %v1261_v61, %v974_v13 }
 0x151   :  { %vm994_vm2 = vcmp.gt.f32.partialorder %v990_v25, 0.0  ;;  %v998_v26 = vmul.f32 0.01, %v990_v25 }
 0x153   :  { %v1002_v34 = vsel %vm994_vm2, %v990_v25, %v998_v26  ;;  %v720_v22 = vpop.f32.mrf.mxu2 }
 0x154   :  { %v1252_v40 = vpack.c.bf16 %v1002_v34, %v1001_v30  ;;  %v731_v36 = vadd.f32 %v720_v22, %v487_v33 }
 0x156   :  { %1253 = vst [vmem:[%s1679_s3] sm:$0xff] %v1252_v40  }
 0x15b   :  { %v722_v63 = vpop.f32.mrf.mxu2 }
 0x15c   :  { %v732_v43 = vadd.f32 %v722_v63, %v488_v3 }
 0x15e   :  { %v964_v35 = vpop.f32.mrf.mxu3 }
 0x15f   :  { %v975_v38 = vadd.f32 %v964_v35, %v731_v36 }
 0x161   :  { %v991_v47 = vadd.f32 %v1261_v61, %v975_v38 }
 0x163   :  { %v999_v46 = vmul.f32 0.01, %v991_v47  ;;  %vm995_vm3 = vcmp.gt.f32.partialorder %v991_v47, 0.0 }
 0x165   :  { %v1003_v28 = vsel %vm995_vm3, %v991_v47, %v999_v46 }
 0x166   :  { %v966_v44 = vpop.f32.mrf.mxu3 }
 0x167   :  { %v976_v39 = vadd.f32 %v966_v44, %v732_v43 }
 0x169   :  { %v992_v0 = vadd.f32 %v1261_v61, %v976_v39 }
 0x16b   :  { %vm996_vm4 = vcmp.gt.f32.partialorder %v992_v0, 0.0  ;;  %v1000_v27 = vmul.f32 0.01, %v992_v0 }
 0x16d   :  { %v1004_v1 = vsel %vm996_vm4, %v992_v0, %v1000_v27 }
 0x16e   :  { %v1257_v45 = vpack.c.bf16 %v1004_v1, %v1003_v28 }
 0x170   :  { %1259 = vst [vmem:[%s1679_s3 + $0x8] sm:$0xff] %v1257_v45  }

// kernel: _lambda_.6
= control target key start
LH: loop header
LB: loop body
LE: loop exit
PB: predicated region body
PF: predicated region fallthrough
CT: control target
= control target key end

     0   :  { %s1302_s30 = smov 64   ;;  %vm127_vm0 = vcmask 523264   ;;  %vm160_vm1 = vcmask 1041408   ;;  %s1815_s0 = inlined_call_operand.vmem [shape: bf16[2,1,6,6,64], index: 0, kind: input, shape index: {}]   ;;  %s1816_s1 = inlined_call_operand.vmem [shape: bf16[3,192,128], index: 1, kind: input, shape index: {}]   ;;  %s1817_s2 = inlined_call_operand.vmem [shape: f32[1,128], index: 2, kind: input, shape index: {}]   ;;  %s1818_s3 = inlined_call_operand.vmem [shape: f32[2,16,128], index: 3, kind: output, shape index: {}]  }
   0x1   :  { %v1326_v0 = vld [vmem:[%s1815_s0 + $0x8] sm:$0x7]  ;;  %v1331_v1 = vld [vmem:[%s1815_s0] sm:$0x7]  ;;  %v1336_v2 = vld [vmem:[%s1815_s0 + $0xc] sm:$0x7] }
   0x2   :  { %v33_v3 = vunpack.c.l.b16 %v1326_v0  ;;  %v31_v4 = vunpack.c.l.b16 %v1331_v1  ;;  %v34_v5 = vunpack.c.l.b16 %v1336_v2  ;;  %v1344_v6 = vld [vmem:[%s1815_s0 + $0x4] sm:$0x7]  ;;  %v1361_v12 = vld [vmem:[%s1815_s0 + $0x10] sm:$0x7]  ;;  %v1366_v13 = vld [vmem:[%s1815_s0 + $0xc] sm:$0x7] }
   0x3   :  { %v32_v7 = vunpack.c.l.b16 %v1344_v6  ;;  %v1350_v8 = vld [vmem:[%s1815_s0 + $0x4] sm:$0x7]  ;;  %v360_v20 = vunpack.c.l.b16 %v1361_v12  ;;  %v359_v21 = vunpack.c.l.b16 %v1366_v13  ;;  %v1384_v29 = vld [vmem:[%s1815_s0 + $0x8] sm:$0x7]  ;;  %v1395_v34 = vld [vmem:[%s1815_s0 + $0x20] sm:$0x7] }
   0x4   :  { %v1352_v9 = vpack.c.b16 %v33_v3, %v33_v3  ;;  %v1354_v10 = vpack.c.b16 %v31_v4, %v31_v4  ;;  %v1356_v11 = vpack.c.b16 %v34_v5, %v34_v5  ;;  %v357_v15 = vunpack.c.l.b16 %v1350_v8  ;;  %v1404_v39 = vld [vmem:[%s1815_s0 + $0x18] sm:$0x7]  ;;  %v1409_v40 = vld [vmem:[%s1815_s0 + $0x1c] sm:$0x7]  ;;  %v1430_v59 = vld [vmem:[%s1815_s0 + $0x24] sm:$0x7] }
   0x5   :  { %v1368_v14 = vpack.c.b16 %v32_v7, %v32_v7  ;;  %v1388_v32 = vpack.c.b16 %v360_v20, %v360_v20  ;;  %v1390_v33 = vpack.c.b16 %v359_v21, %v359_v21  ;;  %v358_v41 = vunpack.c.l.b16 %v1384_v29  ;;  %v1440_v63 = vld [vmem:[%s1815_s0 + $0x20] sm:$0x7]  ;;  %v1445_v3 = vld [vmem:[%s1815_s0 + $0x1c] sm:$0x7] }
   0x6   :  { %v62_v16 = vshrl.u32 %v1352_v9, 16  ;;  %v64_v17 = vshll.u32 %v1352_v9, 16  ;;  %v48_v18 = vshrl.u32 %v1354_v10, 16  ;;  %v50_v19 = vshll.u32 %v1354_v10, 16 }
   0x7   :  { %v71_v24 = vshll.u32 %v1356_v11, 16  ;;  %v57_v25 = vshll.u32 %v1368_v14, 16  ;;  %v1379_v28 = vpack.c.b16 %v357_v15, %v357_v15  ;;  %v69_v30 = vshrl.u32 %v1356_v11, 16 }
   0x8   :  { %v66_v22 = vrot.slane %v64_v17, 1  ;;  %v52_v23 = vrot.slane %v50_v19, 1  ;;  %v55_v31 = vshrl.u32 %v1368_v14, 16  ;;  %v37_v43 = vunpack.c.l.b16 %v1395_v34 }
   0x9   :  { %v73_v35 = vrot.slane %v71_v24, 1  ;;  %v59_v36 = vrot.slane %v57_v25, 1  ;;  %v374_v37 = vshrl.u32 %v1379_v28, 16  ;;  %v376_v38 = vshll.u32 %v1379_v28, 16 }
   0xa   :  { %v67_v26 = vor.u32 %v66_v22, %v62_v16  ;;  %v53_v27 = vor.u32 %v52_v23, %v48_v18  ;;  %v397_v44 = vshll.u32 %v1388_v32, 16  ;;  %v390_v45 = vshll.u32 %v1390_v33, 16 }
   0xb   :  { %v378_v42 = vrot.slane %v376_v38, 1  ;;  %v1415_v46 = vpack.c.b16 %v358_v41, %v358_v41  ;;  %v35_v47 = vunpack.c.l.b16 %v1404_v39  ;;  %v74_v48 = vor.u32 %v73_v35, %v69_v30  ;;  %v1468_v35 = vld [vmem:[%s1815_s0 + $0x8] sm:$0x7] }
   0xc   :  { %107 = vrot.lane.b32.xlu1 %v67_v26, %s1302_s30  ;;  %103 = vrot.lane.b32.xlu0 %v53_v27, %s1302_s30  ;;  %v60_v49 = vor.u32 %v59_v36, %v55_v31  ;;  %v36_v51 = vunpack.c.l.b16 %v1409_v40  ;;  %v395_v55 = vshrl.u32 %v1388_v32, 16  ;;  %v399_v56 = vrot.slane %v397_v44, 1  ;;  %v1473_v36 = vld [vmem:[%s1815_s0 + $0x24] sm:$0x7] }
   0xd   :  { %v379_v50 = vor.u32 %v378_v42, %v374_v37  ;;  %v383_v52 = vshll.u32 %v1415_v46, 16  ;;  %v381_v53 = vshrl.u32 %v1415_v46, 16  ;;  %v1422_v54 = vpack.c.b16 %v35_v47, %v35_v47  ;;  %v1478_v37 = vld [vmem:[%s1815_s0 + $0x28] sm:$0x7] }
   0xe   :  { %v1425_v57 = vpack.c.b16 %v37_v43, %v37_v43  ;;  %v388_v60 = vshrl.u32 %v1390_v33, 16  ;;  %v392_v61 = vrot.slane %v390_v45, 1  ;;  %v1435_v62 = vpack.c.b16 %v36_v51, %v36_v51 }
   0xf   :  { %429 = vrot.lane.b32.xlu2 %v379_v50, %s1302_s30  ;;  %v385_v58 = vrot.slane %v383_v52, 1  ;;  %v78_v5 = vshll.u32 %v1422_v54, 16  ;;  %v38_v7 = vunpack.c.l.b16 %v1430_v59  ;;  %v400_v15 = vor.u32 %v399_v56, %v395_v55  ;;  %v1496_v56 = vld [vmem:[%s1815_s0 + $0x14] sm:$0x7] }
  0x10   :  { %v92_v16 = vshll.u32 %v1425_v57, 16  ;;  %v393_v17 = vor.u32 %v392_v61, %v388_v60  ;;  %v85_v18 = vshll.u32 %v1435_v62, 16  ;;  %v362_v19 = vunpack.c.l.b16 %v1440_v63 }
  0x11   :  { %v386_v4 = vor.u32 %v385_v58, %v381_v53  ;;  %v361_v20 = vunpack.c.l.b16 %v1445_v3  ;;  %v76_v21 = vshrl.u32 %v1422_v54, 16  ;;  %v80_v22 = vrot.slane %v78_v5, 1  ;;  %v1506_v5 = vld [vmem:[%s1815_s0 + $0xc] sm:$0x7] }
  0x12   :  { %v1455_v23 = vpack.c.b16 %v38_v7, %v38_v7  ;;  %v90_v24 = vshrl.u32 %v1425_v57, 16  ;;  %v94_v25 = vrot.slane %v92_v16, 1  ;;  %v83_v26 = vshrl.u32 %v1435_v62, 16  ;;  %v1511_v7 = vld [vmem:[%s1815_s0 + $0x10] sm:$0x7] }
  0x13   :  { %v87_v27 = vrot.slane %v85_v18, 1  ;;  %v1461_v30 = vpack.c.b16 %v362_v19, %v362_v19  ;;  %v1463_v31 = vpack.c.b16 %v361_v20, %v361_v20  ;;  %v81_v38 = vor.u32 %v80_v22, %v76_v21 }
  0x14   :  { %109 = vrot.lane.b32.xlu1 %v74_v48, %s1302_s30  ;;  %105 = vrot.lane.b32.xlu0 %v60_v49, %s1302_s30  ;;  %v99_v41 = vshll.u32 %v1455_v23, 16  ;;  %v363_v42 = vunpack.c.l.b16 %v1473_v36  ;;  %v95_v43 = vor.u32 %v94_v25, %v90_v24  ;;  %v690_v44 = vunpack.c.l.b16 %v1468_v35 }
  0x15   :  { %v88_v45 = vor.u32 %v87_v27, %v83_v26  ;;  %v411_v47 = vshll.u32 %v1461_v30, 16  ;;  %v404_v48 = vshll.u32 %v1463_v31, 16  ;;  %v364_v49 = vunpack.c.l.b16 %v1478_v37 }
  0x16   :  { %v97_v50 = vshrl.u32 %v1455_v23, 16  ;;  %v101_v51 = vrot.slane %v99_v41, 1  ;;  %v1488_v52 = vpack.c.b16 %v363_v42, %v363_v42  ;;  %v409_v53 = vshrl.u32 %v1461_v30, 16 }
  0x17   :  { %431 = vrot.lane.b32.xlu2 %v386_v4, %s1302_s30  ;;  %v1491_v55 = vpack.c.b16 %v690_v44, %v690_v44  ;;  %v413_v58 = vrot.slane %v411_v47, 1  ;;  %v402_v60 = vshrl.u32 %v1463_v31, 16  ;;  %v406_v61 = vrot.slane %v404_v48, 1  ;;  %v1532_v44 = vld [vmem:[%s1815_s0 + $0x20] sm:$0x7] }
  0x18   :  { %v1501_v4 = vpack.c.b16 %v364_v49, %v364_v49  ;;  %v418_v16 = vshll.u32 %v1488_v52, 16  ;;  %v693_v19 = vunpack.c.l.b16 %v1496_v56  ;;  %v692_v24 = vunpack.c.l.b16 %v1511_v7 }
  0x19   :  { %v709_v18 = vshll.u32 %v1491_v55, 16  ;;  %v414_v20 = vor.u32 %v413_v58, %v409_v53  ;;  %v407_v21 = vor.u32 %v406_v61, %v402_v60  ;;  %v416_v25 = vshrl.u32 %v1488_v52, 16  ;;  %v1270_v53 = vld [vmem:[%s1816_s1 + $0x30] sm:$0xff] }
  0x1a   :  { %v425_v22 = vshll.u32 %v1501_v4, 16  ;;  %v420_v26 = vrot.slane %v418_v16, 1  ;;  %v707_v41 = vshrl.u32 %v1491_v55, 16  ;;  %v423_v47 = vshrl.u32 %v1501_v4, 16  ;;  %v1282_v58 = vld [vmem:[%s1816_s1 + $0x90] sm:$0xff] }
  0x1b   :  { %v711_v42 = vrot.slane %v709_v18, 1  ;;  %v1540_v49 = vpack.c.b16 %v692_v24, %v692_v24 }
  0x1c   :  { %435 = vrot.lane.b32.xlu1 %v400_v15, %s1302_s30  ;;  %433 = vrot.lane.b32.xlu0 %v393_v17, %s1302_s30  ;;  %v102_v15 = vor.u32 %v101_v51, %v97_v50  ;;  %v691_v17 = vunpack.c.l.b16 %v1506_v5  ;;  %v427_v48 = vrot.slane %v425_v22, 1  ;;  %v1545_v50 = vld [vmem:[%s1815_s0 + $0x28] sm:$0x7]  ;;  %v1550_v51 = vld [vmem:[%s1815_s0 + $0x24] sm:$0x7]  ;;  %v421_v60 = vor.u32 %v420_v26, %v416_v25 }
  0x1d   :  { %1820 = vst [vmem:[#allocation3_spill] sm:$0xff] %v1550_v51  ;;  %v712_v16 = vor.u32 %v711_v42, %v707_v41  ;;  %v1269_v22 = vld [vmem:[%s1816_s1 + $0x28] sm:$0xff]  ;;  %v721_v41 = vshrl.u32 %v1540_v49, 16 }
  0x1e   :  { %v1521_v27 = vpack.c.b16 %v691_v17, %v691_v17  ;;  %v428_v18 = vor.u32 %v427_v48, %v423_v47  ;;  %v1576_v42 = vld [vmem:[%s1815_s0 + $0x2c] sm:$0x7] }
  0x1f   :  { %111 = vrot.lane.b32.xlu2 %v81_v38, %s1302_s30  ;;  %v1271_v38 = vld [vmem:[%s1816_s1 + $0x38] sm:$0xff] }
  0x20   :  { %298 = vmatpush.bf16.msra.mxu0 %v1271_v38  ;;  %v716_v61 = vshll.u32 %v1521_v27, 16  ;;  %v714_v24 = vshrl.u32 %v1521_v27, 16 }
  0x22   :  { %v718_v25 = vrot.slane %v716_v61, 1 }
  0x24   :  { %115 = vrot.lane.b32.xlu1 %v95_v43, %s1302_s30  ;;  %113 = vrot.lane.b32.xlu0 %v88_v45, %s1302_s30  ;;  %v1527_v43 = vpack.c.b16 %v693_v19, %v693_v19  ;;  %v1283_v45 = vld [vmem:[%s1816_s1 + $0x98] sm:$0xff]  ;;  %v723_v19 = vshll.u32 %v1540_v49, 16 }
  0x25   :  { %623 = vmatpush.bf16.msra.mxu2 %v1283_v45  ;;  %299 = vmatpush.bf16.msra.mxu0 %v1270_v53 }
  0x26   :  { %v730_v17 = vshll.u32 %v1527_v43, 16  ;;  %v728_v38 = vshrl.u32 %v1527_v43, 16  ;;  %v725_v47 = vrot.slane %v723_v19, 1 }
  0x27   :  { %117 = vrot.lane.b32.xlu2 %v102_v15, %s1302_s30  ;;  %v694_v15 = vunpack.c.l.b16 %v1532_v44 }
  0x28   :  { %v732_v45 = vrot.slane %v730_v17, 1 }
  0x29   :  { %624 = vmatpush.bf16.msra.mxu2 %v1282_v58  ;;  %v1569_v26 = vpack.c.b16 %v694_v15, %v694_v15  ;;  %300 = vmatpush.bf16.msra.mxu0 %v1269_v22  ;;  %v1268_v58 = vld [vmem:[%s1816_s1 + $0x20] sm:$0xff]  ;;  %v697_v15 = vunpack.c.l.b16 %v1576_v42 }
  0x2b   :  { %v737_v61 = vshll.u32 %v1569_v26, 16  ;;  %v735_v19 = vshrl.u32 %v1569_v26, 16 }
  0x2c   :  { %439 = vrot.lane.b32.xlu1 %v414_v20, %s1302_s30  ;;  %437 = vrot.lane.b32.xlu0 %v407_v21, %s1302_s30  ;;  %v696_v20 = vunpack.c.l.b16 %v1545_v50  ;;  %v695_v21 = vunpack.c.l.b16 %v1550_v51  ;;  %v733_v51 = vor.u32 %v732_v45, %v728_v38 }
  0x2d   :  { %301 = vmatpush.bf16.msra.mxu0 %v1268_v58 }
  0x2e   :  { %v1580_v48 = vpack.c.b16 %v696_v20, %v696_v20  ;;  %v1582_v53 = vpack.c.b16 %v695_v21, %v695_v21  ;;  %v739_v20 = vrot.slane %v737_v61, 1  ;;  %v1593_v21 = vpack.c.b16 %v697_v15, %v697_v15  ;;  %v1267_v15 = vld [vmem:[%s1816_s1 + $0x18] sm:$0xff] }
  0x2f   :  { %441 = vrot.lane.b32.xlu2 %v421_v60, %s1302_s30  ;;  %v719_v60 = vor.u32 %v718_v25, %v714_v24 }
  0x30   :  { %v744_v17 = vshll.u32 %v1582_v53, 16  ;;  %v749_v22 = vshrl.u32 %v1580_v48, 16  ;;  %v742_v25 = vshrl.u32 %v1582_v53, 16  ;;  %v758_v45 = vshll.u32 %v1593_v21, 16 }
  0x31   :  { %302 = vmatpush.bf16.msra.mxu0 %v1267_v15  ;;  %v1285_v15 = vld [vmem:[%s1816_s1 + $0xa8] sm:$0xff] }
  0x32   :  { %v746_v38 = vrot.slane %v744_v17, 1  ;;  %v760_v61 = vrot.slane %v758_v45, 1  ;;  %v1266_v17 = vld [vmem:[%s1816_s1 + $0x10] sm:$0xff]  ;;  %v1264_v45 = vld [vmem:[%s1816_s1] sm:$0xff] }
  0x34   :  { %762 = vrot.lane.b32.xlu1 %v712_v16, %s1302_s30  ;;  %443 = vrot.lane.b32.xlu0 %v428_v18, %s1302_s30  ;;  %v726_v16 = vor.u32 %v725_v47, %v721_v41  ;;  %v751_v18 = vshll.u32 %v1580_v48, 16  ;;  %v740_v41 = vor.u32 %v739_v20, %v735_v19  ;;  %v747_v58 = vor.u32 %v746_v38, %v742_v25  ;;  %v1274_v19 = vld [vmem:[%s1816_s1 + $0x50] sm:$0xff]  ;;  %v1280_v20 = vld [vmem:[%s1816_s1 + $0x80] sm:$0xff] }
  0x35   :  { %303 = vmatpush.bf16.msra.mxu0 %v1266_v17  ;;  %v1279_v25 = vld [vmem:[%s1816_s1 + $0x78] sm:$0xff]  ;;  %v1030_v17 = vrot.slane %v1422_v54, 7 }
  0x36   :  { %v753_v24 = vrot.slane %v751_v18, 1  ;;  %v1281_v18 = vld [vmem:[%s1816_s1 + $0x88] sm:$0xff]  ;;  %v1287_v38 = vld [vmem:[%s1816_s1 + $0xb8] sm:$0xff] }
  0x37   :  { %764 = vrot.lane.b32.xlu2 %v719_v60, %s1302_s30  ;;  %v756_v60 = vshrl.u32 %v1593_v21, 16  ;;  %625 = vmatpush.bf16.msra.mxu2 %v1281_v18  ;;  %v1284_v18 = vld [vmem:[%s1816_s1 + $0xa0] sm:$0xff] }
  0x38   :  { %v754_v47 = vor.u32 %v753_v24, %v749_v22  ;;  %v1265_v22 = vld [vmem:[%s1816_s1 + $0x8] sm:$0xff]  ;;  %646 = vmatpush.bf16.msra.mxu3 %v1287_v38 }
  0x39   :  { %v1273_v24 = vld [vmem:[%s1816_s1 + $0x48] sm:$0xff]  ;;  %304 = vmatpush.bf16.msra.mxu0 %v1265_v22 }
  0x3b   :  { %626 = vmatpush.bf16.msra.mxu2 %v1280_v20  ;;  %v1026_v20 = vrot.slane %v1354_v10, 7 }
  0x3c   :  { %768 = vrot.lane.b32.xlu1 %v733_v51, %s1302_s30  ;;  %766 = vrot.lane.b32.xlu0 %v726_v16, %s1302_s30  ;;  %v761_v51 = vor.u32 %v760_v61, %v756_v60  ;;  %v1275_v16 = vld [vmem:[%s1816_s1 + $0x58] sm:$0xff]  ;;  %v1286_v60 = vld [vmem:[%s1816_s1 + $0xb0] sm:$0xff] }
  0x3d   :  { %321 = vmatpush.bf16.msra.mxu1 %v1275_v16  ;;  %305 = vmatpush.bf16.msra.mxu0 %v1264_v45  ;;  %v1276_v16 = vld [vmem:[%s1816_s1 + $0x60] sm:$0xff] }
  0x3e   :  { %647 = vmatpush.bf16.msra.mxu3 %v1286_v60  ;;  %v1033_v60 = vrot.slane %v1455_v23, 7 }
  0x3f   :  { %770 = vrot.lane.b32.xlu2 %v740_v41, %s1302_s30  ;;  %627 = vmatpush.bf16.msra.mxu2 %v1279_v25 }
  0x41   :  { %322 = vmatpush.bf16.msra.mxu1 %v1274_v19  ;;  %v1028_v19 = vrot.slane %v1352_v9, 7  ;;  %v1294_v9 = vld [vmem:[%s1816_s1 + $0xf0] sm:$0xff] }
  0x42   :  { %648 = vmatpush.bf16.msra.mxu3 %v1285_v15  ;;  %v1027_v15 = vrot.slane %v1368_v14, 7 }
  0x44   :  { %774 = vrot.lane.b32.xlu1 %v754_v47, %s1302_s30  ;;  %772 = vrot.lane.b32.xlu0 %v747_v58, %s1302_s30  ;;  %v1272_v47 = vld [vmem:[%s1816_s1 + $0x40] sm:$0xff]  ;;  %v1278_v58 = vld [vmem:[%s1816_s1 + $0x70] sm:$0xff] }
  0x45   :  { %323 = vmatpush.bf16.msra.mxu1 %v1273_v24  ;;  %628 = vmatpush.bf16.msra.mxu2 %v1278_v58  ;;  %v1295_v24 = vld [vmem:[%s1816_s1 + $0xf8] sm:$0xff] }
  0x46   :  { %649 = vmatpush.bf16.msra.mxu3 %v1284_v18 }
  0x47   :  { %776 = vrot.lane.b32.xlu2 %v761_v51, %s1302_s30  ;;  %v1277_v51 = vld [vmem:[%s1816_s1 + $0x68] sm:$0xff] }
  0x49   :  { %324 = vmatpush.bf16.msra.mxu1 %v1272_v47  ;;  %629 = vmatpush.bf16.msra.mxu2 %v1277_v51  ;;  %v1299_v51 = vld [vmem:[%s1816_s1 + $0x118] sm:$0xff] }
  0x4a   :  { %979 = vmatpush.bf16.msrb.mxu3 %v1299_v51  ;;  %v1031_v51 = vrot.slane %v1435_v62, 7 }
  0x4d   :  { %630 = vmatpush.bf16.msra.mxu2 %v1276_v16  ;;  %956 = vmatpush.bf16.msrb.mxu1 %v1295_v24  ;;  %v1298_v24 = vld [vmem:[%s1816_s1 + $0x110] sm:$0xff] }
  0x4e   :  { %980 = vmatpush.bf16.msrb.mxu3 %v1298_v24 }
  0x51   :  { %957 = vmatpush.bf16.msrb.mxu1 %v1294_v9 }
  0x69   :  { %v1635_v41 = vpop.permute.xlu2 %429 }
  0x71   :  { %v432_v61 = vpop.permute.xlu2 %431 }
  0x79   :  { %v112_v22 = vpop.permute.xlu2 %111 }
  0x7a   :  { %v142_v25 = vsel %vm127_vm0, %v1404_v39, %v112_v22 }
  0x7b   :  { %v170_v54 = vsel %vm160_vm1, %v142_v25, %v1030_v17  ;;  %v1291_v25 = vld [vmem:[%s1816_s1 + $0xd8] sm:$0xff] }
  0x7c   :  { %209 = vst [vmem:[#allocation1 + $0x20] ss:$4 sm:$0xff] %v170_v54  ;;  %v1092_v54 = vrot.slane %v1379_v28, 7  ;;  %v1290_v28 = vld [vmem:[%s1816_s1 + $0xd0] sm:$0xff] }
  0x7e   :  { %v108_v38 = vpop.permute.xlu1 %107  ;;  %v104_v45 = vpop.permute.xlu0 %103 }
  0x7f   :  { %v136_v10 = vsel %vm127_vm0, %v1326_v0, %v108_v38  ;;  %v130_v47 = vsel %vm127_vm0, %v1331_v1, %v104_v45  ;;  %v1293_v0 = vld [vmem:[%s1816_s1 + $0xe8] sm:$0xff]  ;;  %v1029_v1 = vrot.slane %v1356_v11, 7  ;;  %v1095_v45 = vrot.slane %v1388_v32, 7 }
  0x80   :  { %v166_v58 = vsel %vm160_vm1, %v136_v10, %v1028_v19  ;;  %v162_v39 = vsel %vm160_vm1, %v130_v47, %v1026_v20  ;;  %958 = vmatpush.bf16.msrb.mxu1 %v1293_v0  ;;  %v1292_v20 = vld [vmem:[%s1816_s1 + $0xe0] sm:$0xff]  ;;  %v1094_v10 = vrot.slane %v1390_v33, 7 }
  0x81   :  { %205 = vst [vmem:[#allocation1 + $0x2] ss:$4 sm:$0xff] %v166_v58  ;;  %v118_v16 = vpop.permute.xlu2 %117  ;;  %v455_v58 = vsel %vm127_vm0, %v1350_v8, %v1635_v41  ;;  %v1032_v41 = vrot.slane %v1425_v57, 7  ;;  %v1288_v57 = vld [vmem:[%s1816_s1 + $0xc0] sm:$0xff] }
  0x82   :  { %201 = vst [vmem:[#allocation1] ss:$4 sm:$0xff] %v162_v39  ;;  %v151_v18 = vsel %vm127_vm0, %v1430_v59, %v118_v16  ;;  %v1183_v16 = vrot.slane %v1521_v27, 7 }
  0x83   :  { %v176_v19 = vsel %vm160_vm1, %v151_v18, %v1033_v60  ;;  %v486_v60 = vsel %vm160_vm1, %v455_v58, %v1092_v54 }
  0x84   :  { %215 = vst [vmem:[#allocation1 + $0x23] ss:$4 sm:$0xff] %v176_v19  ;;  %959 = vmatpush.bf16.msrb.mxu1 %v1292_v20 }
  0x86   :  { %v110_v17 = vpop.permute.xlu1 %109  ;;  %v106_v23 = vpop.permute.xlu0 %105 }
  0x87   :  { %v139_v22 = vsel %vm127_vm0, %v1336_v2, %v110_v17  ;;  %v133_v11 = vsel %vm127_vm0, %v1344_v6, %v106_v23  ;;  %v1093_v2 = vrot.slane %v1415_v46, 7  ;;  %v458_v6 = vsel %vm127_vm0, %v1384_v29, %v432_v61 }
  0x88   :  { %v168_v14 = vsel %vm160_vm1, %v139_v22, %v1029_v1  ;;  %v164_v59 = vsel %vm160_vm1, %v133_v11, %v1027_v15  ;;  %960 = vmatpush.bf16.msrb.mxu1 %v1291_v25  ;;  %v1098_v11 = vrot.slane %v1488_v52, 7 }
  0x89   :  { %207 = vst [vmem:[#allocation1 + $0x3] ss:$4 sm:$0xff] %v168_v14  ;;  %v442_v38 = vpop.permute.xlu2 %441  ;;  %v488_v46 = vsel %vm160_vm1, %v458_v6, %v1093_v2 }
  0x8a   :  { %203 = vst [vmem:[#allocation1 + $0x1] ss:$4 sm:$0xff] %v164_v59  ;;  %v473_v24 = vsel %vm127_vm0, %v1473_v36, %v442_v38  ;;  %v1099_v36 = vrot.slane %v1501_v4, 7  ;;  %v1186_v4 = vrot.slane %v1569_v26, 7 }
  0x8b   :  { %v498_v52 = vsel %vm160_vm1, %v473_v24, %v1098_v11 }
  0x8c   :  { %961 = vmatpush.bf16.msrb.mxu1 %v1290_v28 }
  0x8e   :  { %v436_v9 = vpop.permute.xlu1 %435  ;;  %v434_v47 = vpop.permute.xlu0 %433 }
  0x8f   :  { %v464_v29 = vsel %vm127_vm0, %v1361_v12, %v436_v9  ;;  %v461_v61 = vsel %vm127_vm0, %v1366_v13, %v434_v47  ;;  %v1297_v12 = vld [vmem:[%s1816_s1 + $0x108] sm:$0xff] }
  0x90   :  { %v492_v39 = vsel %vm160_vm1, %v464_v29, %v1095_v45  ;;  %v490_v8 = vsel %vm160_vm1, %v461_v61, %v1094_v10  ;;  %v1289_v13 = vld [vmem:[%s1816_s1 + $0xc8] sm:$0xff]  ;;  %981 = vmatpush.bf16.msrb.mxu3 %v1297_v12  ;;  %v1185_v29 = vrot.slane %v1527_v43, 7 }
  0x91   :  { %v216_v32 = vld.sshfl [vmem:[#allocation1] sm:$0xff pattern:$0x73625140]  ;;  %v217_v33 = vld.sshfl [vmem:[#allocation1 + $0x8] sm:$0xff pattern:$0x73625140]  ;;  %v765_v0 = vpop.permute.xlu2 %764  ;;  %962 = vmatpush.bf16.msrb.mxu1 %v1289_v13 }
  0x92   :  { %528 = vst [vmem:[#allocation1 + $0x1] ss:$4 sm:$0xff] %v488_v46  ;;  %306 = vmatmul.bf16.vlgmr.msra.gmra.mxu0 %v216_v32  ;;  %1082 = vmatmul.msk.bf16.vlgmr.msra.gmra.mxu1 %vm127_vm0, %v217_v33  ;;  %v791_v23 = vsel %vm127_vm0, %v1506_v5, %v765_v0  ;;  %v1096_v5 = vrot.slane %v1463_v31, 7  ;;  %v1821_v13 = vld [vmem:[#allocation3_spill] sm:$0xff] }
  0x93   :  { %526 = vst [vmem:[#allocation1] ss:$4 sm:$0xff] %v486_v60  ;;  %v821_v27 = vsel %vm160_vm1, %v791_v23, %v1183_v16 }
  0x94   :  { %532 = vst [vmem:[#allocation1 + $0x3] ss:$4 sm:$0xff] %v492_v39 }
  0x95   :  { %530 = vst [vmem:[#allocation1 + $0x2] ss:$4 sm:$0xff] %v490_v8  ;;  %963 = vmatpush.bf16.msrb.mxu1 %v1288_v57 }
  0x96   :  { %v116_v1 = vpop.permute.xlu1 %115  ;;  %v114_v15 = vpop.permute.xlu0 %113 }
  0x97   :  { %v148_v18 = vsel %vm127_vm0, %v1395_v34, %v116_v1  ;;  %v145_v17 = vsel %vm127_vm0, %v1409_v40, %v114_v15  ;;  %v1296_v34 = vld [vmem:[%s1816_s1 + $0x100] sm:$0xff]  ;;  %v1097_v40 = vrot.slane %v1461_v30, 7 }
  0x98   :  { %v174_v62 = vsel %vm160_vm1, %v148_v18, %v1032_v41  ;;  %v172_v19 = vsel %vm160_vm1, %v145_v17, %v1031_v51  ;;  %982 = vmatpush.bf16.msrb.mxu3 %v1296_v34 }
  0x99   :  { %213 = vst [vmem:[#allocation1 + $0x22] ss:$4 sm:$0xff] %v174_v62  ;;  %v771_v54 = vpop.permute.xlu2 %770 }
  0x9a   :  { %211 = vst [vmem:[#allocation1 + $0x21] ss:$4 sm:$0xff] %v172_v19  ;;  %v800_v61 = vsel %vm127_vm0, %v1532_v44, %v771_v54 }
  0x9b   :  { %v827_v39 = vsel %vm160_vm1, %v800_v61, %v1186_v4 }
  0x9c   :  { %v541_v20 = vld.sshfl [vmem:[#allocation1] sm:$0xff pattern:$0x73625140]  ;;  %v542_v22 = vld.sshfl [vmem:[#allocation1 + $0x8] sm:$0xff pattern:$0x73625140] }
  0x9d   :  { %631 = vmatmul.bf16.vlgmr.msra.gmra.mxu2 %v541_v20  ;;  %1172 = vmatmul.msk.bf16.vlgmr.msra.gmra.mxu3 %vm127_vm0, %v542_v22  ;;  %861 = vst [vmem:[#allocation1 + $0x1] ss:$4 sm:$0xff] %v821_v27 }
  0x9e   :  { %v440_v14 = vpop.permute.xlu1 %439  ;;  %v438_v59 = vpop.permute.xlu0 %437 }
  0x9f   :  { %v470_v30 = vsel %vm127_vm0, %v1440_v63, %v440_v14  ;;  %v467_v31 = vsel %vm127_vm0, %v1445_v3, %v438_v59  ;;  %v1182_v63 = vrot.slane %v1491_v55, 7  ;;  %v1184_v55 = vrot.slane %v1540_v49, 7 }
  0xa0   :  { %v496_v25 = vsel %vm160_vm1, %v470_v30, %v1097_v40  ;;  %v494_v2 = vsel %vm160_vm1, %v467_v31, %v1096_v5  ;;  %v1301_v30 = vld [vmem:[%s1817_s2] ss:$0 sm:$0xff] }
  0xa1   :  { %v218_v6 = vld.sshfl [vmem:[#allocation1 + $0x20] sm:$0xff pattern:$0x73625140]  ;;  %v219_v45 = vld.sshfl [vmem:[#allocation1 + $0x28] sm:$0xff pattern:$0x73625140]  ;;  %v777_v46 = vpop.permute.xlu2 %776 }
  0xa2   :  { %536 = vst [vmem:[#allocation1 + $0x21] ss:$4 sm:$0xff] %v496_v25  ;;  %311 = vmatmul.bf16.gmra.mxu0 %v218_v6  ;;  %1083 = vmatmul.msk.bf16.gmra.mxu1 %vm127_vm0, %v219_v45  ;;  %v809_v32 = vsel %vm127_vm0, %v1576_v42, %v777_v46 }
  0xa3   :  { %534 = vst [vmem:[#allocation1 + $0x20] ss:$4 sm:$0xff] %v494_v2 }
  0xa4   :  { %538 = vst [vmem:[#allocation1 + $0x22] ss:$4 sm:$0xff] %v498_v52 }
  0xa6   :  { %v763_v3 = vpop.permute.xlu1 %762  ;;  %v444_v38 = vpop.permute.xlu0 %443 }
  0xa7   :  { %v788_v9 = vsel %vm127_vm0, %v1468_v35, %v763_v3  ;;  %v476_v10 = vsel %vm127_vm0, %v1478_v37, %v444_v38  ;;  %v1189_v35 = vrot.slane %v1593_v21, 7 }
  0xa8   :  { %v819_v47 = vsel %vm160_vm1, %v788_v9, %v1182_v63  ;;  %v500_v58 = vsel %vm160_vm1, %v476_v10, %v1099_v36 }
  0xa9   :  { %859 = vst [vmem:[#allocation1] ss:$4 sm:$0xff] %v819_v47  ;;  %v833_v21 = vsel %vm160_vm1, %v809_v32, %v1189_v35 }
  0xaa   :  { %540 = vst [vmem:[#allocation1 + $0x23] ss:$4 sm:$0xff] %v500_v58 }
  0xae   :  { %v769_v28 = vpop.permute.xlu1 %768  ;;  %v767_v37 = vpop.permute.xlu0 %766 }
  0xaf   :  { %v797_v33 = vsel %vm127_vm0, %v1496_v56, %v769_v28  ;;  %v794_v43 = vsel %vm127_vm0, %v1511_v7, %v767_v37  ;;  %v1188_v56 = vrot.slane %v1580_v48, 7  ;;  %v1187_v7 = vrot.slane %v1582_v53, 7 }
  0xb0   :  { %v825_v49 = vsel %vm160_vm1, %v797_v33, %v1185_v29  ;;  %v823_v26 = vsel %vm160_vm1, %v794_v43, %v1184_v55 }
  0xb1   :  { %865 = vst [vmem:[#allocation1 + $0x3] ss:$4 sm:$0xff] %v825_v49  ;;  %v543_v44 = vld.sshfl [vmem:[#allocation1 + $0x20] sm:$0xff pattern:$0x73625140] }
  0xb2   :  { %863 = vst [vmem:[#allocation1 + $0x2] ss:$4 sm:$0xff] %v823_v26  ;;  %636 = vmatmul.bf16.gmra.mxu2 %v543_v44  ;;  %v544_v60 = vld.sshfl [vmem:[#allocation1 + $0x28] sm:$0xff pattern:$0x73625140] }
  0xb3   :  { %1173 = vmatmul.msk.bf16.gmra.mxu3 %vm127_vm0, %v544_v60  ;;  %867 = vst [vmem:[#allocation1 + $0x20] ss:$4 sm:$0xff] %v827_v39 }
  0xb4   :  { %873 = vst [vmem:[#allocation1 + $0x23] ss:$4 sm:$0xff] %v833_v21 }
  0xb6   :  { %v775_v42 = vpop.permute.xlu1 %774  ;;  %v773_v8 = vpop.permute.xlu0 %772 }
  0xb7   :  { %v806_v12 = vsel %vm127_vm0, %v1545_v50, %v775_v42  ;;  %v803_v41 = vsel %vm127_vm0, %v1821_v13, %v773_v8 }
  0xb8   :  { %v831_v51 = vsel %vm160_vm1, %v806_v12, %v1188_v56  ;;  %v829_v0 = vsel %vm160_vm1, %v803_v41, %v1187_v7 }
  0xb9   :  { %v874_v1 = vld.sshfl [vmem:[#allocation1] sm:$0xff pattern:$0x73625140]  ;;  %871 = vst [vmem:[#allocation1 + $0x22] ss:$4 sm:$0xff] %v831_v51 }
  0xba   :  { %964 = vmatmul.bf16.vlgmr.msrb.gmra.mxu1 %v874_v1  ;;  %869 = vst [vmem:[#allocation1 + $0x21] ss:$4 sm:$0xff] %v829_v0  ;;  %v875_v15 = vld.sshfl [vmem:[#allocation1 + $0x8] sm:$0xff pattern:$0x73625140] }
  0xc1   :  { %v876_v48 = vld.sshfl [vmem:[#allocation1 + $0x20] sm:$0xff pattern:$0x73625140]  ;;  %v877_v53 = vld.sshfl [vmem:[#allocation1 + $0x28] sm:$0xff pattern:$0x73625140] }
  0xc3   :  { %1262 = vmatmul.msk.bf16.vlgmr.msrb.gmra.mxu3 %vm127_vm0, %v875_v15 }
  0xca   :  { %969 = vmatmul.bf16.gmra.mxu1 %v876_v48 }
  0xd3   :  { %1263 = vmatmul.msk.bf16.gmra.mxu3 %vm127_vm0, %v877_v53 }
 0x10f   :  { %v326_v50 = vpop.f32.mrf.mxu1  ;;  %v307_v19 = vpop.f32.mrf.mxu0 }
 0x110   :  { %v327_v20 = vadd.f32 %v326_v50, %v307_v19 }
 0x117   :  { %v328_v16 = vpop.f32.mrf.mxu1  ;;  %v309_v22 = vpop.f32.mrf.mxu0 }
 0x118   :  { %v329_v45 = vadd.f32 %v328_v16, %v309_v22 }
 0x11f   :  { %v331_v17 = vpop.f32.mrf.mxu1  ;;  %v312_v3 = vpop.f32.mrf.mxu0 }
 0x120   :  { %v651_v18 = vpop.f32.mrf.mxu3  ;;  %v632_v27 = vpop.f32.mrf.mxu2  ;;  %v332_v58 = vadd.f32 %v331_v17, %v312_v3 }
 0x121   :  { %v652_v5 = vadd.f32 %v651_v18, %v632_v27 }
 0x123   :  { %v665_v59 = vadd.f32 %v652_v5, %v327_v20 }
 0x127   :  { %v333_v62 = vpop.f32.mrf.mxu1  ;;  %v314_v35 = vpop.f32.mrf.mxu0 }
 0x128   :  { %v653_v23 = vpop.f32.mrf.mxu3  ;;  %v634_v11 = vpop.f32.mrf.mxu2  ;;  %v334_v32 = vadd.f32 %v333_v62, %v314_v35 }
 0x129   :  { %v654_v2 = vadd.f32 %v653_v23, %v634_v11 }
 0x12b   :  { %v666_v63 = vadd.f32 %v654_v2, %v329_v45 }
 0x135   :  { %v637_v52 = vpop.f32.mrf.mxu2 }
 0x136   :  { %v656_v57 = vpop.f32.mrf.mxu3 }
 0x137   :  { %v965_v40 = vpop.f32.mrf.mxu1  ;;  %v657_v9 = vadd.f32 %v656_v57, %v637_v52 }
 0x139   :  { %v667_v29 = vadd.f32 %v657_v9, %v332_v58 }
 0x13d   :  { %v639_v4 = vpop.f32.mrf.mxu2 }
 0x13e   :  { %v658_v34 = vpop.f32.mrf.mxu3 }
 0x13f   :  { %v967_v25 = vpop.f32.mrf.mxu1  ;;  %v659_v28 = vadd.f32 %v658_v34, %v639_v4 }
 0x141   :  { %v668_v49 = vadd.f32 %v659_v28, %v334_v32 }
 0x146   :  { %v984_v14 = vpop.f32.mrf.mxu3 }
 0x147   :  { %v985_v24 = vadd.f32 %v984_v14, %v965_v40  ;;  %v970_v47 = vpop.f32.mrf.mxu1 }
 0x149   :  { %v998_v31 = vadd.f32 %v985_v24, %v665_v59 }
 0x14b   :  { %v1014_v6 = vadd.f32 %v1301_v30, %v998_v31 }
 0x14d   :  { %1018 = vst [vmem:[%s1818_s3] sm:$0xff] %v1014_v6 }
 0x14e   :  { %v986_v54 = vpop.f32.mrf.mxu3 }
 0x14f   :  { %v987_v36 = vadd.f32 %v986_v54, %v967_v25  ;;  %v972_v33 = vpop.f32.mrf.mxu1 }
 0x151   :  { %v999_v38 = vadd.f32 %v987_v36, %v666_v63 }
 0x153   :  { %v1015_v10 = vadd.f32 %v1301_v30, %v999_v38 }
 0x155   :  { %1019 = vst [vmem:[%s1818_s3 + $0x8] sm:$0xff] %v1015_v10 }
 0x156   :  { %v989_v46 = vpop.f32.mrf.mxu3 }
 0x157   :  { %v990_v55 = vadd.f32 %v989_v46, %v970_v47 }
 0x159   :  { %v1000_v61 = vadd.f32 %v990_v55, %v667_v29 }
 0x15b   :  { %v1016_v37 = vadd.f32 %v1301_v30, %v1000_v61 }
 0x15d   :  { %1020 = vst [vmem:[%s1818_s3 + $0x10] sm:$0xff] %v1016_v37 }
 0x15e   :  { %v991_v43 = vpop.f32.mrf.mxu3 }
 0x15f   :  { %v992_v26 = vadd.f32 %v991_v43, %v972_v33 }
 0x161   :  { %v1001_v39 = vadd.f32 %v992_v26, %v668_v49 }
 0x163   :  { %v1017_v44 = vadd.f32 %v1301_v30, %v1001_v39 }
 0x165   :  { %1021 = vst [vmem:[%s1818_s3 + $0x18] sm:$0xff] %v1017_v44 }

// kernel: _lambda_.7
= control target key start
LH: loop header
LB: loop body
LE: loop exit
PB: predicated region body
PF: predicated region fallthrough
CT: control target
= control target key end

     0   :  { %s1355_s16 = smov 64   ;;  %vm55_vm0 = vcmask 523264   ;;  %vm107_vm1 = vcmask 1041409   ;;  %s1713_s0 = inlined_call_operand.vmem [shape: bf16[2,1,4,4,64], index: 0, kind: input, shape index: {}]   ;;  %s1714_s1 = inlined_call_operand.vmem [shape: bf16[4,256,128], index: 1, kind: input, shape index: {}]   ;;  %s1715_s2 = inlined_call_operand.vmem [shape: f32[1,128], index: 2, kind: input, shape index: {}]   ;;  %s1716_s3 = inlined_call_operand.vmem [shape: f32[2,1,128], index: 3, kind: output, shape index: {}]  }
   0x1   :  { %v1379_v0 = vld [vmem:[%s1713_s0 + $0x8] sm:$0x3]  ;;  %v1384_v1 = vld [vmem:[%s1713_s0] sm:$0x3]  ;;  %v1401_v8 = vld [vmem:[%s1713_s0 + $0xa] sm:$0x3] }
   0x2   :  { %21 = vst [vmem:[#allocation1 + $0x20] ss:$4 sm:$0xff] %v1379_v0  ;;  %v1406_v9 = vld [vmem:[%s1713_s0 + $0x2] sm:$0x3]  ;;  %v1424_v22 = vld [vmem:[%s1713_s0 + $0xc] sm:$0x3] }
   0x3   :  { %17 = vst [vmem:[#allocation1] ss:$4 sm:$0xff] %v1384_v1  ;;  %v1429_v23 = vld [vmem:[%s1713_s0 + $0x4] sm:$0x3]  ;;  %v1449_v36 = vld [vmem:[%s1713_s0 + $0xe] sm:$0x3] }
   0x4   :  { %v1296_v37 = vld [vmem:[%s1714_s1 + $0x38] sm:$0xff]  ;;  %v1460_v39 = vld [vmem:[%s1713_s0 + $0x6] sm:$0x3]  ;;  %v1295_v40 = vld [vmem:[%s1714_s1 + $0x30] sm:$0xff] }
   0x5   :  { %v1304_v38 = vld [vmem:[%s1714_s1 + $0x78] sm:$0xff]  ;;  %211 = vmatpush.bf16.msra.mxu0 %v1296_v37  ;;  %v1303_v42 = vld [vmem:[%s1714_s1 + $0x70] sm:$0xff]  ;;  %v1294_v51 = vld [vmem:[%s1714_s1 + $0x28] sm:$0xff] }
   0x6   :  { %224 = vmatpush.bf16.msra.mxu1 %v1304_v38  ;;  %v1312_v43 = vld [vmem:[%s1714_s1 + $0xb8] sm:$0xff]  ;;  %v1311_v47 = vld [vmem:[%s1714_s1 + $0xb0] sm:$0xff]  ;;  %v1302_v52 = vld [vmem:[%s1714_s1 + $0x68] sm:$0xff] }
   0x7   :  { %435 = vmatpush.bf16.msra.mxu2 %v1312_v43  ;;  %v1320_v48 = vld [vmem:[%s1714_s1 + $0xf8] sm:$0xff]  ;;  %v1319_v53 = vld [vmem:[%s1714_s1 + $0xf0] sm:$0xff]  ;;  %v1310_v54 = vld [vmem:[%s1714_s1 + $0xa8] sm:$0xff] }
   0x8   :  { %448 = vmatpush.bf16.msra.mxu3 %v1320_v48  ;;  %v1293_v56 = vld [vmem:[%s1714_s1 + $0x20] sm:$0xff]  ;;  %v1292_v62 = vld [vmem:[%s1714_s1 + $0x18] sm:$0xff]  ;;  %v1315_v37 = vld [vmem:[%s1714_s1 + $0xd0] sm:$0xff] }
   0x9   :  { %v22_v2 = vld.sshfl [vmem:[#allocation1 + $0x20] sm:$0xff pattern:$0x73625140]  ;;  %212 = vmatpush.bf16.msra.mxu0 %v1295_v40  ;;  %v1300_v63 = vld [vmem:[%s1714_s1 + $0x58] sm:$0xff]  ;;  %v1326_v40 = vld [vmem:[%s1714_s1 + $0x128] sm:$0xff] }
   0xa   :  { %v25_v3 = vshrl.u32 %v22_v2, 16  ;;  %35 = vst [vmem:[#allocation1 + $0x20] ss:$4 sm:$0xff] %v1379_v0  ;;  %v18_v4 = vld.sshfl [vmem:[#allocation1] sm:$0xff pattern:$0x73625140]  ;;  %225 = vmatpush.bf16.msra.mxu1 %v1303_v42 }
   0xb   :  { %v23_v5 = vshrl.u32 %v18_v4, 16  ;;  %31 = vst [vmem:[#allocation1] ss:$4 sm:$0xff] %v1384_v1  ;;  %436 = vmatpush.bf16.msra.mxu2 %v1311_v47  ;;  %v1301_v57 = vld [vmem:[%s1714_s1 + $0x60] sm:$0xff]  ;;  %v1299_v4 = vld [vmem:[%s1714_s1 + $0x50] sm:$0xff]  ;;  %v1344_v42 = vld [vmem:[%s1714_s1 + $0x1b8] sm:$0xff] }
   0xc   :  { %29 = vrot.lane.b32.xlu0 %v25_v3, %s1355_s16  ;;  %449 = vmatpush.bf16.msra.mxu3 %v1319_v53  ;;  %v1309_v61 = vld [vmem:[%s1714_s1 + $0xa0] sm:$0xff]  ;;  %v1291_v3 = vld [vmem:[%s1714_s1 + $0x10] sm:$0xff]  ;;  %v1314_v43 = vld [vmem:[%s1714_s1 + $0xc8] sm:$0xff] }
   0xd   :  { %27 = vrot.lane.b32.xlu1 %v23_v5, %s1355_s16  ;;  %213 = vmatpush.bf16.msra.mxu0 %v1294_v51  ;;  %v1305_v38 = vld [vmem:[%s1714_s1 + $0x80] sm:$0xff] }
   0xe   :  { %226 = vmatpush.bf16.msra.mxu1 %v1302_v52  ;;  %v1325_v53 = vld [vmem:[%s1714_s1 + $0x120] sm:$0xff] }
   0xf   :  { %437 = vmatpush.bf16.msra.mxu2 %v1310_v54  ;;  %v1343_v54 = vld [vmem:[%s1714_s1 + $0x1b0] sm:$0xff] }
  0x11   :  { %v1392_v6 = vld.sshfl [vmem:[#allocation1 + $0x20] sm:$0xff pattern:$0x73625140]  ;;  %214 = vmatpush.bf16.msra.mxu0 %v1293_v56  ;;  %v1324_v56 = vld [vmem:[%s1714_s1 + $0x118] sm:$0xff] }
  0x12   :  { %43 = vst [vmem:[#allocation1 + $0x20] ss:$4 sm:$0xff] %v1379_v0  ;;  %v1395_v7 = vld.sshfl [vmem:[#allocation1] sm:$0xff pattern:$0x73625140]  ;;  %227 = vmatpush.bf16.msra.mxu1 %v1301_v57  ;;  %v1332_v57 = vld [vmem:[%s1714_s1 + $0x158] sm:$0xff] }
  0x13   :  { %40 = vst [vmem:[#allocation1] ss:$4 sm:$0xff] %v1384_v1  ;;  %438 = vmatpush.bf16.msra.mxu2 %v1309_v61 }
  0x15   :  { %215 = vmatpush.bf16.msra.mxu0 %v1292_v62 }
  0x16   :  { %228 = vmatpush.bf16.msra.mxu1 %v1300_v63 }
  0x19   :  { %v44_v10 = vld.sshfl [vmem:[#allocation1 + $0x20] sm:$0xff pattern:$0x73625140]  ;;  %216 = vmatpush.bf16.msra.mxu0 %v1291_v3  ;;  %v1331_v3 = vld [vmem:[%s1714_s1 + $0x150] sm:$0xff] }
  0x1a   :  { %v48_v11 = vshrl.u32 %v44_v10, 16  ;;  %246 = vst [vmem:[#allocation1 + $0x20] ss:$4 sm:$0xff] %v1401_v8  ;;  %v41_v12 = vld.sshfl [vmem:[#allocation1] sm:$0xff pattern:$0x73625140]  ;;  %229 = vmatpush.bf16.msra.mxu1 %v1299_v4 }
  0x1b   :  { %v45_v13 = vshrl.u32 %v41_v12, 16  ;;  %242 = vst [vmem:[#allocation1] ss:$4 sm:$0xff] %v1406_v9  ;;  %v1352_v4 = vld [vmem:[%s1714_s1 + $0x1f8] sm:$0xff] }
  0x1c   :  { %v50_v14 = vrot.slane %v48_v11, 1 }
  0x1d   :  { %v47_v15 = vrot.slane %v45_v13, 1  ;;  %v1318_v13 = vld [vmem:[%s1714_s1 + $0xe8] sm:$0xff] }
  0x1e   :  { %53 = vrot.lane.b32.xlu0 %v50_v14, %s1355_s16  ;;  %v1290_v14 = vld [vmem:[%s1714_s1 + $0x8] sm:$0xff]  ;;  %450 = vmatpush.bf16.msra.mxu3 %v1318_v13 }
  0x1f   :  { %51 = vrot.lane.b32.xlu1 %v47_v15, %s1355_s16  ;;  %217 = vmatpush.bf16.msra.mxu0 %v1290_v14 }
  0x21   :  { %v247_v16 = vld.sshfl [vmem:[#allocation1 + $0x20] sm:$0xff pattern:$0x73625140] }
  0x22   :  { %260 = vst [vmem:[#allocation1 + $0x20] ss:$4 sm:$0xff] %v1401_v8  ;;  %v243_v17 = vld.sshfl [vmem:[#allocation1] sm:$0xff pattern:$0x73625140]  ;;  %v250_v21 = vshrl.u32 %v247_v16, 16 }
  0x23   :  { %v248_v18 = vshrl.u32 %v243_v17, 16  ;;  %256 = vst [vmem:[#allocation1] ss:$4 sm:$0xff] %v1406_v9  ;;  %v1298_v16 = vld [vmem:[%s1714_s1 + $0x48] sm:$0xff]  ;;  %v1308_v17 = vld [vmem:[%s1714_s1 + $0x98] sm:$0xff] }
  0x24   :  { %254 = vrot.lane.b32.xlu2 %v250_v21, %s1355_s16  ;;  %v1317_v21 = vld [vmem:[%s1714_s1 + $0xe0] sm:$0xff]  ;;  %230 = vmatpush.bf16.msra.mxu1 %v1298_v16 }
  0x25   :  { %439 = vmatpush.bf16.msra.mxu2 %v1308_v17  ;;  %451 = vmatpush.bf16.msra.mxu3 %v1317_v21 }
  0x26   :  { %252 = vrot.lane.b32.xlu0 %v248_v18, %s1355_s16 }
  0x29   :  { %v1415_v19 = vld.sshfl [vmem:[#allocation1 + $0x20] sm:$0xff pattern:$0x73625140] }
  0x2a   :  { %268 = vst [vmem:[#allocation1 + $0x20] ss:$4 sm:$0xff] %v1401_v8  ;;  %v1418_v20 = vld.sshfl [vmem:[#allocation1] sm:$0xff pattern:$0x73625140] }
  0x2b   :  { %265 = vst [vmem:[#allocation1] ss:$4 sm:$0xff] %v1406_v9 }
  0x31   :  { %v269_v24 = vld.sshfl [vmem:[#allocation1 + $0x20] sm:$0xff pattern:$0x73625140] }
  0x32   :  { %472 = vst [vmem:[#allocation1 + $0x20] ss:$4 sm:$0xff] %v1424_v22  ;;  %v266_v25 = vld.sshfl [vmem:[#allocation1] sm:$0xff pattern:$0x73625140]  ;;  %v273_v28 = vshrl.u32 %v269_v24, 16 }
  0x33   :  { %v270_v26 = vshrl.u32 %v266_v25, 16  ;;  %468 = vst [vmem:[#allocation1] ss:$4 sm:$0xff] %v1429_v23  ;;  %v1289_v24 = vld [vmem:[%s1714_s1] sm:$0xff] }
  0x34   :  { %v275_v29 = vrot.slane %v273_v28, 1  ;;  %v1328_v28 = vld [vmem:[%s1714_s1 + $0x138] sm:$0xff]  ;;  %218 = vmatpush.bf16.msra.mxu0 %v1289_v24 }
  0x35   :  { %v272_v27 = vrot.slane %v270_v26, 1  ;;  %v1297_v26 = vld [vmem:[%s1714_s1 + $0x40] sm:$0xff] }
  0x36   :  { %278 = vrot.lane.b32.xlu2 %v275_v29, %s1355_s16  ;;  %v1336_v29 = vld [vmem:[%s1714_s1 + $0x178] sm:$0xff]  ;;  %231 = vmatpush.bf16.msra.mxu1 %v1297_v26 }
  0x37   :  { %276 = vrot.lane.b32.xlu1 %v272_v27, %s1355_s16  ;;  %v1307_v27 = vld [vmem:[%s1714_s1 + $0x90] sm:$0xff] }
  0x38   :  { %440 = vmatpush.bf16.msra.mxu2 %v1307_v27  ;;  %661 = vmatpush.bf16.msrb.mxu0 %v1328_v28  ;;  %v264_v27 = vrot.slane %v1415_v19, 1  ;;  %v1351_v19 = vld [vmem:[%s1714_s1 + $0x1f0] sm:$0xff] }
  0x39   :  { %v473_v30 = vld.sshfl [vmem:[#allocation1 + $0x20] sm:$0xff pattern:$0x73625140] }
  0x3a   :  { %486 = vst [vmem:[#allocation1 + $0x20] ss:$4 sm:$0xff] %v1424_v22  ;;  %v469_v31 = vld.sshfl [vmem:[#allocation1] sm:$0xff pattern:$0x73625140]  ;;  %v476_v33 = vshrl.u32 %v473_v30, 16  ;;  %674 = vmatpush.bf16.msrb.mxu1 %v1336_v29 }
  0x3b   :  { %v474_v32 = vshrl.u32 %v469_v31, 16  ;;  %482 = vst [vmem:[#allocation1] ss:$4 sm:$0xff] %v1429_v23  ;;  %v1316_v30 = vld [vmem:[%s1714_s1 + $0xd8] sm:$0xff]  ;;  %v1306_v31 = vld [vmem:[%s1714_s1 + $0x88] sm:$0xff] }
  0x3c   :  { %452 = vmatpush.bf16.msra.mxu3 %v1316_v30  ;;  %441 = vmatpush.bf16.msra.mxu2 %v1306_v31  ;;  %v1322_v30 = vld [vmem:[%s1714_s1 + $0x108] sm:$0xff] }
  0x3d   :  { %v1330_v31 = vld [vmem:[%s1714_s1 + $0x148] sm:$0xff] }
  0x3e   :  { %480 = vrot.lane.b32.xlu2 %v476_v33, %s1355_s16  ;;  %v1335_v33 = vld [vmem:[%s1714_s1 + $0x170] sm:$0xff] }
  0x3f   :  { %478 = vrot.lane.b32.xlu1 %v474_v32, %s1355_s16  ;;  %v1327_v32 = vld [vmem:[%s1714_s1 + $0x130] sm:$0xff]  ;;  %675 = vmatpush.bf16.msrb.mxu1 %v1335_v33  ;;  %v1329_v33 = vld [vmem:[%s1714_s1 + $0x140] sm:$0xff] }
  0x40   :  { %662 = vmatpush.bf16.msrb.mxu0 %v1327_v32  ;;  %453 = vmatpush.bf16.msra.mxu3 %v1315_v37  ;;  %v1321_v32 = vld [vmem:[%s1714_s1 + $0x100] sm:$0xff] }
  0x41   :  { %v1439_v34 = vld.sshfl [vmem:[#allocation1 + $0x20] sm:$0xff pattern:$0x73625140]  ;;  %442 = vmatpush.bf16.msra.mxu2 %v1305_v38  ;;  %v1339_v38 = vld [vmem:[%s1714_s1 + $0x190] sm:$0xff] }
  0x42   :  { %494 = vst [vmem:[#allocation1 + $0x20] ss:$4 sm:$0xff] %v1424_v22  ;;  %v1442_v35 = vld.sshfl [vmem:[#allocation1] sm:$0xff pattern:$0x73625140] }
  0x43   :  { %491 = vst [vmem:[#allocation1] ss:$4 sm:$0xff] %v1429_v23 }
  0x44   :  { %663 = vmatpush.bf16.msrb.mxu0 %v1326_v40  ;;  %454 = vmatpush.bf16.msra.mxu3 %v1314_v43  ;;  %v263_v40 = vrot.slane %v1418_v20, 1  ;;  %v1338_v20 = vld [vmem:[%s1714_s1 + $0x188] sm:$0xff] }
  0x45   :  { %887 = vmatpush.bf16.msrb.mxu2 %v1344_v42 }
  0x48   :  { %664 = vmatpush.bf16.msrb.mxu0 %v1325_v53 }
  0x49   :  { %v495_v41 = vld.sshfl [vmem:[#allocation1 + $0x20] sm:$0xff pattern:$0x73625140]  ;;  %888 = vmatpush.bf16.msrb.mxu2 %v1343_v54 }
  0x4a   :  { %v499_v44 = vshrl.u32 %v495_v41, 16  ;;  %v492_v45 = vld.sshfl [vmem:[#allocation1] sm:$0xff pattern:$0x73625140]  ;;  %698 = vst [vmem:[#allocation1 + $0x20] ss:$4 sm:$0xff] %v1449_v36 }
  0x4b   :  { %694 = vst [vmem:[#allocation1] ss:$4 sm:$0xff] %v1460_v39  ;;  %v496_v46 = vshrl.u32 %v492_v45, 16  ;;  %v1334_v41 = vld [vmem:[%s1714_s1 + $0x168] sm:$0xff] }
  0x4c   :  { %v501_v49 = vrot.slane %v499_v44, 1  ;;  %676 = vmatpush.bf16.msrb.mxu1 %v1334_v41  ;;  %665 = vmatpush.bf16.msrb.mxu0 %v1324_v56  ;;  %v1350_v41 = vld [vmem:[%s1714_s1 + $0x1e8] sm:$0xff] }
  0x4d   :  { %v498_v50 = vrot.slane %v496_v46, 1 }
  0x4e   :  { %504 = vrot.lane.b32.xlu0 %v501_v49, %s1355_s16 }
  0x4f   :  { %502 = vrot.lane.b32.xlu2 %v498_v50, %s1355_s16 }
  0x51   :  { %v699_v55 = vld.sshfl [vmem:[#allocation1 + $0x20] sm:$0xff pattern:$0x73625140] }
  0x52   :  { %v695_v58 = vld.sshfl [vmem:[#allocation1] sm:$0xff pattern:$0x73625140]  ;;  %v702_v59 = vshrl.u32 %v699_v55, 16  ;;  %712 = vst [vmem:[#allocation1 + $0x20] ss:$4 sm:$0xff] %v1449_v36 }
  0x53   :  { %708 = vst [vmem:[#allocation1] ss:$4 sm:$0xff] %v1460_v39  ;;  %v700_v60 = vshrl.u32 %v695_v58, 16  ;;  %v39_v55 = vrot.slane %v1392_v6, 1  ;;  %v38_v58 = vrot.slane %v1395_v7, 1  ;;  %v1323_v7 = vld [vmem:[%s1714_s1 + $0x110] sm:$0xff] }
  0x54   :  { %666 = vmatpush.bf16.msrb.mxu0 %v1323_v7 }
  0x56   :  { %706 = vrot.lane.b32.xlu0 %v702_v59, %s1355_s16  ;;  %v1342_v59 = vld [vmem:[%s1714_s1 + $0x1a8] sm:$0xff] }
  0x57   :  { %704 = vrot.lane.b32.xlu2 %v700_v60, %s1355_s16  ;;  %889 = vmatpush.bf16.msrb.mxu2 %v1342_v59 }
  0x58   :  { %667 = vmatpush.bf16.msrb.mxu0 %v1322_v30 }
  0x59   :  { %v1512_v2 = vld.sshfl [vmem:[#allocation1 + $0x20] sm:$0xff pattern:$0x73625140] }
  0x5a   :  { %720 = vst [vmem:[#allocation1 + $0x20] ss:$4 sm:$0xff] %v1449_v36  ;;  %v1521_v5 = vld.sshfl [vmem:[#allocation1] sm:$0xff pattern:$0x73625140] }
  0x5b   :  { %717 = vst [vmem:[#allocation1] ss:$4 sm:$0xff] %v1460_v39 }
  0x5c   :  { %668 = vmatpush.bf16.msrb.mxu0 %v1321_v32 }
  0x61   :  { %v721_v10 = vld.sshfl [vmem:[#allocation1 + $0x20] sm:$0xff pattern:$0x73625140] }
  0x62   :  { %v725_v11 = vshrl.u32 %v721_v10, 16  ;;  %v718_v12 = vld.sshfl [vmem:[#allocation1] sm:$0xff pattern:$0x73625140] }
  0x63   :  { %v722_v15 = vshrl.u32 %v718_v12, 16 }
  0x64   :  { %v727_v18 = vrot.slane %v725_v11, 1  ;;  %v1341_v11 = vld [vmem:[%s1714_s1 + $0x1a0] sm:$0xff] }
  0x65   :  { %v724_v25 = vrot.slane %v722_v15, 1  ;;  %890 = vmatpush.bf16.msrb.mxu2 %v1341_v11 }
  0x66   :  { %730 = vrot.lane.b32.xlu1 %v727_v18, %s1355_s16 }
  0x67   :  { %728 = vrot.lane.b32.xlu0 %v724_v25, %s1355_s16 }
  0x7e   :  { %v30_v44 = vpop.permute.xlu0 %29  ;;  %v255_v60 = vpop.permute.xlu2 %254 }
  0x7f   :  { %v59_v45 = vsel %vm55_vm0, %v1379_v0, %v30_v44  ;;  %v28_v46 = vpop.permute.xlu1 %27  ;;  %v1333_v0 = vld [vmem:[%s1714_s1 + $0x160] sm:$0xff]  ;;  %v283_v61 = vsel %vm55_vm0, %v1401_v8, %v255_v60  ;;  %v489_v60 = vrot.slane %v1442_v35, 1 }
  0x80   :  { %v104_v47 = vunpack.c.l.b16 %v59_v45  ;;  %v57_v48 = vsel %vm55_vm0, %v1384_v1, %v28_v46  ;;  %v1313_v1 = vld [vmem:[%s1714_s1 + $0xc0] sm:$0xff]  ;;  %677 = vmatpush.bf16.msrb.mxu1 %v1333_v0  ;;  %v329_v13 = vunpack.c.l.b16 %v283_v61 }
  0x81   :  { %v102_v49 = vunpack.c.l.b16 %v57_v48  ;;  %455 = vmatpush.bf16.msra.mxu3 %v1313_v1  ;;  %v1349_v48 = vld [vmem:[%s1714_s1 + $0x1e0] sm:$0xff]  ;;  %v1347_v1 = vld [vmem:[%s1714_s1 + $0x1d0] sm:$0xff] }
  0x82   :  { %v106_v50 = vrot.slane %v104_v47, 7  ;;  %v331_v17 = vrot.slane %v329_v13, 7 }
  0x84   :  { %v108_v51 = vsel %vm107_vm1, %v106_v50, %v102_v49  ;;  %678 = vmatpush.bf16.msrb.mxu1 %v1332_v57 }
  0x85   :  { %v111_v52 = vpack.c.b16 %v108_v51, %v108_v51  ;;  %900 = vmatpush.bf16.msrb.mxu3 %v1352_v4  ;;  %v1337_v51 = vld [vmem:[%s1714_s1 + $0x180] sm:$0xff] }
  0x87   :  { %219 = vmatmul.bf16.vlgmr.msra.gmra.mxu0 %v111_v52 }
  0x88   :  { %679 = vmatpush.bf16.msrb.mxu1 %v1331_v3 }
  0x89   :  { %901 = vmatpush.bf16.msrb.mxu3 %v1351_v19 }
  0x8c   :  { %680 = vmatpush.bf16.msrb.mxu1 %v1330_v31 }
  0x8d   :  { %902 = vmatpush.bf16.msrb.mxu3 %v1350_v41 }
  0x90   :  { %v54_v6 = vpop.permute.xlu0 %53  ;;  %v279_v28 = vpop.permute.xlu2 %278  ;;  %681 = vmatpush.bf16.msrb.mxu1 %v1329_v33 }
  0x91   :  { %v65_v62 = vsel %vm55_vm0, %v39_v55, %v54_v6  ;;  %v52_v63 = vpop.permute.xlu1 %51  ;;  %v289_v29 = vsel %vm55_vm0, %v264_v27, %v279_v28  ;;  %903 = vmatpush.bf16.msrb.mxu3 %v1349_v48  ;;  %v490_v6 = vrot.slane %v1439_v34, 1 }
  0x92   :  { %v105_v10 = vunpack.c.l.b16 %v65_v62  ;;  %v62_v8 = vsel %vm55_vm0, %v38_v58, %v52_v63  ;;  %v330_v37 = vunpack.c.l.b16 %v289_v29  ;;  %v1346_v58 = vld [vmem:[%s1714_s1 + $0x1c8] sm:$0xff] }
  0x93   :  { %v103_v12 = vunpack.c.l.b16 %v62_v8 }
  0x94   :  { %v109_v14 = vrot.slane %v105_v10, 7  ;;  %v333_v42 = vrot.slane %v330_v37, 7 }
  0x96   :  { %v110_v15 = vsel %vm107_vm1, %v109_v14, %v103_v12 }
  0x97   :  { %v112_v16 = vpack.c.b16 %v110_v15, %v110_v15 }
  0x98   :  { %v253_v18 = vpop.permute.xlu0 %252  ;;  %v481_v44 = vpop.permute.xlu2 %480 }
  0x99   :  { %v281_v21 = vsel %vm55_vm0, %v1406_v9, %v253_v18  ;;  %232 = vmatmul.bf16.vlgmr.msra.gmra.mxu1 %v112_v16  ;;  %v1340_v9 = vld [vmem:[%s1714_s1 + $0x198] sm:$0xff]  ;;  %v509_v46 = vsel %vm55_vm0, %v1424_v22, %v481_v44  ;;  %v716_v18 = vrot.slane %v1512_v2, 1 }
  0x9a   :  { %v327_v24 = vunpack.c.l.b16 %v281_v21  ;;  %891 = vmatpush.bf16.msrb.mxu2 %v1340_v9  ;;  %v555_v49 = vunpack.c.l.b16 %v509_v46  ;;  %v1348_v22 = vld [vmem:[%s1714_s1 + $0x1d8] sm:$0xff]  ;;  %v715_v21 = vrot.slane %v1521_v5, 1 }
  0x9b   :  { %904 = vmatpush.bf16.msrb.mxu3 %v1348_v22 }
  0x9c   :  { %v332_v25 = vsel %vm107_vm1, %v331_v17, %v327_v24  ;;  %v557_v53 = vrot.slane %v555_v49, 7 }
  0x9d   :  { %v335_v26 = vpack.c.b16 %v332_v25, %v332_v25 }
  0x9e   :  { %892 = vmatpush.bf16.msrb.mxu2 %v1339_v38 }
  0x9f   :  { %443 = vmatmul.bf16.vlgmr.msra.gmra.mxu2 %v335_v26  ;;  %905 = vmatpush.bf16.msrb.mxu3 %v1347_v1 }
  0xa2   :  { %893 = vmatpush.bf16.msrb.mxu2 %v1338_v20 }
  0xa3   :  { %906 = vmatpush.bf16.msrb.mxu3 %v1346_v58 }
  0xa6   :  { %894 = vmatpush.bf16.msrb.mxu2 %v1337_v51 }
  0xa9   :  { %v277_v43 = vpop.permute.xlu1 %276  ;;  %v503_v59 = vpop.permute.xlu2 %502 }
  0xaa   :  { %v286_v45 = vsel %vm55_vm0, %v263_v40, %v277_v43  ;;  %v512_v61 = vsel %vm55_vm0, %v489_v60, %v503_v59 }
  0xab   :  { %v328_v47 = vunpack.c.l.b16 %v286_v45  ;;  %v554_v3 = vunpack.c.l.b16 %v512_v61 }
  0xad   :  { %v334_v50 = vsel %vm107_vm1, %v333_v42, %v328_v47 }
  0xae   :  { %v336_v52 = vpack.c.b16 %v334_v50, %v334_v50 }
  0xb0   :  { %456 = vmatmul.bf16.vlgmr.msra.gmra.mxu3 %v336_v52 }
  0xb1   :  { %v479_v0 = vpop.permute.xlu1 %478  ;;  %v705_v10 = vpop.permute.xlu2 %704 }
  0xb2   :  { %v507_v54 = vsel %vm55_vm0, %v1429_v23, %v479_v0  ;;  %v1345_v23 = vld [vmem:[%s1714_s1 + $0x1c0] sm:$0xff]  ;;  %v733_v35 = vsel %vm55_vm0, %v1460_v39, %v705_v10 }
  0xb3   :  { %v553_v55 = vunpack.c.l.b16 %v507_v54  ;;  %907 = vmatpush.bf16.msrb.mxu3 %v1345_v23  ;;  %v779_v14 = vunpack.c.l.b16 %v733_v35  ;;  %v1354_v54 = vld [vmem:[%s1715_s2] ss:$0 sm:$0xff] }
  0xb5   :  { %v558_v56 = vsel %vm107_vm1, %v557_v53, %v553_v55 }
  0xb6   :  { %v561_v57 = vpack.c.b16 %v558_v56, %v558_v56 }
  0xb8   :  { %669 = vmatmul.bf16.vlgmr.msrb.gmra.mxu0 %v561_v57 }
  0xc0   :  { %v505_v62 = vpop.permute.xlu0 %504 }
  0xc1   :  { %v515_v63 = vsel %vm55_vm0, %v490_v6, %v505_v62 }
  0xc2   :  { %v556_v7 = vunpack.c.l.b16 %v515_v63 }
  0xc4   :  { %v559_v4 = vrot.slane %v556_v7, 7 }
  0xc6   :  { %v560_v8 = vsel %vm107_vm1, %v559_v4, %v554_v3 }
  0xc7   :  { %v562_v11 = vpack.c.b16 %v560_v8, %v560_v8 }
  0xc8   :  { %v707_v12 = vpop.permute.xlu0 %706 }
  0xc9   :  { %v735_v34 = vsel %vm55_vm0, %v1449_v36, %v707_v12  ;;  %682 = vmatmul.bf16.vlgmr.msrb.gmra.mxu1 %v562_v11 }
  0xca   :  { %v781_v13 = vunpack.c.l.b16 %v735_v34 }
  0xcc   :  { %v783_v15 = vrot.slane %v781_v13, 7 }
  0xce   :  { %v784_v16 = vsel %vm107_vm1, %v783_v15, %v779_v14 }
  0xcf   :  { %v787_v17 = vpack.c.b16 %v784_v16, %v784_v16 }
  0xd1   :  { %895 = vmatmul.bf16.vlgmr.msrb.gmra.mxu2 %v787_v17 }
  0xd8   :  { %v731_v24 = vpop.permute.xlu1 %730 }
  0xd9   :  { %v741_v25 = vsel %vm55_vm0, %v716_v18, %v731_v24  ;;  %v729_v39 = vpop.permute.xlu0 %728 }
  0xda   :  { %v782_v26 = vunpack.c.l.b16 %v741_v25  ;;  %v738_v27 = vsel %vm55_vm0, %v715_v21, %v729_v39 }
  0xdb   :  { %v780_v36 = vunpack.c.l.b16 %v738_v27 }
  0xdc   :  { %v785_v28 = vrot.slane %v782_v26, 7 }
  0xde   :  { %v786_v29 = vsel %vm107_vm1, %v785_v28, %v780_v36 }
  0xdf   :  { %v788_v30 = vpack.c.b16 %v786_v29, %v786_v29 }
  0xe1   :  { %908 = vmatmul.bf16.vlgmr.msrb.gmra.mxu3 %v788_v30 }
 0x104   :  { %v220_v31 = vpop.f32.mrf.mxu0 }
 0x10c   :  { %v222_v9 = vpop.f32.mrf.mxu0 }
 0x116   :  { %v233_v19 = vpop.f32.mrf.mxu1 }
 0x117   :  { %v234_v32 = vadd.f32 %v233_v19, %v220_v31 }
 0x119   :  { %237 = vst [vmem:[#allocation2] sm:$0x3] %v234_v32 }
 0x11e   :  { %v235_v2 = vpop.f32.mrf.mxu1 }
 0x120   :  { %v461_v38 = vld [vmem:[#allocation2] sm:$0x3] }
 0x122   :  { %v444_v5 = vpop.f32.mrf.mxu2 }
 0x12a   :  { %v446_v33 = vpop.f32.mrf.mxu2 }
 0x133   :  { %v457_v37 = vpop.f32.mrf.mxu3 }
 0x134   :  { %v458_v40 = vadd.f32 %v457_v37, %v444_v5 }
 0x135   :  { %v670_v41 = vpop.f32.mrf.mxu0 }
 0x136   :  { %v462_v42 = vadd.f32 %v461_v38, %v458_v40 }
 0x138   :  { %463 = vst [vmem:[#allocation2] sm:$0x3] %v462_v42 }
 0x13b   :  { %v459_v43 = vpop.f32.mrf.mxu3 }
 0x13d   :  { %v672_v44 = vpop.f32.mrf.mxu0 }
 0x13f   :  { %v687_v46 = vld [vmem:[#allocation2] sm:$0x3] }
 0x146   :  { %v683_v45 = vpop.f32.mrf.mxu1 }
 0x147   :  { %v684_v20 = vadd.f32 %v683_v45, %v670_v41 }
 0x149   :  { %v688_v47 = vadd.f32 %v687_v46, %v684_v20 }
 0x14b   :  { %689 = vst [vmem:[#allocation2] sm:$0x3] %v688_v47 }
 0x14e   :  { %v685_v48 = vpop.f32.mrf.mxu1 }
 0x152   :  { %v913_v22 = vld [vmem:[#allocation2] sm:$0x3] }
 0x154   :  { %v896_v49 = vpop.f32.mrf.mxu2 }
 0x15c   :  { %v898_v50 = vpop.f32.mrf.mxu2 }
 0x164   :  { %v909_v51 = vpop.f32.mrf.mxu3 }
 0x165   :  { %v910_v52 = vadd.f32 %v909_v51, %v896_v49 }
 0x167   :  { %v914_v53 = vadd.f32 %v913_v22, %v910_v52 }
 0x169   :  { %915 = vst [vmem:[#allocation2] sm:$0x3] %v914_v53 }
 0x16c   :  { %v911_v0 = vpop.f32.mrf.mxu3 }
 0x170   :  { %v916_v1 = vld [vmem:[#allocation2] sm:$0x3] }
 0x171   :  { %v921_v55 = vadd.f32 %v1354_v54, %v916_v1 }
 0x173   :  { %v923_v56 = vrot.slane %v921_v55, 1  ;;  %925 = vst [vmem:[%s1716_s3] sm:$0x1] %v921_v55 }
 0x175   :  { %926 = vst [vmem:[%s1716_s3 + $0x1] sm:$0x1] %v923_v56 }

</bundles_post_ra>
